<compile_context>
chip_gen: v5e
topology: v5e:2x2
jax: 0.10.0
libtpu: 0.0.40
codegen_flags: <defaults>
</compile_context>

<pallas_src>
import jax
import jax.numpy as jnp
from jax import lax
from jax.experimental import pallas as pl
from jax.experimental.pallas import tpu as pltpu


def bottleneck_kernel(x_ref, w1_ref, b1_ref, w2_ref, b2_ref, w3_ref, b3_ref,
                      o_ref, im_ref):
    # x_ref: (BB, H, W, Cin) VMEM tile.  im_ref: (BB, H+2, W, 3P) bf16 scratch.
    BB, H, W, Cin = x_ref.shape
    P = w1_ref.shape[1]          # planes
    Cout = w3_ref.shape[1]       # planes * 4 == Cin (no-downsample path)
    M = BB * H * W
    K2 = 3 * P

    # ---- conv1 (1x1, BN-scale folded) + bias + relu ---------------------
    x2d = x_ref[...].reshape(M, Cin)                       # f32, free reshape
    h1 = jnp.dot(x2d.astype(jnp.bfloat16), w1_ref[...],
                 preferred_element_type=jnp.float32)       # (M, P) f32
    h1 = jnp.maximum(h1 + b1_ref[...], 0.0)

    # ---- conv2 (3x3, stride=1, pad=1, BN-scale folded) + bias + relu ----
    # dx shifts: XLU roll along W + a small (1, W, P) boundary mask.  The
    # three dx taps are cast to bf16 *before* concatenation so the padded
    # im2col intermediate is half width; it is written once into the bf16
    # VMEM scratch (halo rows zeroed every step) and each ky dot reads a
    # windowed slice directly from the scratch ref.
    h1_3d = h1.reshape(BB * H, W, P)                       # f32
    col = lax.broadcasted_iota(jnp.int32, (1, W, P), 1)    # small, broadcast
    left = jnp.where(col == 0, 0.0,
                     pltpu.roll(h1_3d, shift=1, axis=1))       # h1[., x-1, .]
    right = jnp.where(col == W - 1, 0.0,
                      pltpu.roll(h1_3d, shift=W - 1, axis=1))  # h1[., x+1, .]
    cat = jnp.concatenate([left.astype(jnp.bfloat16),
                           h1_3d.astype(jnp.bfloat16),
                           right.astype(jnp.bfloat16)],
                          axis=-1)                         # (BB*H, W, 3P) bf16

    zrow = jnp.zeros((BB, 1, W, K2), jnp.bfloat16)
    im_ref[:, 0:1] = zrow                                  # top halo row
    im_ref[:, H + 1:H + 2] = zrow                          # bottom halo row
    im_ref[:, 1:H + 1] = cat.reshape(BB, H, W, K2)         # interior, once

    w2 = w2_ref[...]                                       # (3, 3P, P) bf16
    h2 = (jnp.dot(im_ref[:, 0:H].reshape(M, K2), w2[0],
                  preferred_element_type=jnp.float32)
          + jnp.dot(im_ref[:, 1:H + 1].reshape(M, K2), w2[1],
                    preferred_element_type=jnp.float32)
          + jnp.dot(im_ref[:, 2:H + 2].reshape(M, K2), w2[2],
                    preferred_element_type=jnp.float32))   # chained, no zeros
    h2 = jnp.maximum(h2 + b2_ref[...], 0.0)                # (M, P) f32

    # ---- conv3 (1x1, BN-scale folded) + bias + residual + relu ----------
    h3 = jnp.dot(h2.astype(jnp.bfloat16), w3_ref[...],
                 preferred_element_type=jnp.float32)       # (M, Cout) f32
    h3 = h3 + b3_ref[...]
    res = x_ref[...].reshape(M, Cin)                       # re-read residual
    out = jnp.maximum(h3 + res, 0.0)
    o_ref[...] = out.reshape(BB, H, W, Cout).astype(o_ref.dtype)


def pack_params(w1, s1, b1, w2_hwio, s2, b2, w3, s3, b3):
    """Fold eval-mode BN scales into the conv weights (host side), cast the
    matmul weights to bf16, keep per-channel biases in f32.

    w1: (Cin, P)   w2_hwio: (3, 3, P, P)   w3: (P, Cout)
    sX/bX: folded BN scale/bias vectors (C,).
    Returns (w1f, b1, w2f, b2, w3f, b3) with w2f shaped (3, 3P, P):
    w2f[ky, kx*P + i, o] == (w2_hwio * s2)[ky, kx, i, o].
    """
    P = w1.shape[1]
    Cout = w3.shape[1]
    w1f = (w1 * s1[None, :]).astype(jnp.bfloat16)
    w2f = (w2_hwio * s2[None, None, None, :]).reshape(3, 3 * P, P)
    w2f = w2f.astype(jnp.bfloat16)
    w3f = (w3 * s3[None, :]).astype(jnp.bfloat16)
    return (w1f, b1.reshape(1, P).astype(jnp.float32),
            w2f, b2.reshape(1, P).astype(jnp.float32),
            w3f, b3.reshape(1, Cout).astype(jnp.float32))


def _vmem_limit_bytes():
    # Per-generation VMEM budget: ~3/4 of physical, capped at 96 MiB
    # (v5e/v6e 128 MiB -> 96 MiB, v7x 64 MiB -> 48 MiB).
    try:
        phys = int(pltpu.get_tpu_info().vmem_capacity_bytes)
    except Exception:
        phys = 64 * 1024 * 1024
    return min(phys * 3 // 4, 96 * 1024 * 1024)


def _pick_batch_block(N, H, W, target_m=512):
    # Largest batch block with M = BB*H*W <= target while keeping the grid
    # length >= 2 so ("parallel",) can shard across both v7x TensorCores.
    bb = 1
    for cand in range(1, N + 1):
        if N % cand:
            continue
        if N >= 2 and N // cand < 2:
            continue
        if cand * H * W <= target_m:
            bb = cand
    return bb


def bottleneck_forward(x, packed, *, batch_block=None):
    N, H, W, Cin = x.shape
    w1f, b1, w2f, b2, w3f, b3 = packed
    P = w1f.shape[1]
    Cout = w3f.shape[1]
    assert Cout == Cin, "downsample=None path requires inplanes == planes*4"
    BB = batch_block if batch_block is not None else _pick_batch_block(N, H, W)
    assert N % BB == 0

    def build(single_buffer_weights):
        def const_spec(a):
            nd = a.ndim
            if single_buffer_weights:
                return pl.BlockSpec(a.shape, lambda n, _nd=nd: (0,) * _nd,
                                    pipeline_mode=pl.Buffered(1))
            return pl.BlockSpec(a.shape, lambda n, _nd=nd: (0,) * _nd)

        in_specs = [pl.BlockSpec((BB, H, W, Cin), lambda n: (n, 0, 0, 0))]
        in_specs += [const_spec(a) for a in packed]
        out_spec = pl.BlockSpec((BB, H, W, Cout), lambda n: (n, 0, 0, 0))

        return pl.pallas_call(
            bottleneck_kernel,
            out_shape=jax.ShapeDtypeStruct((N, H, W, Cout), x.dtype),
            grid=(N // BB,),
            in_specs=in_specs,
            out_specs=out_spec,
            scratch_shapes=[pltpu.VMEM((BB, H + 2, W, 3 * P), jnp.bfloat16)],
            compiler_params=pltpu.CompilerParams(
                dimension_semantics=("parallel",),
                vmem_limit_bytes=_vmem_limit_bytes()),
        )

    try:
        return build(True)(x, *packed)
    except Exception:
        # Fallback if single-buffered (pl.Buffered(1)) constant specs are
        # unsupported on this JAX/Mosaic version.
        return build(False)(x, *packed)


def ref_forward(x, packed):
    """Pure-JAX reference mirroring the kernel's precision contract:
    bf16 conv operands (BN scale already folded into the weights) with f32
    accumulation, f32 bias/ReLU/residual -- i.e. the PyTorch Bottleneck
    forward in eval mode, up to bf16 operand quantization."""
    w1f, b1, w2f, b2, w3f, b3 = packed
    Cin = x.shape[-1]
    P = w1f.shape[1]
    Cout = w3f.shape[1]
    dn = ("NHWC", "HWIO", "NHWC")

    o = lax.conv_general_dilated(
        x.astype(jnp.bfloat16), w1f.reshape(1, 1, Cin, P), (1, 1), "VALID",
        dimension_numbers=dn, preferred_element_type=jnp.float32)
    o = jnp.maximum(o + b1.reshape(1, 1, 1, -1), 0.0)

    w2_hwio = w2f.reshape(3, 3, P, P)
    o = lax.conv_general_dilated(
        o.astype(jnp.bfloat16), w2_hwio, (1, 1), "SAME",
        dimension_numbers=dn, preferred_element_type=jnp.float32)
    o = jnp.maximum(o + b2.reshape(1, 1, 1, -1), 0.0)

    o = lax.conv_general_dilated(
        o.astype(jnp.bfloat16), w3f.reshape(1, 1, P, Cout), (1, 1), "VALID",
        dimension_numbers=dn, preferred_element_type=jnp.float32)
    o = o + b3.reshape(1, 1, 1, -1)
    return jnp.maximum(o + x.astype(jnp.float32), 0.0)


if __name__ == "__main__":
    key = jax.random.PRNGKey(0)
    N, H, W = 8, 8, 8             # grid=(2,) with BB=4 -> M=256 per step
    planes = 32                   # P
    inplanes = planes * 4         # 128 -> lane-dense channels, residual valid

    ks = jax.random.split(key, 8)
    x = jax.random.normal(ks[0], (N, H, W, inplanes), jnp.float32)

    def bn_params(k, c):
        k1, k2, k3, k4 = jax.random.split(k, 4)
        gamma = 1.0 + 0.1 * jax.random.normal(k1, (c,), jnp.float32)
        beta = 0.1 * jax.random.normal(k2, (c,), jnp.float32)
        mean = 0.1 * jax.random.normal(k3, (c,), jnp.float32)
        var = jnp.abs(jax.random.normal(k4, (c,), jnp.float32)) + 0.5
        eps = 1e-5
        scale = gamma / jnp.sqrt(var + eps)
        bias = beta - mean * scale
        return scale, bias

    w1 = 0.1 * jax.random.normal(ks[1], (inplanes, planes), jnp.float32)
    s1, b1 = bn_params(ks[2], planes)
    w2_hwio = 0.1 * jax.random.normal(ks[3], (3, 3, planes, planes),
                                      jnp.float32)
    s2, b2 = bn_params(ks[4], planes)
    w3 = 0.1 * jax.random.normal(ks[5], (planes, planes * 4), jnp.float32)
    s3, b3 = bn_params(ks[6], planes * 4)

    packed = pack_params(w1, s1, b1, w2_hwio, s2, b2, w3, s3, b3)

    out = bottleneck_forward(x, packed)
    out = jax.block_until_ready(out)

    ref = ref_forward(x, packed)
    err = float(jnp.max(jnp.abs(out - ref)))
    assert jnp.allclose(out, ref, atol=2e-2, rtol=2e-2), f"max abs err {err}"
    print("KERNEL_OK")
</pallas_src>

<mosaic_0001>
module attributes {stable_mosaic.version = 11 : i64} {
  func.func @bottleneck_kernel(%arg0: i32, %arg1: memref<4x8x8x128xf32, #tpu.memory_space<vmem>>, %arg2: memref<128x32xbf16, #tpu.memory_space<vmem>>, %arg3: memref<1x32xf32, #tpu.memory_space<vmem>>, %arg4: memref<3x96x32xbf16, #tpu.memory_space<vmem>>, %arg5: memref<1x32xf32, #tpu.memory_space<vmem>>, %arg6: memref<32x128xbf16, #tpu.memory_space<vmem>>, %arg7: memref<1x128xf32, #tpu.memory_space<vmem>>, %arg8: memref<4x8x8x128xf32, #tpu.memory_space<vmem>>, %arg9: memref<4x10x8x96xbf16, #tpu.memory_space<vmem>>) attributes {dimension_semantics = [#tpu.dimension_semantics<parallel>], iteration_bounds = array<i64: 2>, scalar_prefetch = 0 : i64, scratch_operands = 1 : i64, tpu.core_type = #tpu.core_type<tc>, window_params = [{transform_indices = @transform_0, window_bounds = array<i64: 4, 8, 8, 128>}, {pipeline_mode = #tpu.pipeline_mode<synchronous>, transform_indices = @transform_1, window_bounds = array<i64: 128, 32>}, {pipeline_mode = #tpu.pipeline_mode<synchronous>, transform_indices = @transform_2, window_bounds = array<i64: 1, 32>}, {pipeline_mode = #tpu.pipeline_mode<synchronous>, transform_indices = @transform_3, window_bounds = array<i64: 3, 96, 32>}, {pipeline_mode = #tpu.pipeline_mode<synchronous>, transform_indices = @transform_4, window_bounds = array<i64: 1, 32>}, {pipeline_mode = #tpu.pipeline_mode<synchronous>, transform_indices = @transform_5, window_bounds = array<i64: 32, 128>}, {pipeline_mode = #tpu.pipeline_mode<synchronous>, transform_indices = @transform_6, window_bounds = array<i64: 1, 128>}, {transform_indices = @transform_7, window_bounds = array<i64: 4, 8, 8, 128>}]} {
    %c0 = arith.constant 0 : index
    %c0_0 = arith.constant 0 : index
    %c0_1 = arith.constant 0 : index
    %c0_2 = arith.constant 0 : index
    %0 = vector.load %arg1[%c0, %c0_0, %c0_1, %c0_2] : memref<4x8x8x128xf32, #tpu.memory_space<vmem>>, vector<4x8x8x128xf32>
    %1 = vector.shape_cast %0 : vector<4x8x8x128xf32> to vector<256x128xf32>
    %2 = arith.truncf %1 : vector<256x128xf32> to vector<256x128xbf16>
    %c0_3 = arith.constant 0 : index
    %c0_4 = arith.constant 0 : index
    %3 = vector.load %arg2[%c0_3, %c0_4] : memref<128x32xbf16, #tpu.memory_space<vmem>>, vector<128x32xbf16>
    %cst = arith.constant dense<0.000000e+00> : vector<256x32xf32>
    %4 = tpu.matmul %2, %3, %cst {dimension_numbers = #tpu.dot_dimension_numbers<[1], [0], [0], [1], [0, 0, 1, 1], [], []>} : vector<256x128xbf16>, vector<128x32xbf16>, vector<256x32xf32> -> vector<256x32xf32>
    %c0_5 = arith.constant 0 : index
    %c0_6 = arith.constant 0 : index
    %5 = vector.load %arg3[%c0_5, %c0_6] : memref<1x32xf32, #tpu.memory_space<vmem>>, vector<1x32xf32>
    %6 = vector.broadcast %5 : vector<1x32xf32> to vector<256x32xf32>
    %7 = arith.addf %4, %6 : vector<256x32xf32>
    %cst_7 = arith.constant 0.000000e+00 : f32
    %8 = vector.broadcast %cst_7 : f32 to vector<256x32xf32>
    %9 = arith.maximumf %7, %8 : vector<256x32xf32>
    %10 = vector.shape_cast %9 : vector<256x32xf32> to vector<32x8x32xf32>
    %11 = tpu.iota {dimensions = array<i32: 1>} : vector<1x8x32xi32>
    %c0_i32 = arith.constant 0 : i32
    %12 = vector.broadcast %c0_i32 : i32 to vector<1x8x32xi32>
    %13 = arith.cmpi eq, %11, %12 : vector<1x8x32xi32>
    %c1_i32 = arith.constant 1 : i32
    %14 = tpu.dynamic_rotate %10 by %c1_i32 dim 1 : vector<32x8x32xf32>, i32 -> vector<32x8x32xf32>
    %cst_8 = arith.constant 0.000000e+00 : f32
    %15 = vector.shape_cast %13 : vector<1x8x32xi1> to vector<1x8x32xi1>
    %16 = vector.broadcast %15 : vector<1x8x32xi1> to vector<32x8x32xi1>
    %17 = vector.broadcast %cst_8 : f32 to vector<32x8x32xf32>
    %18 = arith.select %16, %17, %14 : vector<32x8x32xi1>, vector<32x8x32xf32>
    %c7_i32 = arith.constant 7 : i32
    %19 = vector.broadcast %c7_i32 : i32 to vector<1x8x32xi32>
    %20 = arith.cmpi eq, %11, %19 : vector<1x8x32xi32>
    %c7_i32_9 = arith.constant 7 : i32
    %21 = tpu.dynamic_rotate %10 by %c7_i32_9 dim 1 : vector<32x8x32xf32>, i32 -> vector<32x8x32xf32>
    %cst_10 = arith.constant 0.000000e+00 : f32
    %22 = vector.shape_cast %20 : vector<1x8x32xi1> to vector<1x8x32xi1>
    %23 = vector.broadcast %22 : vector<1x8x32xi1> to vector<32x8x32xi1>
    %24 = vector.broadcast %cst_10 : f32 to vector<32x8x32xf32>
    %25 = arith.select %23, %24, %21 : vector<32x8x32xi1>, vector<32x8x32xf32>
    %26 = arith.truncf %18 : vector<32x8x32xf32> to vector<32x8x32xbf16>
    %27 = arith.truncf %10 : vector<32x8x32xf32> to vector<32x8x32xbf16>
    %28 = arith.truncf %25 : vector<32x8x32xf32> to vector<32x8x32xbf16>
    %29 = tpu.concatenate %26, %27, %28 in 2 : vector<32x8x32xbf16>, vector<32x8x32xbf16>, vector<32x8x32xbf16> -> vector<32x8x96xbf16>
    %cst_11 = arith.constant 0.000000e+00 : bf16
    %30 = vector.broadcast %cst_11 : bf16 to vector<4x1x8x96xbf16>
    %c0_12 = arith.constant 0 : index
    %c0_13 = arith.constant 0 : index
    %c0_14 = arith.constant 0 : index
    %c0_15 = arith.constant 0 : index
    %31 = vector.load %arg9[%c0_12, %c0_13, %c0_14, %c0_15] : memref<4x10x8x96xbf16, #tpu.memory_space<vmem>>, vector<4x1x8x96xbf16>
    tpu.vector_store %arg9[%c0_12, %c0_13, %c0_14, %c0_15], %30 {strides = array<i32>} : memref<4x10x8x96xbf16, #tpu.memory_space<vmem>>, vector<4x1x8x96xbf16>,
    %c0_16 = arith.constant 0 : index
    %c9 = arith.constant 9 : index
    %c0_17 = arith.constant 0 : index
    %c0_18 = arith.constant 0 : index
    %32 = vector.load %arg9[%c0_16, %c9, %c0_17, %c0_18] : memref<4x10x8x96xbf16, #tpu.memory_space<vmem>>, vector<4x1x8x96xbf16>
    tpu.vector_store %arg9[%c0_16, %c9, %c0_17, %c0_18], %30 {strides = array<i32>} : memref<4x10x8x96xbf16, #tpu.memory_space<vmem>>, vector<4x1x8x96xbf16>,
    %33 = vector.shape_cast %29 : vector<32x8x96xbf16> to vector<4x8x8x96xbf16>
    %c0_19 = arith.constant 0 : index
    %c1 = arith.constant 1 : index
    %c0_20 = arith.constant 0 : index
    %c0_21 = arith.constant 0 : index
    %34 = vector.load %arg9[%c0_19, %c1, %c0_20, %c0_21] : memref<4x10x8x96xbf16, #tpu.memory_space<vmem>>, vector<4x8x8x96xbf16>
    tpu.vector_store %arg9[%c0_19, %c1, %c0_20, %c0_21], %33 {strides = array<i32>} : memref<4x10x8x96xbf16, #tpu.memory_space<vmem>>, vector<4x8x8x96xbf16>,
    %c0_22 = arith.constant 0 : index
    %c0_23 = arith.constant 0 : index
    %c0_24 = arith.constant 0 : index
    %35 = vector.load %arg4[%c0_22, %c0_23, %c0_24] : memref<3x96x32xbf16, #tpu.memory_space<vmem>>, vector<3x96x32xbf16>
    %c0_25 = arith.constant 0 : index
    %c0_26 = arith.constant 0 : index
    %c0_27 = arith.constant 0 : index
    %c0_28 = arith.constant 0 : index
    %36 = vector.load %arg9[%c0_25, %c0_26, %c0_27, %c0_28] : memref<4x10x8x96xbf16, #tpu.memory_space<vmem>>, vector<4x8x8x96xbf16>
    %37 = vector.shape_cast %36 : vector<4x8x8x96xbf16> to vector<256x96xbf16>
    %38 = vector.extract_strided_slice %35 {offsets = [0, 0, 0], sizes = [1, 96, 32], strides = [1, 1, 1]} : vector<3x96x32xbf16> to vector<1x96x32xbf16>
    %39 = vector.shape_cast %38 : vector<1x96x32xbf16> to vector<96x32xbf16>
    %cst_29 = arith.constant dense<0.000000e+00> : vector<256x32xf32>
    %40 = tpu.matmul %37, %39, %cst_29 {dimension_numbers = #tpu.dot_dimension_numbers<[1], [0], [0], [1], [0, 0, 1, 1], [], []>} : vector<256x96xbf16>, vector<96x32xbf16>, vector<256x32xf32> -> vector<256x32xf32>
    %c0_30 = arith.constant 0 : index
    %c1_31 = arith.constant 1 : index
    %c0_32 = arith.constant 0 : index
    %c0_33 = arith.constant 0 : index
    %41 = vector.load %arg9[%c0_30, %c1_31, %c0_32, %c0_33] : memref<4x10x8x96xbf16, #tpu.memory_space<vmem>>, vector<4x8x8x96xbf16>
    %42 = vector.shape_cast %41 : vector<4x8x8x96xbf16> to vector<256x96xbf16>
    %43 = vector.extract_strided_slice %35 {offsets = [1, 0, 0], sizes = [1, 96, 32], strides = [1, 1, 1]} : vector<3x96x32xbf16> to vector<1x96x32xbf16>
    %44 = vector.shape_cast %43 : vector<1x96x32xbf16> to vector<96x32xbf16>
    %cst_34 = arith.constant dense<0.000000e+00> : vector<256x32xf32>
    %45 = tpu.matmul %42, %44, %cst_34 {dimension_numbers = #tpu.dot_dimension_numbers<[1], [0], [0], [1], [0, 0, 1, 1], [], []>} : vector<256x96xbf16>, vector<96x32xbf16>, vector<256x32xf32> -> vector<256x32xf32>
    %46 = arith.addf %40, %45 : vector<256x32xf32>
    %c0_35 = arith.constant 0 : index
    %c2 = arith.constant 2 : index
    %c0_36 = arith.constant 0 : index
    %c0_37 = arith.constant 0 : index
    %47 = vector.load %arg9[%c0_35, %c2, %c0_36, %c0_37] : memref<4x10x8x96xbf16, #tpu.memory_space<vmem>>, vector<4x8x8x96xbf16>
    %48 = vector.shape_cast %47 : vector<4x8x8x96xbf16> to vector<256x96xbf16>
    %49 = vector.extract_strided_slice %35 {offsets = [2, 0, 0], sizes = [1, 96, 32], strides = [1, 1, 1]} : vector<3x96x32xbf16> to vector<1x96x32xbf16>
    %50 = vector.shape_cast %49 : vector<1x96x32xbf16> to vector<96x32xbf16>
    %cst_38 = arith.constant dense<0.000000e+00> : vector<256x32xf32>
    %51 = tpu.matmul %48, %50, %cst_38 {dimension_numbers = #tpu.dot_dimension_numbers<[1], [0], [0], [1], [0, 0, 1, 1], [], []>} : vector<256x96xbf16>, vector<96x32xbf16>, vector<256x32xf32> -> vector<256x32xf32>
    %52 = arith.addf %46, %51 : vector<256x32xf32>
    %c0_39 = arith.constant 0 : index
    %c0_40 = arith.constant 0 : index
    %53 = vector.load %arg5[%c0_39, %c0_40] : memref<1x32xf32, #tpu.memory_space<vmem>>, vector<1x32xf32>
    %54 = vector.broadcast %53 : vector<1x32xf32> to vector<256x32xf32>
    %55 = arith.addf %52, %54 : vector<256x32xf32>
    %cst_41 = arith.constant 0.000000e+00 : f32
    %56 = vector.broadcast %cst_41 : f32 to vector<256x32xf32>
    %57 = arith.maximumf %55, %56 : vector<256x32xf32>
    %58 = arith.truncf %57 : vector<256x32xf32> to vector<256x32xbf16>
    %c0_42 = arith.constant 0 : index
    %c0_43 = arith.constant 0 : index
    %59 = vector.load %arg6[%c0_42, %c0_43] : memref<32x128xbf16, #tpu.memory_space<vmem>>, vector<32x128xbf16>
    %cst_44 = arith.constant dense<0.000000e+00> : vector<256x128xf32>
    %60 = tpu.matmul %58, %59, %cst_44 {dimension_numbers = #tpu.dot_dimension_numbers<[1], [0], [0], [1], [0, 0, 1, 1], [], []>} : vector<256x32xbf16>, vector<32x128xbf16>, vector<256x128xf32> -> vector<256x128xf32>
    %c0_45 = arith.constant 0 : index
    %c0_46 = arith.constant 0 : index
    %61 = vector.load %arg7[%c0_45, %c0_46] : memref<1x128xf32, #tpu.memory_space<vmem>>, vector<1x128xf32>
    %62 = vector.broadcast %61 : vector<1x128xf32> to vector<256x128xf32>
    %63 = arith.addf %60, %62 : vector<256x128xf32>
    %c0_47 = arith.constant 0 : index
    %c0_48 = arith.constant 0 : index
    %c0_49 = arith.constant 0 : index
    %c0_50 = arith.constant 0 : index
    %64 = vector.load %arg1[%c0_47, %c0_48, %c0_49, %c0_50] : memref<4x8x8x128xf32, #tpu.memory_space<vmem>>, vector<4x8x8x128xf32>
    %65 = vector.shape_cast %64 : vector<4x8x8x128xf32> to vector<256x128xf32>
    %66 = arith.addf %63, %65 : vector<256x128xf32>
    %cst_51 = arith.constant 0.000000e+00 : f32
    %67 = vector.broadcast %cst_51 : f32 to vector<256x128xf32>
    %68 = arith.maximumf %66, %67 : vector<256x128xf32>
    %69 = vector.shape_cast %68 : vector<256x128xf32> to vector<4x8x8x128xf32>
    %c0_52 = arith.constant 0 : index
    %c0_53 = arith.constant 0 : index
    %c0_54 = arith.constant 0 : index
    %c0_55 = arith.constant 0 : index
    %70 = vector.load %arg8[%c0_52, %c0_53, %c0_54, %c0_55] : memref<4x8x8x128xf32, #tpu.memory_space<vmem>>, vector<4x8x8x128xf32>
    tpu.vector_store %arg8[%c0_52, %c0_53, %c0_54, %c0_55], %69 {strides = array<i32>} : memref<4x8x8x128xf32, #tpu.memory_space<vmem>>, vector<4x8x8x128xf32>,
    return
  }
  func.func @transform_0(%arg0: i32) -> (i32, i32, i32, i32) {
    %c0_i32 = arith.constant 0 : i32
    %c0_i32_0 = arith.constant 0 : i32
    %c0_i32_1 = arith.constant 0 : i32
    %c0_i32_2 = arith.constant 0 : i32
    return %arg0, %c0_i32, %c0_i32_0, %c0_i32_1 : i32, i32, i32, i32
  }
  func.func @transform_1(%arg0: i32) -> (i32, i32) {
    %c0_i32 = arith.constant 0 : i32
    %c0_i32_0 = arith.constant 0 : i32
    %c0_i32_1 = arith.constant 0 : i32
    return %c0_i32, %c0_i32_0 : i32, i32
  }
  func.func @transform_2(%arg0: i32) -> (i32, i32) {
    %c0_i32 = arith.constant 0 : i32
    %c0_i32_0 = arith.constant 0 : i32
    %c0_i32_1 = arith.constant 0 : i32
    return %c0_i32, %c0_i32_0 : i32, i32
  }
  func.func @transform_3(%arg0: i32) -> (i32, i32, i32) {
    %c0_i32 = arith.constant 0 : i32
    %c0_i32_0 = arith.constant 0 : i32
    %c0_i32_1 = arith.constant 0 : i32
    %c0_i32_2 = arith.constant 0 : i32
    return %c0_i32, %c0_i32_0, %c0_i32_1 : i32, i32, i32
  }
  func.func @transform_4(%arg0: i32) -> (i32, i32) {
    %c0_i32 = arith.constant 0 : i32
    %c0_i32_0 = arith.constant 0 : i32
    %c0_i32_1 = arith.constant 0 : i32
    return %c0_i32, %c0_i32_0 : i32, i32
  }
  func.func @transform_5(%arg0: i32) -> (i32, i32) {
    %c0_i32 = arith.constant 0 : i32
    %c0_i32_0 = arith.constant 0 : i32
    %c0_i32_1 = arith.constant 0 : i32
    return %c0_i32, %c0_i32_0 : i32, i32
  }
  func.func @transform_6(%arg0: i32) -> (i32, i32) {
    %c0_i32 = arith.constant 0 : i32
    %c0_i32_0 = arith.constant 0 : i32
    %c0_i32_1 = arith.constant 0 : i32
    return %c0_i32, %c0_i32_0 : i32, i32
  }
  func.func @transform_7(%arg0: i32) -> (i32, i32, i32, i32) {
    %c0_i32 = arith.constant 0 : i32
    %c0_i32_0 = arith.constant 0 : i32
    %c0_i32_1 = arith.constant 0 : i32
    %c0_i32_2 = arith.constant 0 : i32
    return %arg0, %c0_i32, %c0_i32_0, %c0_i32_1 : i32, i32, i32, i32
  }
}

module attributes {stable_mosaic.version = 11 : i64} {
  func.func @bottleneck_kernel(%arg0: i32, %arg1: memref<4x8x8x128xf32, #tpu.memory_space<vmem>>, %arg2: memref<128x32xbf16, #tpu.memory_space<vmem>>, %arg3: memref<1x32xf32, #tpu.memory_space<vmem>>, %arg4: memref<3x96x32xbf16, #tpu.memory_space<vmem>>, %arg5: memref<1x32xf32, #tpu.memory_space<vmem>>, %arg6: memref<32x128xbf16, #tpu.memory_space<vmem>>, %arg7: memref<1x128xf32, #tpu.memory_space<vmem>>, %arg8: memref<4x8x8x128xf32, #tpu.memory_space<vmem>>, %arg9: memref<4x10x8x96xbf16, #tpu.memory_space<vmem>>) attributes {dimension_semantics = [#tpu.dimension_semantics<parallel>], iteration_bounds = array<i64: 2>, scalar_prefetch = 0 : i64, scratch_operands = 1 : i64, tpu.core_type = #tpu.core_type<tc>, window_params = [{transform_indices = @transform_0, window_bounds = array<i64: 4, 8, 8, 128>}, {pipeline_mode = #tpu.pipeline_mode<synchronous>, transform_indices = @transform_1, window_bounds = array<i64: 128, 32>}, {pipeline_mode = #tpu.pipeline_mode<synchronous>, transform_indices = @transform_2, window_bounds = array<i64: 1, 32>}, {pipeline_mode = #tpu.pipeline_mode<synchronous>, transform_indices = @transform_3, window_bounds = array<i64: 3, 96, 32>}, {pipeline_mode = #tpu.pipeline_mode<synchronous>, transform_indices = @transform_4, window_bounds = array<i64: 1, 32>}, {pipeline_mode = #tpu.pipeline_mode<synchronous>, transform_indices = @transform_5, window_bounds = array<i64: 32, 128>}, {pipeline_mode = #tpu.pipeline_mode<synchronous>, transform_indices = @transform_6, window_bounds = array<i64: 1, 128>}, {transform_indices = @transform_7, window_bounds = array<i64: 4, 8, 8, 128>}]} {
    %c0 = arith.constant 0 : index
    %c0_0 = arith.constant 0 : index
    %c0_1 = arith.constant 0 : index
    %c0_2 = arith.constant 0 : index
    %0 = vector.load %arg1[%c0, %c0_0, %c0_1, %c0_2] : memref<4x8x8x128xf32, #tpu.memory_space<vmem>>, vector<4x8x8x128xf32>
    %1 = vector.shape_cast %0 : vector<4x8x8x128xf32> to vector<256x128xf32>
    %2 = arith.truncf %1 : vector<256x128xf32> to vector<256x128xbf16>
    %c0_3 = arith.constant 0 : index
    %c0_4 = arith.constant 0 : index
    %3 = vector.load %arg2[%c0_3, %c0_4] : memref<128x32xbf16, #tpu.memory_space<vmem>>, vector<128x32xbf16>
    %cst = arith.constant dense<0.000000e+00> : vector<256x32xf32>
    %4 = tpu.matmul %2, %3, %cst {dimension_numbers = #tpu.dot_dimension_numbers<[1], [0], [0], [1], [0, 0, 1, 1], [], []>} : vector<256x128xbf16>, vector<128x32xbf16>, vector<256x32xf32> -> vector<256x32xf32>
    %c0_5 = arith.constant 0 : index
    %c0_6 = arith.constant 0 : index
    %5 = vector.load %arg3[%c0_5, %c0_6] : memref<1x32xf32, #tpu.memory_space<vmem>>, vector<1x32xf32>
    %6 = vector.broadcast %5 : vector<1x32xf32> to vector<256x32xf32>
    %7 = arith.addf %4, %6 : vector<256x32xf32>
    %cst_7 = arith.constant 0.000000e+00 : f32
    %8 = vector.broadcast %cst_7 : f32 to vector<256x32xf32>
    %9 = arith.maximumf %7, %8 : vector<256x32xf32>
    %10 = vector.shape_cast %9 : vector<256x32xf32> to vector<32x8x32xf32>
    %11 = tpu.iota {dimensions = array<i32: 1>} : vector<1x8x32xi32>
    %c0_i32 = arith.constant 0 : i32
    %12 = vector.broadcast %c0_i32 : i32 to vector<1x8x32xi32>
    %13 = arith.cmpi eq, %11, %12 : vector<1x8x32xi32>
    %c1_i32 = arith.constant 1 : i32
    %14 = tpu.dynamic_rotate %10 by %c1_i32 dim 1 : vector<32x8x32xf32>, i32 -> vector<32x8x32xf32>
    %cst_8 = arith.constant 0.000000e+00 : f32
    %15 = vector.shape_cast %13 : vector<1x8x32xi1> to vector<1x8x32xi1>
    %16 = vector.broadcast %15 : vector<1x8x32xi1> to vector<32x8x32xi1>
    %17 = vector.broadcast %cst_8 : f32 to vector<32x8x32xf32>
    %18 = arith.select %16, %17, %14 : vector<32x8x32xi1>, vector<32x8x32xf32>
    %c7_i32 = arith.constant 7 : i32
    %19 = vector.broadcast %c7_i32 : i32 to vector<1x8x32xi32>
    %20 = arith.cmpi eq, %11, %19 : vector<1x8x32xi32>
    %c7_i32_9 = arith.constant 7 : i32
    %21 = tpu.dynamic_rotate %10 by %c7_i32_9 dim 1 : vector<32x8x32xf32>, i32 -> vector<32x8x32xf32>
    %cst_10 = arith.constant 0.000000e+00 : f32
    %22 = vector.shape_cast %20 : vector<1x8x32xi1> to vector<1x8x32xi1>
    %23 = vector.broadcast %22 : vector<1x8x32xi1> to vector<32x8x32xi1>
    %24 = vector.broadcast %cst_10 : f32 to vector<32x8x32xf32>
    %25 = arith.select %23, %24, %21 : vector<32x8x32xi1>, vector<32x8x32xf32>
    %26 = arith.truncf %18 : vector<32x8x32xf32> to vector<32x8x32xbf16>
    %27 = arith.truncf %10 : vector<32x8x32xf32> to vector<32x8x32xbf16>
    %28 = arith.truncf %25 : vector<32x8x32xf32> to vector<32x8x32xbf16>
    %29 = tpu.concatenate %26, %27, %28 in 2 : vector<32x8x32xbf16>, vector<32x8x32xbf16>, vector<32x8x32xbf16> -> vector<32x8x96xbf16>
    %cst_11 = arith.constant 0.000000e+00 : bf16
    %30 = vector.broadcast %cst_11 : bf16 to vector<4x1x8x96xbf16>
    %c0_12 = arith.constant 0 : index
    %c0_13 = arith.constant 0 : index
    %c0_14 = arith.constant 0 : index
    %c0_15 = arith.constant 0 : index
    %31 = vector.load %arg9[%c0_12, %c0_13, %c0_14, %c0_15] : memref<4x10x8x96xbf16, #tpu.memory_space<vmem>>, vector<4x1x8x96xbf16>
    tpu.vector_store %arg9[%c0_12, %c0_13, %c0_14, %c0_15], %30 {strides = array<i32>} : memref<4x10x8x96xbf16, #tpu.memory_space<vmem>>, vector<4x1x8x96xbf16>,
    %c0_16 = arith.constant 0 : index
    %c9 = arith.constant 9 : index
    %c0_17 = arith.constant 0 : index
    %c0_18 = arith.constant 0 : index
    %32 = vector.load %arg9[%c0_16, %c9, %c0_17, %c0_18] : memref<4x10x8x96xbf16, #tpu.memory_space<vmem>>, vector<4x1x8x96xbf16>
    tpu.vector_store %arg9[%c0_16, %c9, %c0_17, %c0_18], %30 {strides = array<i32>} : memref<4x10x8x96xbf16, #tpu.memory_space<vmem>>, vector<4x1x8x96xbf16>,
    %33 = vector.shape_cast %29 : vector<32x8x96xbf16> to vector<4x8x8x96xbf16>
    %c0_19 = arith.constant 0 : index
    %c1 = arith.constant 1 : index
    %c0_20 = arith.constant 0 : index
    %c0_21 = arith.constant 0 : index
    %34 = vector.load %arg9[%c0_19, %c1, %c0_20, %c0_21] : memref<4x10x8x96xbf16, #tpu.memory_space<vmem>>, vector<4x8x8x96xbf16>
    tpu.vector_store %arg9[%c0_19, %c1, %c0_20, %c0_21], %33 {strides = array<i32>} : memref<4x10x8x96xbf16, #tpu.memory_space<vmem>>, vector<4x8x8x96xbf16>,
    %c0_22 = arith.constant 0 : index
    %c0_23 = arith.constant 0 : index
    %c0_24 = arith.constant 0 : index
    %35 = vector.load %arg4[%c0_22, %c0_23, %c0_24] : memref<3x96x32xbf16, #tpu.memory_space<vmem>>, vector<3x96x32xbf16>
    %c0_25 = arith.constant 0 : index
    %c0_26 = arith.constant 0 : index
    %c0_27 = arith.constant 0 : index
    %c0_28 = arith.constant 0 : index
    %36 = vector.load %arg9[%c0_25, %c0_26, %c0_27, %c0_28] : memref<4x10x8x96xbf16, #tpu.memory_space<vmem>>, vector<4x8x8x96xbf16>
    %37 = vector.shape_cast %36 : vector<4x8x8x96xbf16> to vector<256x96xbf16>
    %38 = vector.extract_strided_slice %35 {offsets = [0, 0, 0], sizes = [1, 96, 32], strides = [1, 1, 1]} : vector<3x96x32xbf16> to vector<1x96x32xbf16>
    %39 = vector.shape_cast %38 : vector<1x96x32xbf16> to vector<96x32xbf16>
    %cst_29 = arith.constant dense<0.000000e+00> : vector<256x32xf32>
    %40 = tpu.matmul %37, %39, %cst_29 {dimension_numbers = #tpu.dot_dimension_numbers<[1], [0], [0], [1], [0, 0, 1, 1], [], []>} : vector<256x96xbf16>, vector<96x32xbf16>, vector<256x32xf32> -> vector<256x32xf32>
    %c0_30 = arith.constant 0 : index
    %c1_31 = arith.constant 1 : index
    %c0_32 = arith.constant 0 : index
    %c0_33 = arith.constant 0 : index
    %41 = vector.load %arg9[%c0_30, %c1_31, %c0_32, %c0_33] : memref<4x10x8x96xbf16, #tpu.memory_space<vmem>>, vector<4x8x8x96xbf16>
    %42 = vector.shape_cast %41 : vector<4x8x8x96xbf16> to vector<256x96xbf16>
    %43 = vector.extract_strided_slice %35 {offsets = [1, 0, 0], sizes = [1, 96, 32], strides = [1, 1, 1]} : vector<3x96x32xbf16> to vector<1x96x32xbf16>
    %44 = vector.shape_cast %43 : vector<1x96x32xbf16> to vector<96x32xbf16>
    %cst_34 = arith.constant dense<0.000000e+00> : vector<256x32xf32>
    %45 = tpu.matmul %42, %44, %cst_34 {dimension_numbers = #tpu.dot_dimension_numbers<[1], [0], [0], [1], [0, 0, 1, 1], [], []>} : vector<256x96xbf16>, vector<96x32xbf16>, vector<256x32xf32> -> vector<256x32xf32>
    %46 = arith.addf %40, %45 : vector<256x32xf32>
    %c0_35 = arith.constant 0 : index
    %c2 = arith.constant 2 : index
    %c0_36 = arith.constant 0 : index
    %c0_37 = arith.constant 0 : index
    %47 = vector.load %arg9[%c0_35, %c2, %c0_36, %c0_37] : memref<4x10x8x96xbf16, #tpu.memory_space<vmem>>, vector<4x8x8x96xbf16>
    %48 = vector.shape_cast %47 : vector<4x8x8x96xbf16> to vector<256x96xbf16>
    %49 = vector.extract_strided_slice %35 {offsets = [2, 0, 0], sizes = [1, 96, 32], strides = [1, 1, 1]} : vector<3x96x32xbf16> to vector<1x96x32xbf16>
    %50 = vector.shape_cast %49 : vector<1x96x32xbf16> to vector<96x32xbf16>
    %cst_38 = arith.constant dense<0.000000e+00> : vector<256x32xf32>
    %51 = tpu.matmul %48, %50, %cst_38 {dimension_numbers = #tpu.dot_dimension_numbers<[1], [0], [0], [1], [0, 0, 1, 1], [], []>} : vector<256x96xbf16>, vector<96x32xbf16>, vector<256x32xf32> -> vector<256x32xf32>
    %52 = arith.addf %46, %51 : vector<256x32xf32>
    %c0_39 = arith.constant 0 : index
    %c0_40 = arith.constant 0 : index
    %53 = vector.load %arg5[%c0_39, %c0_40] : memref<1x32xf32, #tpu.memory_space<vmem>>, vector<1x32xf32>
    %54 = vector.broadcast %53 : vector<1x32xf32> to vector<256x32xf32>
    %55 = arith.addf %52, %54 : vector<256x32xf32>
    %cst_41 = arith.constant 0.000000e+00 : f32
    %56 = vector.broadcast %cst_41 : f32 to vector<256x32xf32>
    %57 = arith.maximumf %55, %56 : vector<256x32xf32>
    %58 = arith.truncf %57 : vector<256x32xf32> to vector<256x32xbf16>
    %c0_42 = arith.constant 0 : index
    %c0_43 = arith.constant 0 : index
    %59 = vector.load %arg6[%c0_42, %c0_43] : memref<32x128xbf16, #tpu.memory_space<vmem>>, vector<32x128xbf16>
    %cst_44 = arith.constant dense<0.000000e+00> : vector<256x128xf32>
    %60 = tpu.matmul %58, %59, %cst_44 {dimension_numbers = #tpu.dot_dimension_numbers<[1], [0], [0], [1], [0, 0, 1, 1], [], []>} : vector<256x32xbf16>, vector<32x128xbf16>, vector<256x128xf32> -> vector<256x128xf32>
    %c0_45 = arith.constant 0 : index
    %c0_46 = arith.constant 0 : index
    %61 = vector.load %arg7[%c0_45, %c0_46] : memref<1x128xf32, #tpu.memory_space<vmem>>, vector<1x128xf32>
    %62 = vector.broadcast %61 : vector<1x128xf32> to vector<256x128xf32>
    %63 = arith.addf %60, %62 : vector<256x128xf32>
    %c0_47 = arith.constant 0 : index
    %c0_48 = arith.constant 0 : index
    %c0_49 = arith.constant 0 : index
    %c0_50 = arith.constant 0 : index
    %64 = vector.load %arg1[%c0_47, %c0_48, %c0_49, %c0_50] : memref<4x8x8x128xf32, #tpu.memory_space<vmem>>, vector<4x8x8x128xf32>
    %65 = vector.shape_cast %64 : vector<4x8x8x128xf32> to vector<256x128xf32>
    %66 = arith.addf %63, %65 : vector<256x128xf32>
    %cst_51 = arith.constant 0.000000e+00 : f32
    %67 = vector.broadcast %cst_51 : f32 to vector<256x128xf32>
    %68 = arith.maximumf %66, %67 : vector<256x128xf32>
    %69 = vector.shape_cast %68 : vector<256x128xf32> to vector<4x8x8x128xf32>
    %c0_52 = arith.constant 0 : index
    %c0_53 = arith.constant 0 : index
    %c0_54 = arith.constant 0 : index
    %c0_55 = arith.constant 0 : index
    %70 = vector.load %arg8[%c0_52, %c0_53, %c0_54, %c0_55] : memref<4x8x8x128xf32, #tpu.memory_space<vmem>>, vector<4x8x8x128xf32>
    tpu.vector_store %arg8[%c0_52, %c0_53, %c0_54, %c0_55], %69 {strides = array<i32>} : memref<4x8x8x128xf32, #tpu.memory_space<vmem>>, vector<4x8x8x128xf32>,
    return
  }
  func.func @transform_0(%arg0: i32) -> (i32, i32, i32, i32) {
    %c0_i32 = arith.constant 0 : i32
    %c0_i32_0 = arith.constant 0 : i32
    %c0_i32_1 = arith.constant 0 : i32
    %c0_i32_2 = arith.constant 0 : i32
    return %arg0, %c0_i32, %c0_i32_0, %c0_i32_1 : i32, i32, i32, i32
  }
  func.func @transform_1(%arg0: i32) -> (i32, i32) {
    %c0_i32 = arith.constant 0 : i32
    %c0_i32_0 = arith.constant 0 : i32
    %c0_i32_1 = arith.constant 0 : i32
    return %c0_i32, %c0_i32_0 : i32, i32
  }
  func.func @transform_2(%arg0: i32) -> (i32, i32) {
    %c0_i32 = arith.constant 0 : i32
    %c0_i32_0 = arith.constant 0 : i32
    %c0_i32_1 = arith.constant 0 : i32
    return %c0_i32, %c0_i32_0 : i32, i32
  }
  func.func @transform_3(%arg0: i32) -> (i32, i32, i32) {
    %c0_i32 = arith.constant 0 : i32
    %c0_i32_0 = arith.constant 0 : i32
    %c0_i32_1 = arith.constant 0 : i32
    %c0_i32_2 = arith.constant 0 : i32
    return %c0_i32, %c0_i32_0, %c0_i32_1 : i32, i32, i32
  }
  func.func @transform_4(%arg0: i32) -> (i32, i32) {
    %c0_i32 = arith.constant 0 : i32
    %c0_i32_0 = arith.constant 0 : i32
    %c0_i32_1 = arith.constant 0 : i32
    return %c0_i32, %c0_i32_0 : i32, i32
  }
  func.func @transform_5(%arg0: i32) -> (i32, i32) {
    %c0_i32 = arith.constant 0 : i32
    %c0_i32_0 = arith.constant 0 : i32
    %c0_i32_1 = arith.constant 0 : i32
    return %c0_i32, %c0_i32_0 : i32, i32
  }
  func.func @transform_6(%arg0: i32) -> (i32, i32) {
    %c0_i32 = arith.constant 0 : i32
    %c0_i32_0 = arith.constant 0 : i32
    %c0_i32_1 = arith.constant 0 : i32
    return %c0_i32, %c0_i32_0 : i32, i32
  }
  func.func @transform_7(%arg0: i32) -> (i32, i32, i32, i32) {
    %c0_i32 = arith.constant 0 : i32
    %c0_i32_0 = arith.constant 0 : i32
    %c0_i32_1 = arith.constant 0 : i32
    %c0_i32_2 = arith.constant 0 : i32
    return %arg0, %c0_i32, %c0_i32_0, %c0_i32_1 : i32, i32, i32, i32
  }
}

</mosaic_0001>

<bundles_post_ra>
// kernel: tpu_custom_call.1
= control target key start
LH: loop header
LB: loop body
LE: loop exit
PB: predicated region body
PF: predicated region fallthrough
CT: control target
= control target key end

     0   :  { %12 = vsyncpa [#allocation4], 0  ;;  %s4481_s0 = inlined_call_operand.hbm [shape: f32[8,8,8,128], index: 0, kind: input, shape index: {}]   ;;  %s4482_s1 = inlined_call_operand.vmem [shape: bf16[128,32], index: 1, kind: input, shape index: {}]   ;;  %s4483_s2 = inlined_call_operand.vmem [shape: f32[1,32], index: 2, kind: input, shape index: {}]   ;;  %s4484_s3 = inlined_call_operand.vmem [shape: bf16[3,96,32], index: 3, kind: input, shape index: {}]   ;;  %s4485_s4 = inlined_call_operand.vmem [shape: f32[1,32], index: 4, kind: input, shape index: {}]   ;;  %s4486_s5 = inlined_call_operand.vmem [shape: bf16[32,128], index: 5, kind: input, shape index: {}]   ;;  %s4487_s6 = inlined_call_operand.vmem [shape: f32[1,128], index: 6, kind: input, shape index: {}]   ;;  %s4488_s7 = inlined_call_operand.hbm [shape: f32[8,8,8,128], index: 7, kind: output, shape index: {}]  }
   0x1   :  { %14 = vsyncpa [#allocation4 + $0x1], 0 }
   0x2   :  { %15 = vsyncpa [#allocation5], 0 }
   0x3   :  { %17 = vsyncpa [#allocation5 + $0x1], 0  ;;  %s3396_s24 = smov 0   ;;  %s3398_s25 = smov 0  }
   0x4   :  { %s3400_s26 = smov 0   ;;  %s3402_s27 = smov 0  }
   0x5 LB: > { %s3417_s28 = sadd.s32 4294967295, %s3347_s27   ;;  %s2713_s29 = sadd.s32 4294967294, %s3347_s27   ;;  %s3347_s27 = sphi %s3402_s27, %s4500_s27   ;;  %s3343_s26 = sphi %s3400_s26, %s4499_s26   ;;  %s3339_s25 = sphi %s3398_s25, %s4498_s25   ;;  %s3335_s24 = sphi %s3396_s24, %s4497_s24  }
   0x6   : > { %s3421_s30 = sadd.s32 1, %s3347_s27   ;;  %s30_s8 = sadd.s32 1, %s3343_s26 }
   0x7   : > { %s27_s9 = ssub.s32 %s3347_s27, %s3421_s30  ;;  %p37_p0 = scmp.ne.s32.totalorder %s3343_s26, %s3339_s25 }
   0x8   : > { %p28_p1 = scmp.eq.s32.totalorder %s27_s9, 0  ;;  %p38_p2 = scmp.eq.s32.totalorder %s3347_s27, 0 }
   0x9   : > { %p43_p3 = scmp.ne.s32.totalorder %s3339_s25, %s3335_s24  ;;  %p44_p4 = scmp.eq.s32.totalorder %s3417_s28, 0 }
   0xa   : > { %s3433_s10 = scalar_select %p28_p1, %s3343_s26, %s30_s8  }
   0xb   : > { %p3435_p5 = por %p38_p2, %p37_p0  ;;  %p3439_p6 = por %p44_p4, %p43_p3 }
   0xc   : > { %4489 = sst [smem:[#allocation9_spill]] %s3433_s10  ;;  %p193_p7 = scmp.eq.s32.totalorder %s3417_s28, 1 }
   0xd   : > { %p199_p8 = scmp.eq.s32.totalorder %s2713_s29, 1  ;;  %p3207_p10 = scmp.lt.s32.totalorder %s3347_s27, 2 }
   0xe   : > { %p3446_p11 = por %p193_p7, %p37_p0  ;;  %s237_s15 = sand.u32 1, %s3343_s26  }
   0xf   : > { %p3450_p12 = por %p199_p8, %p43_p3  ;;  %s3098_s16 = sshll.u32 %s3347_s27, 8 }
  0x10   : > { %s2716_s17 = sshll.u32 %s237_s15, 8  ;;  %s247_s20 = scalar_lea.hbm %s4481_s0, %s3098_s16 }
  0x11   : > { %s248_s21 = sshll.u32 %s247_s20, 4  ;;  %s241_s22 = scalar_lea.vmem [#allocation3], %s2716_s17  ;;  %s249_s21 = int_to_ptr.hbm [resolvable:$true] %s248_s21 }
  0x12   : > { %s250_s23 = sshll.u32 %s241_s22, 4  ;;  %p3461_p13 = pnand %p3207_p10, %p3435_p5  ;;  %s251_s23 = int_to_ptr.vmem [resolvable:$true] %s250_s23 }
  0x13   : > { %p2720_p0 = scmp.ge.s32.totalorder %s3347_s27, 1  ;;  %p258_p1 = scmp.lt.s32.totalorder %s3347_s27, 3 }
  0x14   : > { %s238_s8 = scalar_lea.sflag [#allocation4], %s237_s15  ;;  %s3251_s9 = sshra.s32 %s249_s21, 4  ;;  %s3252_s9 = int_to_ptr.hbm [resolvable:$true] %s3251_s9 }
  0x15   : > { %s3253_s10 = scalar_lea.hbm %s3252_s9, 256  ;;  %p3255_p3 = pneg %p3461_p13 }
  0x16   : > { %p3254_p2 = scmp.ne.s32.totalorder %s3252_s9, %s3253_s10  ;;  %s3258_s11 = scalar_lea.hbm %s4481_s0, 512 }
  0x17   : > { %p3259_p5 = scmp.lt.s32.totalorder %s3252_s9, %s4481_s0  ;;  %p3260_p8 = scmp.lt.s32.totalorder %s3258_s11, %s3253_s10 }
  0x18   : > { %p3256_p4 = pnand %p3255_p3, %p3254_p2 }
  0x19   : > { %p3261_p10 = por %p3260_p8, %p3259_p5 }
  0x1a   : > { %p3257_p7 = pneg %p3256_p4 }
  0x1c   : > { %p3262_p9 = pnand %p3261_p10, %p3257_p7 }
  0x1e   : > { %3265 = shalt.err (!%p3262_p9)
}
  0x1f   : > { %s3349_s15 = smov 128   ;;  %s3350_s20 = smov 8  }
  0x20   : > { %3202 = dma.hbm_to_vmem [thread:$0]  (!%p3461_p13), %s249_s21, 4096, %s251_s23, %s238_s8, %s3349_s15, %s3349_s15, %s3350_s20  }
  0x21   : > { %p259_p2 = pnand %p2720_p0, %p258_p1 }
  0x22   : > { %s3482_s22 = sand.u32 (!%p259_p2), 1, %s3339_s25  }
  0x23   : > { %262 = sbr.rel (%p259_p2) target bundleno = 1133 (0x46d), region = 48  ;;  %s2721_s10 = sshll.u32 (!%p259_p2), %s3482_s22, 8 }
  0x24   : > { %s265_s9 = scalar_lea.sflag (!%p259_p2), [#allocation4], %s3482_s22  ;;  %s3488_s16 = scalar_lea.vmem (!%p259_p2), [#allocation3], %s2721_s10 }
  0x28   : > { %3326 = dma.done.wait (%p3439_p6), %s265_s9, 4096  }
  0x29   : > { %3328 = vsyncadd (%p3439_p6), %s265_s9, 4294963200  ;;  %v3106_v0 = vld [vmem:[%s4482_s1 + $0x38] sm:$0xff]  ;;  %v3105_v1 = vld [vmem:[%s4482_s1 + $0x30] sm:$0xff]  ;;  %s3351_s19 = smov 32   ;;  %s3352_s15 = smov 64   ;;  %vm1189_vm2 = vcmask 523264  }
  0x2a   : > { %419 = vmatpush.bf16.msra.mxu0 %v3106_v0  ;;  %v3104_v2 = vld [vmem:[%s4482_s1 + $0x28] sm:$0xff]  ;;  %v3103_v3 = vld [vmem:[%s4482_s1 + $0x20] sm:$0xff]  ;;  %v3102_v4 = vld [vmem:[%s4482_s1 + $0x18] sm:$0xff]  ;;  %vm1092_vm3 = vcmask 261120   ;;  %vm1286_vm4 = vcmask 781312   ;;  %vm1545_vm5 = vcmask 785408  }
  0x2b   : > { %v3101_v5 = vld [vmem:[%s4482_s1 + $0x10] sm:$0xff]  ;;  %v3100_v6 = vld [vmem:[%s4482_s1 + $0x8] sm:$0xff]  ;;  %v3099_v7 = vld [vmem:[%s4482_s1] sm:$0xff]  ;;  %s2624_s29 = scalar_lea.sflag [#allocation5], %s3482_s22 }
  0x2c   : > { %v303_v8 = vld [vmem:[%s3488_s16] sm:$0xff]  ;;  %v304_v9 = vld [vmem:[%s3488_s16 + $0x8] sm:$0xff]  ;;  %v305_v11 = vld [vmem:[%s3488_s16 + $0x10] sm:$0xff] }
  0x2d   : > { %v335_v10 = vpack.c.bf16 %v304_v9, %v303_v8  ;;  %v306_v12 = vld [vmem:[%s3488_s16 + $0x18] sm:$0xff]  ;;  %v307_v14 = vld [vmem:[%s3488_s16 + $0x20] sm:$0xff]  ;;  %v308_v15 = vld [vmem:[%s3488_s16 + $0x28] sm:$0xff] }
  0x2e   : > { %420 = vmatpush.bf16.msra.mxu0 %v3105_v1  ;;  %v336_v13 = vpack.c.bf16 %v306_v12, %v305_v11  ;;  %v337_v16 = vpack.c.bf16 %v308_v15, %v307_v14  ;;  %v309_v17 = vld [vmem:[%s3488_s16 + $0x30] sm:$0xff]  ;;  %v310_v18 = vld [vmem:[%s3488_s16 + $0x38] sm:$0xff]  ;;  %v311_v20 = vld [vmem:[%s3488_s16 + $0x40] sm:$0xff]  ;;  %v540_v11 = vlaneseq }
  0x2f   : > { %v338_v19 = vpack.c.bf16 %v310_v18, %v309_v17  ;;  %v312_v21 = vld [vmem:[%s3488_s16 + $0x48] sm:$0xff]  ;;  %v313_v23 = vld [vmem:[%s3488_s16 + $0x50] sm:$0xff]  ;;  %v314_v24 = vld [vmem:[%s3488_s16 + $0x58] sm:$0xff] }
  0x30   : > { %v339_v22 = vpack.c.bf16 %v312_v21, %v311_v20  ;;  %v340_v25 = vpack.c.bf16 %v314_v24, %v313_v23  ;;  %v315_v26 = vld [vmem:[%s3488_s16 + $0x60] sm:$0xff]  ;;  %v316_v27 = vld [vmem:[%s3488_s16 + $0x68] sm:$0xff]  ;;  %v317_v29 = vld [vmem:[%s3488_s16 + $0x70] sm:$0xff]  ;;  %v3595_v15 = vshrl.u32 %v540_v11, 7 }
  0x31   : > { %v341_v28 = vpack.c.bf16 %v316_v27, %v315_v26  ;;  %v318_v30 = vld [vmem:[%s3488_s16 + $0x78] sm:$0xff]  ;;  %v319_v32 = vld [vmem:[%s3488_s16 + $0x80] sm:$0xff]  ;;  %v320_v33 = vld [vmem:[%s3488_s16 + $0x88] sm:$0xff] }
  0x32   : > { %421 = vmatpush.bf16.msra.mxu0 %v3104_v2  ;;  %v342_v31 = vpack.c.bf16 %v318_v30, %v317_v29  ;;  %v343_v34 = vpack.c.bf16 %v320_v33, %v319_v32  ;;  %v321_v37 = vld [vmem:[%s3488_s16 + $0x90] sm:$0xff]  ;;  %v322_v38 = vld [vmem:[%s3488_s16 + $0x98] sm:$0xff]  ;;  %v323_v42 = vld [vmem:[%s3488_s16 + $0xa0] sm:$0xff]  ;;  %vm609_vm0 = vcmp.eq.s32.totalorder %v3595_v15, 7  ;;  %vm542_vm1 = vcmp.eq.s32.totalorder %v3595_v15, 0 }
  0x33   : > { %v344_v39 = vpack.c.bf16 %v322_v38, %v321_v37  ;;  %v324_v43 = vld [vmem:[%s3488_s16 + $0xa8] sm:$0xff]  ;;  %v325_v47 = vld [vmem:[%s3488_s16 + $0xb0] sm:$0xff]  ;;  %v326_v48 = vld [vmem:[%s3488_s16 + $0xb8] sm:$0xff] }
  0x34   : > { %v345_v44 = vpack.c.bf16 %v324_v43, %v323_v42  ;;  %v346_v49 = vpack.c.bf16 %v326_v48, %v325_v47  ;;  %v327_v52 = vld [vmem:[%s3488_s16 + $0xc0] sm:$0xff]  ;;  %v328_v53 = vld [vmem:[%s3488_s16 + $0xc8] sm:$0xff]  ;;  %v329_v57 = vld [vmem:[%s3488_s16 + $0xd0] sm:$0xff] }
  0x35   : > { %v347_v54 = vpack.c.bf16 %v328_v53, %v327_v52  ;;  %v330_v58 = vld [vmem:[%s3488_s16 + $0xd8] sm:$0xff]  ;;  %v331_v62 = vld [vmem:[%s3488_s16 + $0xe0] sm:$0xff]  ;;  %v332_v63 = vld [vmem:[%s3488_s16 + $0xe8] sm:$0xff] }
  0x36   : > { %422 = vmatpush.bf16.msra.mxu0 %v3103_v3  ;;  %v348_v59 = vpack.c.bf16 %v330_v58, %v329_v57  ;;  %v349_v0 = vpack.c.bf16 %v332_v63, %v331_v62  ;;  %v333_v3 = vld [vmem:[%s3488_s16 + $0xf0] sm:$0xff]  ;;  %v3118_v8 = vld [vmem:[%s4484_s3 + $0x58] sm:$0xff]  ;;  %v3592_v12 = vld [vmem:[%s4483_s2] ss:$0 sm:$0xff] }
  0x37   : > { %3178 = vmatpush.bf16.msra.mxu2 %v3118_v8  ;;  %3179 = vmatpush.bf16.msra.mxu3 %v3118_v8  ;;  %v3117_v47 = vld [vmem:[%s4484_s3 + $0x50] sm:$0xff] }
  0x38   : > { %3177 = vmatpush.bf16.msra.mxu1 %v3118_v8 }
  0x3a   : > { %423 = vmatpush.bf16.msra.mxu0 %v3102_v4  ;;  %v334_v4 = vld [vmem:[%s3488_s16 + $0xf8] sm:$0xff] }
  0x3b   : > { %3181 = vmatpush.bf16.msra.mxu2 %v3117_v47  ;;  %3182 = vmatpush.bf16.msra.mxu3 %v3117_v47 }
  0x3c   : > { %3180 = vmatpush.bf16.msra.mxu1 %v3117_v47 }
  0x3e   : > { %424 = vmatpush.bf16.msra.mxu0 %v3101_v5  ;;  %v350_v5 = vpack.c.bf16 %v334_v4, %v333_v3 }
  0x42   : > { %425 = vmatpush.bf16.msra.mxu0 %v3100_v6 }
  0x46   : > { %426 = vmatpush.bf16.msra.mxu0 %v3099_v7 }
  0x49   : > { %427 = vmatmul.bf16.vlgmr.msra.gmra.mxu0 %v335_v10 }
  0x4a   : > { %1596 = vmatpush.bf16.msrb.mxu0 %v3118_v8 }
  0x4e   : > { %1597 = vmatpush.bf16.msrb.mxu0 %v3117_v47 }
  0x59   : > { %432 = vmatmul.bf16.gmra.mxu0 %v336_v13 }
  0x69   : > { %437 = vmatmul.bf16.gmra.mxu0 %v337_v16 }
  0x79   : > { %442 = vmatmul.bf16.gmra.mxu0 %v338_v19 }
  0x89   : > { %447 = vmatmul.bf16.gmra.mxu0 %v339_v22 }
  0x99   : > { %452 = vmatmul.bf16.gmra.mxu0 %v340_v25 }
  0xa9   : > { %457 = vmatmul.bf16.gmra.mxu0 %v341_v28 }
  0xb9   : > { %462 = vmatmul.bf16.gmra.mxu0 %v342_v31 }
  0xc6   : > { %v3536_v35 = vpop.f32.mrf.mxu0 }
  0xc9   : > { %467 = vmatmul.bf16.gmra.mxu0 %v343_v34 }
  0xce   : > { %v3538_v36 = vpop.f32.mrf.mxu0 }
  0xd6   : > { %v3542_v40 = vpop.f32.mrf.mxu0 }
  0xd9   : > { %472 = vmatmul.bf16.gmra.mxu0 %v344_v39 }
  0xde   : > { %v3544_v41 = vpop.f32.mrf.mxu0 }
  0xe6   : > { %v3548_v45 = vpop.f32.mrf.mxu0 }
  0xe9   : > { %477 = vmatmul.bf16.gmra.mxu0 %v345_v44 }
  0xee   : > { %v3550_v46 = vpop.f32.mrf.mxu0 }
  0xf6   : > { %v3554_v50 = vpop.f32.mrf.mxu0 }
  0xf9   : > { %482 = vmatmul.bf16.gmra.mxu0 %v346_v49 }
  0xfe   : > { %v3556_v51 = vpop.f32.mrf.mxu0 }
 0x106   : > { %v3560_v55 = vpop.f32.mrf.mxu0 }
 0x109   : > { %487 = vmatmul.bf16.gmra.mxu0 %v347_v54 }
 0x10e   : > { %v3562_v56 = vpop.f32.mrf.mxu0 }
 0x116   : > { %v3566_v60 = vpop.f32.mrf.mxu0 }
 0x119   : > { %492 = vmatmul.bf16.gmra.mxu0 %v348_v59 }
 0x11e   : > { %v3568_v61 = vpop.f32.mrf.mxu0 }
 0x126   : > { %v3572_v1 = vpop.f32.mrf.mxu0 }
 0x129   : > { %497 = vmatmul.bf16.gmra.mxu0 %v349_v0 }
 0x12e   : > { %v3574_v2 = vpop.f32.mrf.mxu0 }
 0x136   : > { %v3578_v6 = vpop.f32.mrf.mxu0 }
 0x139   : > { %502 = vmatmul.bf16.gmra.mxu0 %v350_v5 }
 0x13e   : > { %v3580_v7 = vpop.f32.mrf.mxu0 }
 0x146   : > { %v3585_v9 = vpop.f32.mrf.mxu0 }
 0x14e   : > { %v3587_v10 = vpop.f32.mrf.mxu0 }
 0x156   : > { %v473_v13 = vpop.f32.mrf.mxu0 }
 0x157   : > { %v474_v14 = vadd.f32 %v3592_v12, %v473_v13 }
 0x159   : > { %v3597_v16 = vmax.f32 %v474_v14, 0.0 }
 0x15b   : > { %v726_v17 = vpack.c.bf16 %v3597_v16, %v3597_v16  ;;  %v628_v18 = vrot.slane %v3597_v16, 1 }
 0x15d   : > { %v822_v19 = vunpack.c.l.b16 %v726_v17  ;;  %v662_v20 = vsel %vm609_vm0, 0.0, %v628_v18 }
 0x15e   : > { %v475_v21 = vpop.f32.mrf.mxu0  ;;  %v758_v22 = vpack.c.bf16 %v662_v20, %v662_v20 }
 0x15f   : > { %v476_v23 = vadd.f32 %v3592_v12, %v475_v21  ;;  %v854_v24 = vpack.c.b16 %v822_v19, %v822_v19 }
 0x160   : > { %v982_v25 = vunpack.c.l.b16 %v758_v22 }
 0x161   : > { %v3606_v26 = vmax.f32 %v476_v23, 0.0  ;;  %904 = vrot.lane.b32.xlu0 %v854_v24, %s3351_s19 }
 0x162   : > { %v1014_v27 = vpack.c.b16 %v982_v25, %v982_v25 }
 0x163   : > { %v629_v28 = vrot.slane %v3606_v26, 1  ;;  %v727_v29 = vpack.c.bf16 %v3606_v26, %v3606_v26 }
 0x164   : > { %1064 = vrot.lane.b32.xlu1 %v1014_v27, %s3352_s15 }
 0x165   : > { %v823_v30 = vunpack.c.l.b16 %v727_v29  ;;  %v663_v31 = vsel %vm609_vm0, 0.0, %v629_v28 }
 0x166   : > { %v478_v32 = vpop.f32.mrf.mxu0  ;;  %v759_v33 = vpack.c.bf16 %v663_v31, %v663_v31 }
 0x167   : > { %v479_v34 = vadd.f32 %v3592_v12, %v478_v32  ;;  %v855_v37 = vpack.c.b16 %v823_v30, %v823_v30 }
 0x168   : > { %v983_v38 = vunpack.c.l.b16 %v759_v33 }
 0x169   : > { %v3616_v39 = vmax.f32 %v479_v34, 0.0  ;;  %906 = vrot.lane.b32.xlu0 %v855_v37, %s3351_s19 }
 0x16a   : > { %v1015_v42 = vpack.c.b16 %v983_v38, %v983_v38 }
 0x16b   : > { %v630_v43 = vrot.slane %v3616_v39, 1  ;;  %v728_v44 = vpack.c.bf16 %v3616_v39, %v3616_v39 }
 0x16c   : > { %1066 = vrot.lane.b32.xlu1 %v1015_v42, %s3352_s15 }
 0x16d   : > { %v824_v48 = vunpack.c.l.b16 %v728_v44  ;;  %v664_v49 = vsel %vm609_vm0, 0.0, %v630_v43 }
 0x16e   : > { %v480_v52 = vpop.f32.mrf.mxu0  ;;  %v760_v53 = vpack.c.bf16 %v664_v49, %v664_v49 }
 0x16f   : > { %v481_v54 = vadd.f32 %v3592_v12, %v480_v52  ;;  %v856_v57 = vpack.c.b16 %v824_v48, %v824_v48 }
 0x170   : > { %v984_v58 = vunpack.c.l.b16 %v760_v53 }
 0x171   : > { %v3629_v59 = vmax.f32 %v481_v54, 0.0  ;;  %908 = vrot.lane.b32.xlu2 %v856_v57, %s3351_s19 }
 0x172   : > { %v1016_v62 = vpack.c.b16 %v984_v58, %v984_v58 }
 0x173   : > { %v631_v63 = vrot.slane %v3629_v59, 1  ;;  %v729_v0 = vpack.c.bf16 %v3629_v59, %v3629_v59 }
 0x174   : > { %1068 = vrot.lane.b32.xlu0 %v1016_v62, %s3352_s15 }
 0x175   : > { %v825_v3 = vunpack.c.l.b16 %v729_v0  ;;  %v665_v4 = vsel %vm609_vm0, 0.0, %v631_v63 }
 0x176   : > { %v483_v5 = vpop.f32.mrf.mxu0  ;;  %v761_v8 = vpack.c.bf16 %v665_v4, %v665_v4 }
 0x177   : > { %v484_v11 = vadd.f32 %v3592_v12, %v483_v5  ;;  %v857_v13 = vpack.c.b16 %v825_v3, %v825_v3 }
 0x178   : > { %v985_v14 = vunpack.c.l.b16 %v761_v8 }
 0x179   : > { %v3639_v17 = vmax.f32 %v484_v11, 0.0  ;;  %910 = vrot.lane.b32.xlu2 %v857_v13, %s3351_s19  ;;  %v3116_v11 = vld [vmem:[%s4484_s3 + $0x48] sm:$0xff] }
 0x17a   : > { %v1017_v18 = vpack.c.b16 %v985_v14, %v985_v14  ;;  %1598 = vmatpush.bf16.msrb.mxu0 %v3116_v11  ;;  %3184 = vmatpush.bf16.msra.mxu2 %v3116_v11 }
 0x17b   : > { %v632_v19 = vrot.slane %v3639_v17, 1  ;;  %v730_v20 = vpack.c.bf16 %v3639_v17, %v3639_v17  ;;  %3185 = vmatpush.bf16.msra.mxu3 %v3116_v11  ;;  %3183 = vmatpush.bf16.msra.mxu1 %v3116_v11 }
 0x17c   : > { %1070 = vrot.lane.b32.xlu1 %v1017_v18, %s3352_s15 }
 0x17d   : > { %v826_v21 = vunpack.c.l.b16 %v730_v20  ;;  %v666_v22 = vsel %vm609_vm0, 0.0, %v632_v19 }
 0x17e   : > { %v485_v23 = vpop.f32.mrf.mxu0  ;;  %v762_v24 = vpack.c.bf16 %v666_v22, %v666_v22 }
 0x17f   : > { %v486_v25 = vadd.f32 %v3592_v12, %v485_v23  ;;  %v858_v27 = vpack.c.b16 %v826_v21, %v826_v21 }
 0x180   : > { %v986_v28 = vunpack.c.l.b16 %v762_v24 }
 0x181   : > { %v3649_v29 = vmax.f32 %v486_v25, 0.0  ;;  %912 = vrot.lane.b32.xlu2 %v858_v27, %s3351_s19 }
 0x182   : > { %v1018_v30 = vpack.c.b16 %v986_v28, %v986_v28 }
 0x183   : > { %v633_v31 = vrot.slane %v3649_v29, 1  ;;  %v731_v32 = vpack.c.bf16 %v3649_v29, %v3649_v29 }
 0x184   : > { %1072 = vrot.lane.b32.xlu1 %v1018_v30, %s3352_s15 }
 0x185   : > { %v827_v33 = vunpack.c.l.b16 %v731_v32  ;;  %v667_v34 = vsel %vm609_vm0, 0.0, %v633_v31 }
 0x186   : > { %v488_v37 = vpop.f32.mrf.mxu0  ;;  %v763_v38 = vpack.c.bf16 %v667_v34, %v667_v34 }
 0x187   : > { %v489_v42 = vadd.f32 %v3592_v12, %v488_v37  ;;  %v859_v43 = vpack.c.b16 %v827_v33, %v827_v33 }
 0x188   : > { %v987_v44 = vunpack.c.l.b16 %v763_v38 }
 0x189   : > { %v3659_v47 = vmax.f32 %v489_v42, 0.0  ;;  %914 = vrot.lane.b32.xlu0 %v859_v43, %s3351_s19 }
 0x18a   : > { %v1019_v48 = vpack.c.b16 %v987_v44, %v987_v44 }
 0x18b   : > { %v634_v49 = vrot.slane %v3659_v47, 1  ;;  %v732_v52 = vpack.c.bf16 %v3659_v47, %v3659_v47 }
 0x18c   : > { %1074 = vrot.lane.b32.xlu2 %v1019_v48, %s3352_s15 }
 0x18d   : > { %v828_v53 = vunpack.c.l.b16 %v732_v52  ;;  %v668_v54 = vsel %vm609_vm0, 0.0, %v634_v49 }
 0x18e   : > { %v490_v57 = vpop.f32.mrf.mxu0  ;;  %v764_v58 = vpack.c.bf16 %v668_v54, %v668_v54 }
 0x18f   : > { %v491_v62 = vadd.f32 %v3592_v12, %v490_v57  ;;  %v860_v63 = vpack.c.b16 %v828_v53, %v828_v53 }
 0x190   : > { %v988_v0 = vunpack.c.l.b16 %v764_v58 }
 0x191   : > { %v3669_v3 = vmax.f32 %v491_v62, 0.0  ;;  %916 = vrot.lane.b32.xlu0 %v860_v63, %s3351_s19 }
 0x192   : > { %v1020_v4 = vpack.c.b16 %v988_v0, %v988_v0 }
 0x193   : > { %v635_v5 = vrot.slane %v3669_v3, 1  ;;  %v733_v8 = vpack.c.bf16 %v3669_v3, %v3669_v3 }
 0x194   : > { %1076 = vrot.lane.b32.xlu2 %v1020_v4, %s3352_s15 }
 0x195   : > { %v829_v13 = vunpack.c.l.b16 %v733_v8  ;;  %v669_v14 = vsel %vm609_vm0, 0.0, %v635_v5 }
 0x196   : > { %v493_v18 = vpop.f32.mrf.mxu0  ;;  %v765_v19 = vpack.c.bf16 %v669_v14, %v669_v14 }
 0x197   : > { %v861_v20 = vpack.c.b16 %v829_v13, %v829_v13  ;;  %v494_v30 = vadd.f32 %v3592_v12, %v493_v18 }
 0x198   : > { %v989_v21 = vunpack.c.l.b16 %v765_v19 }
 0x199   : > { %918 = vrot.lane.b32.xlu1 %v861_v20, %s3351_s19  ;;  %v3695_v43 = vmax.f32 %v494_v30, 0.0 }
 0x19a   : > { %v1021_v22 = vpack.c.b16 %v989_v21, %v989_v21 }
 0x19b   : > { %v636_v57 = vrot.slane %v3695_v43, 1  ;;  %v734_v14 = vpack.c.bf16 %v3695_v43, %v3695_v43 }
 0x19c   : > { %1078 = vrot.lane.b32.xlu0 %v1021_v22, %s3352_s15 }
 0x19d   : > { %v670_v18 = vsel %vm609_vm0, 0.0, %v636_v57  ;;  %v431_v57 = vadd.f32 %v3592_v12, %v3538_v36 }
 0x19e   : > { %v495_v23 = vpop.f32.mrf.mxu0 }
 0x19f   : > { %v496_v28 = vadd.f32 %v3592_v12, %v495_v23 }
 0x1a1   : > { %v3693_v37 = vmax.f32 %v496_v28, 0.0 }
 0x1a3   : > { %v735_v54 = vpack.c.bf16 %v3693_v37, %v3693_v37  ;;  %v637_v19 = vrot.slane %v3693_v37, 1 }
 0x1a5   : > { %v831_v5 = vunpack.c.l.b16 %v735_v54  ;;  %v671_v30 = vsel %vm609_vm0, 0.0, %v637_v19 }
 0x1a6   : > { %v498_v24 = vpop.f32.mrf.mxu0 }
 0x1a7   : > { %v499_v25 = vadd.f32 %v3592_v12, %v498_v24  ;;  %v863_v22 = vpack.c.b16 %v831_v5, %v831_v5  ;;  %v766_v24 = vpack.c.bf16 %v670_v18, %v670_v18 }
 0x1a9   : > { %v3684_v27 = vmax.f32 %v499_v25, 0.0  ;;  %v830_v25 = vunpack.c.l.b16 %v734_v14 }
 0x1ab   : > { %v638_v31 = vrot.slane %v3684_v27, 1  ;;  %v736_v32 = vpack.c.bf16 %v3684_v27, %v3684_v27 }
 0x1ad   : > { %v832_v33 = vunpack.c.l.b16 %v736_v32  ;;  %v672_v34 = vsel %vm609_vm0, 0.0, %v638_v31  ;;  %v3115_v31 = vld [vmem:[%s4484_s3 + $0x40] sm:$0xff] }
 0x1ae   : > { %v500_v38 = vpop.f32.mrf.mxu0  ;;  %v768_v42 = vpack.c.bf16 %v672_v34, %v672_v34  ;;  %v990_v34 = vunpack.c.l.b16 %v766_v24  ;;  %1599 = vmatpush.bf16.msrb.mxu0 %v3115_v31  ;;  %3187 = vmatpush.bf16.msra.mxu2 %v3115_v31 }
 0x1af   : > { %v501_v44 = vadd.f32 %v3592_v12, %v500_v38  ;;  %v864_v48 = vpack.c.b16 %v832_v33, %v832_v33  ;;  %3188 = vmatpush.bf16.msra.mxu3 %v3115_v31  ;;  %3186 = vmatpush.bf16.msra.mxu1 %v3115_v31 }
 0x1b0   : > { %v992_v49 = vunpack.c.l.b16 %v768_v42  ;;  %v862_v42 = vpack.c.b16 %v830_v25, %v830_v25  ;;  %v436_v25 = vadd.f32 %v3592_v12, %v3544_v41 }
 0x1b1   : > { %v3698_v52 = vmax.f32 %v501_v44, 0.0  ;;  %924 = vrot.lane.b32.xlu1 %v864_v48, %s3351_s19  ;;  %v767_v44 = vpack.c.bf16 %v671_v30, %v671_v30  ;;  %v429_v48 = vadd.f32 %v3592_v12, %v3536_v35  ;;  %v434_v35 = vadd.f32 %v3592_v12, %v3542_v40  ;;  %v3113_v40 = vld [vmem:[%s4484_s3 + $0x30] sm:$0xff] }
 0x1b2   : > { %v1024_v53 = vpack.c.b16 %v992_v49, %v992_v49 }
 0x1b3   : > { %v639_v58 = vrot.slane %v3698_v52, 1  ;;  %v737_v62 = vpack.c.bf16 %v3698_v52, %v3698_v52  ;;  %v3745_v5 = vmax.f32 %v429_v48, 0.0  ;;  %v3758_v18 = vmax.f32 %v434_v35, 0.0 }
 0x1b4   : > { %1084 = vrot.lane.b32.xlu0 %v1024_v53, %s3352_s15  ;;  %v3114_v53 = vld [vmem:[%s4484_s3 + $0x38] sm:$0xff] }
 0x1b5   : > { %v833_v63 = vunpack.c.l.b16 %v737_v62  ;;  %v673_v0 = vsel %vm609_vm0, 0.0, %v639_v58  ;;  %v1022_v62 = vpack.c.b16 %v990_v34, %v990_v34  ;;  %3190 = vmatpush.bf16.msra.mxu2 %v3114_v53  ;;  %1600 = vmatpush.bf16.msrb.mxu0 %v3114_v53  ;;  %v708_v24 = vpack.c.bf16 %v3745_v5, %v3745_v5 }
 0x1b6   : > { %v503_v4 = vpop.f32.mrf.mxu0  ;;  %v769_v8 = vpack.c.bf16 %v673_v0, %v673_v0  ;;  %v991_v0 = vunpack.c.l.b16 %v767_v44  ;;  %3191 = vmatpush.bf16.msra.mxu3 %v3114_v53  ;;  %3189 = vmatpush.bf16.msra.mxu1 %v3114_v53  ;;  %v3774_v44 = vmax.f32 %v436_v25, 0.0 }
 0x1b7   : > { %v504_v11 = vadd.f32 %v3592_v12, %v503_v4  ;;  %v865_v13 = vpack.c.b16 %v833_v63, %v833_v63 }
 0x1b8   : > { %v993_v20 = vunpack.c.l.b16 %v769_v8  ;;  %v1023_v19 = vpack.c.b16 %v991_v0, %v991_v0  ;;  %v613_v35 = vrot.slane %v3774_v44, 1 }
 0x1b9   : > { %v3716_v21 = vmax.f32 %v504_v11, 0.0  ;;  %926 = vrot.lane.b32.xlu2 %v865_v13, %s3351_s19  ;;  %v3756_v11 = vmax.f32 %v431_v57, 0.0  ;;  %3193 = vmatpush.bf16.msra.mxu2 %v3113_v40 }
 0x1ba   : > { %v1025_v23 = vpack.c.b16 %v993_v20, %v993_v20  ;;  %1601 = vmatpush.bf16.msrb.mxu0 %v3113_v40  ;;  %3194 = vmatpush.bf16.msra.mxu3 %v3113_v40 }
 0x1bb   : > { %v738_v28 = vpack.c.bf16 %v3716_v21, %v3716_v21  ;;  %v640_v49 = vrot.slane %v3716_v21, 1  ;;  %3192 = vmatpush.bf16.msra.mxu1 %v3113_v40  ;;  %v709_v31 = vpack.c.bf16 %v3756_v11, %v3756_v11  ;;  %v611_v57 = vrot.slane %v3756_v11, 1 }
 0x1bc   : > { %922 = vrot.lane.b32.xlu0 %v863_v22, %s3351_s19  ;;  %1086 = vrot.lane.b32.xlu1 %v1025_v23, %s3352_s15  ;;  %v610_v22 = vrot.slane %v3745_v5, 1 }
 0x1bd   : > { %v834_v33 = vunpack.c.l.b16 %v738_v28  ;;  %v674_v36 = vsel %vm609_vm0, 0.0, %v640_v49  ;;  %v805_v41 = vunpack.c.l.b16 %v709_v31 }
 0x1be   : > { %v505_v32 = vpop.f32.mrf.mxu0  ;;  %v770_v20 = vpack.c.bf16 %v674_v36, %v674_v36  ;;  %v644_v34 = vsel %vm609_vm0, 0.0, %v610_v22 }
 0x1bf   : > { %v506_v38 = vadd.f32 %v3592_v12, %v505_v32  ;;  %v866_v58 = vpack.c.b16 %v834_v33, %v834_v33  ;;  %v612_v32 = vrot.slane %v3758_v18, 1  ;;  %v740_v49 = vpack.c.bf16 %v644_v34, %v644_v34 }
 0x1c0   : > { %v994_v33 = vunpack.c.l.b16 %v770_v20  ;;  %v837_v0 = vpack.c.b16 %v805_v41, %v805_v41 }
 0x1c1   : > { %v3735_v54 = vmax.f32 %v506_v38, 0.0  ;;  %920 = vrot.lane.b32.xlu2 %v862_v42, %s3351_s19  ;;  %v561_v38 = vrot.slane %v3597_v16, 7  ;;  %v804_v42 = vunpack.c.l.b16 %v708_v24  ;;  %v646_v53 = vsel %vm609_vm0, 0.0, %v612_v32 }
 0x1c2   : > { %v1026_v48 = vpack.c.b16 %v994_v33, %v994_v33  ;;  %v710_v16 = vpack.c.bf16 %v3758_v18, %v3758_v18  ;;  %v964_v40 = vunpack.c.l.b16 %v740_v49  ;;  %v647_v24 = vsel %vm609_vm0, 0.0, %v613_v35 }
 0x1c3   : > { %v641_v63 = vrot.slane %v3735_v54, 1  ;;  %v739_v4 = vpack.c.bf16 %v3735_v54, %v3735_v54  ;;  %v743_v32 = vpack.c.bf16 %v647_v24, %v647_v24  ;;  %v711_v33 = vpack.c.bf16 %v3774_v44, %v3774_v44 }
 0x1c4   : > { %928 = vrot.lane.b32.xlu0 %v866_v58, %s3351_s19  ;;  %1080 = vrot.lane.b32.xlu1 %v1022_v62, %s3352_s15  ;;  %v595_v58 = vsel %vm542_vm1, 0.0, %v561_v38  ;;  %v836_v62 = vpack.c.b16 %v804_v42, %v804_v42  ;;  %v444_v38 = vadd.f32 %v3592_v12, %v3554_v50 }
 0x1c5   : > { %v675_v8 = vsel %vm609_vm0, 0.0, %v641_v63  ;;  %v835_v14 = vunpack.c.l.b16 %v739_v4  ;;  %v439_v63 = vadd.f32 %v3592_v12, %v3548_v45  ;;  %v742_v4 = vpack.c.bf16 %v646_v53, %v646_v53 }
 0x1c6   : > { %v771_v13 = vpack.c.bf16 %v675_v8, %v675_v8  ;;  %v694_v8 = vpack.c.bf16 %v595_v58, %v595_v58  ;;  %v967_v58 = vunpack.c.l.b16 %v743_v32 }
 0x1c7   : > { %v867_v30 = vpack.c.b16 %v835_v14, %v835_v14  ;;  %v562_v14 = vrot.slane %v3606_v26, 7  ;;  %v3793_v20 = vmax.f32 %v439_v63, 0.0  ;;  %v441_v26 = vadd.f32 %v3592_v12, %v3550_v46 }
 0x1c8   : > { %v995_v23 = vunpack.c.l.b16 %v771_v13  ;;  %v645_v13 = vsel %vm609_vm0, 0.0, %v611_v57  ;;  %v563_v57 = vrot.slane %v3616_v39, 7 }
 0x1c9   : > { %1082 = vrot.lane.b32.xlu2 %v1023_v19, %s3352_s15  ;;  %v806_v19 = vunpack.c.l.b16 %v710_v16  ;;  %v596_v31 = vsel %vm542_vm1, 0.0, %v562_v14  ;;  %v614_v34 = vrot.slane %v3793_v20, 1  ;;  %v3812_v46 = vmax.f32 %v441_v26, 0.0 }
 0x1ca   : > { %v1027_v28 = vpack.c.b16 %v995_v23, %v995_v23  ;;  %v966_v23 = vunpack.c.l.b16 %v742_v4  ;;  %v695_v53 = vpack.c.bf16 %v596_v31, %v596_v31  ;;  %v3815_v16 = vmax.f32 %v444_v38, 0.0  ;;  %v3112_v38 = vld [vmem:[%s4484_s3 + $0x28] sm:$0xff] }
 0x1cb   : > { %v838_v41 = vpack.c.b16 %v806_v19, %v806_v19  ;;  %v909_v35 = vpop.permute.xlu2 %908  ;;  %v615_v39 = vrot.slane %v3812_v46, 1  ;;  %v597_v14 = vsel %vm542_vm1, 0.0, %v563_v57  ;;  %1849 = vmatpush.bf16.msrb.mxu2 %v3112_v38 }
 0x1cc   : > { %1090 = vrot.lane.b32.xlu0 %v1027_v28, %s3352_s15  ;;  %930 = vrot.lane.b32.xlu1 %v867_v30, %s3351_s19  ;;  %v996_v28 = vpack.c.b16 %v964_v40, %v964_v40  ;;  %v741_v30 = vpack.c.bf16 %v645_v13, %v645_v13  ;;  %v998_v42 = vpack.c.b16 %v966_v23, %v966_v23 }
 0x1cd   : > { %v712_v40 = vpack.c.bf16 %v3793_v20, %v3793_v20  ;;  %v446_v13 = vadd.f32 %v3592_v12, %v3556_v51  ;;  %v714_v24 = vpack.c.bf16 %v3815_v16, %v3815_v16  ;;  %v696_v51 = vpack.c.bf16 %v597_v14, %v597_v14 }
 0x1ce   : > { %v965_v49 = vunpack.c.l.b16 %v741_v30  ;;  %v649_v26 = vsel %vm609_vm0, 0.0, %v615_v39  ;;  %v565_v39 = vrot.slane %v3639_v17, 7 }
 0x1cf   : > { %v1155_v32 = vsel %vm1092_vm3, %v696_v51, %v909_v35  ;;  %v745_v35 = vpack.c.bf16 %v649_v26, %v649_v26 }
 0x1d1   : > { %1088 = vrot.lane.b32.xlu2 %v1026_v48, %s3352_s15 }
 0x1d3   : > { %v905_v36 = vpop.permute.xlu0 %904 }
 0x1d4   : > { %870 = vrot.lane.b32.xlu0 %v837_v0, %s3351_s19  ;;  %868 = vrot.lane.b32.xlu1 %v836_v62, %s3351_s19  ;;  %v1149_v45 = vsel %vm1092_vm3, %v694_v8, %v905_v36  ;;  %v807_v62 = vunpack.c.l.b16 %v711_v33  ;;  %v648_v0 = vsel %vm609_vm0, 0.0, %v614_v34  ;;  %v997_v36 = vpack.c.b16 %v965_v49, %v965_v49 }
 0x1d5   : > { %v3353_v8 = vmov 0   ;;  %v744_v19 = vpack.c.bf16 %v648_v0, %v648_v0  ;;  %v810_v34 = vunpack.c.l.b16 %v714_v24  ;;  %v616_v49 = vrot.slane %v3815_v16, 1 }
 0x1d6   : > { %v1065_v22 = vpop.permute.xlu1 %1064  ;;  %1287 = vst.msk [vmem:[#allocation2] sm:$0xf] %vm1286_vm4, %v3353_v8  ;;  %v839_v23 = vpack.c.b16 %v807_v62, %v807_v62 }
 0x1d7   : > { %v1245_v25 = vsel %vm1189_vm2, %v1149_v45, %v1065_v22  ;;  %1288 = vst.msk [vmem:[#allocation2 + $0x28] sm:$0xf] %vm1286_vm4, %v3353_v8  ;;  %v449_v45 = vadd.f32 %v3592_v12, %v3560_v55  ;;  %v999_v22 = vpack.c.b16 %v967_v58, %v967_v58  ;;  %v564_v55 = vrot.slane %v3629_v59, 7 }
 0x1d8   : > { %1315 = vst.msk [vmem:[#allocation2 + $0x5c] sm:$0xf] %vm1286_vm4, %v1245_v25  ;;  %v808_v25 = vunpack.c.l.b16 %v712_v40  ;;  %v968_v30 = vunpack.c.l.b16 %v744_v19  ;;  %v842_v0 = vpack.c.b16 %v810_v34, %v810_v34 }
 0x1d9   : > { %1028 = vrot.lane.b32.xlu2 %v996_v28, %s3352_s15  ;;  %1289 = vst.msk [vmem:[#allocation2 + $0x50] sm:$0xf] %vm1286_vm4, %v3353_v8  ;;  %v3841_v28 = vmax.f32 %v446_v13, 0.0  ;;  %v3847_v31 = vmax.f32 %v449_v45, 0.0  ;;  %v598_v58 = vsel %vm542_vm1, 0.0, %v564_v55  ;;  %v969_v13 = vunpack.c.l.b16 %v745_v35 }
 0x1da   : > { %1290 = vst.msk [vmem:[#allocation2 + $0x78] sm:$0xf] %vm1286_vm4, %v3353_v8  ;;  %v1000_v62 = vpack.c.b16 %v968_v30, %v968_v30  ;;  %v697_v40 = vpack.c.bf16 %v598_v58, %v598_v58  ;;  %v599_v55 = vsel %vm542_vm1, 0.0, %v565_v39 }
 0x1db   : > { %v907_v48 = vpop.permute.xlu0 %906  ;;  %1292 = vst.msk [vmem:[#allocation2 + $0x24] sm:$0xf] %vm1286_vm4, %v3353_v8  ;;  %v617_v57 = vrot.slane %v3841_v28, 1  ;;  %v1001_v38 = vpack.c.b16 %v969_v13, %v969_v13  ;;  %v456_v13 = vadd.f32 %v3592_v12, %v3568_v61 }
 0x1dc   : > { %1032 = vrot.lane.b32.xlu0 %v998_v42, %s3352_s15  ;;  %872 = vrot.lane.b32.xlu1 %v838_v41, %s3351_s19  ;;  %v1152_v50 = vsel %vm1092_vm3, %v695_v53, %v907_v48  ;;  %1293 = vst.msk [vmem:[#allocation2 + $0x4c] sm:$0xf] %vm1286_vm4, %v3353_v8  ;;  %v840_v42 = vpack.c.b16 %v808_v25, %v808_v25  ;;  %v911_v53 = vpop.permute.xlu2 %910 }
 0x1dd   : > { %1294 = vst.msk [vmem:[#allocation2 + $0x74] sm:$0xf] %vm1286_vm4, %v3353_v8  ;;  %v713_v48 = vpack.c.bf16 %v3812_v46, %v3812_v46  ;;  %v651_v14 = vsel %vm609_vm0, 0.0, %v617_v57  ;;  %v1158_v19 = vsel %vm1092_vm3, %v697_v40, %v911_v53  ;;  %v3921_v61 = vmax.f32 %v456_v13, 0.0 }
 0x1de   : > { %v1067_v63 = vpop.permute.xlu1 %1066  ;;  %1295 = vst.msk [vmem:[#allocation2 + $0x9c] sm:$0xf] %vm1286_vm4, %v3353_v8  ;;  %v650_v8 = vsel %vm609_vm0, 0.0, %v616_v49  ;;  %v747_v17 = vpack.c.bf16 %v651_v14, %v651_v14  ;;  %v3111_v49 = vld [vmem:[%s4484_s3 + $0x20] sm:$0xff]  ;;  %v459_v14 = vadd.f32 %v3592_v12, %v3572_v1 }
 0x1df   : > { %v1248_v4 = vsel %vm1189_vm2, %v1152_v50, %v1067_v63  ;;  %v618_v50 = vrot.slane %v3847_v31, 1  ;;  %v451_v63 = vadd.f32 %v3592_v12, %v3562_v56  ;;  %v746_v51 = vpack.c.bf16 %v650_v8, %v650_v8  ;;  %1850 = vmatpush.bf16.msrb.mxu2 %v3111_v49 }
 0x1e0   : > { %1316 = vst.msk [vmem:[#allocation2 + $0x60] sm:$0xf] %vm1286_vm4, %v1248_v4  ;;  %v715_v4 = vpack.c.bf16 %v3841_v28, %v3841_v28  ;;  %v464_v49 = vadd.f32 %v3592_v12, %v3578_v6 }
 0x1e1   : > { %1030 = vrot.lane.b32.xlu2 %v997_v36, %s3352_s15  ;;  %v809_v36 = vunpack.c.l.b16 %v713_v48  ;;  %v3877_v56 = vmax.f32 %v451_v63, 0.0  ;;  %v971_v48 = vunpack.c.l.b16 %v747_v17 }
 0x1e3   : > { %v841_v25 = vpack.c.b16 %v809_v36, %v809_v36  ;;  %v619_v26 = vrot.slane %v3877_v56, 1  ;;  %v717_v8 = vpack.c.bf16 %v3877_v56, %v3877_v56 }
 0x1e4   : > { %1034 = vrot.lane.b32.xlu0 %v999_v22, %s3352_s15  ;;  %874 = vrot.lane.b32.xlu1 %v839_v23, %s3351_s19  ;;  %v811_v22 = vunpack.c.l.b16 %v715_v4  ;;  %v652_v23 = vsel %vm609_vm0, 0.0, %v618_v50  ;;  %v1003_v4 = vpack.c.b16 %v971_v48, %v971_v48 }
 0x1e5   : > { %v748_v30 = vpack.c.bf16 %v652_v23, %v652_v23 }
 0x1e6   : > { %v1069_v33 = vpop.permute.xlu0 %1068  ;;  %v843_v34 = vpack.c.b16 %v811_v22, %v811_v22  ;;  %v567_v22 = vrot.slane %v3659_v47, 7 }
 0x1e7   : > { %v1251_v59 = vsel %vm1189_vm2, %v1155_v32, %v1069_v33  ;;  %v3150_v41 = vld [vmem:[#allocation2 + $0x5c] sm:$0xff]  ;;  %v454_v32 = vadd.f32 %v3592_v12, %v3566_v60  ;;  %v913_v33 = vpop.permute.xlu2 %912  ;;  %v972_v53 = vunpack.c.l.b16 %v748_v30  ;;  %v3923_v30 = vmax.f32 %v459_v14, 0.0 }
 0x1e8   : > { %1317 = vst.msk [vmem:[#allocation2 + $0x64] sm:$0xf] %vm1286_vm4, %v1251_v59  ;;  %2852 = vmatmul.msk.bf16.vlgmr.msra.gmra.mxu2 %vm1545_vm5, %v3150_v41  ;;  %v566_v59 = vrot.slane %v3649_v29, 7  ;;  %v698_v41 = vpack.c.bf16 %v599_v55, %v599_v55  ;;  %v653_v29 = vsel %vm609_vm0, 0.0, %v619_v26  ;;  %v813_v55 = vunpack.c.l.b16 %v717_v8 }
 0x1e9   : > { %876 = vrot.lane.b32.xlu2 %v840_v42, %s3351_s19  ;;  %v970_v42 = vunpack.c.l.b16 %v746_v51  ;;  %v3896_v57 = vmax.f32 %v454_v32, 0.0  ;;  %v1004_v36 = vpack.c.b16 %v972_v53, %v972_v53  ;;  %v749_v40 = vpack.c.bf16 %v653_v29, %v653_v29 }
 0x1ea   : > { %v1161_v60 = vsel %vm1092_vm3, %v698_v41, %v913_v33  ;;  %v600_v63 = vsel %vm542_vm1, 0.0, %v566_v59  ;;  %v601_v26 = vsel %vm542_vm1, 0.0, %v567_v22  ;;  %v621_v59 = vrot.slane %v3921_v61, 1 }
 0x1eb   : > { %v1002_v35 = vpack.c.b16 %v970_v42, %v970_v42  ;;  %v620_v39 = vrot.slane %v3896_v57, 1  ;;  %v973_v17 = vunpack.c.l.b16 %v749_v40  ;;  %v718_v32 = vpack.c.bf16 %v3896_v57, %v3896_v57 }
 0x1ec   : > { %880 = vrot.lane.b32.xlu0 %v842_v0, %s3351_s19  ;;  %1036 = vrot.lane.b32.xlu1 %v1000_v62, %s3352_s15  ;;  %v716_v0 = vpack.c.bf16 %v3847_v31, %v3847_v31  ;;  %v461_v42 = vadd.f32 %v3592_v12, %v3574_v2  ;;  %v700_v41 = vpack.c.bf16 %v601_v26, %v601_v26  ;;  %v3110_v2 = vld [vmem:[%s4484_s3 + $0x18] sm:$0xff] }
 0x1ed   : > { %v654_v1 = vsel %vm609_vm0, 0.0, %v620_v39  ;;  %v1005_v33 = vpack.c.b16 %v973_v17, %v973_v17  ;;  %v720_v48 = vpack.c.bf16 %v3923_v30, %v3923_v30  ;;  %1851 = vmatpush.bf16.msrb.mxu2 %v3110_v2  ;;  %v719_v8 = vpack.c.bf16 %v3921_v61, %v3921_v61 }
 0x1ee   : > { %v1071_v45 = vpop.permute.xlu1 %1070 }
 0x1ef   : > { %v1254_v24 = vsel %vm1189_vm2, %v1158_v19, %v1071_v45  ;;  %v1075_v19 = vpop.permute.xlu2 %1074  ;;  %v699_v45 = vpack.c.bf16 %v600_v63, %v600_v63  ;;  %v816_v6 = vunpack.c.l.b16 %v720_v48  ;;  %v469_v48 = vadd.f32 %v3592_v12, %v3585_v9 }
 0x1f0   : > { %1318 = vst.msk [vmem:[#allocation2 + $0x68] sm:$0xf] %vm1286_vm4, %v1254_v24  ;;  %v812_v24 = vunpack.c.l.b16 %v716_v0  ;;  %v655_v0 = vsel %vm609_vm0, 0.0, %v621_v59  ;;  %v466_v59 = vadd.f32 %v3592_v12, %v3580_v7  ;;  %v471_v7 = vadd.f32 %v3592_v12, %v3587_v10 }
 0x1f1   : > { %878 = vrot.lane.b32.xlu2 %v841_v25, %s3351_s19  ;;  %v751_v13 = vpack.c.bf16 %v655_v0, %v655_v0  ;;  %v848_v14 = vpack.c.b16 %v816_v6, %v816_v6 }
 0x1f2   : > { %v844_v47 = vpack.c.b16 %v812_v24, %v812_v24  ;;  %v815_v24 = vunpack.c.l.b16 %v719_v8  ;;  %v3989_v2 = vmax.f32 %v466_v59, 0.0 }
 0x1f3   : > { %v975_v17 = vunpack.c.l.b16 %v751_v13 }
 0x1f4   : > { %882 = vrot.lane.b32.xlu0 %v843_v34, %s3351_s19  ;;  %1038 = vrot.lane.b32.xlu1 %v1001_v38, %s3352_s15  ;;  %v845_v34 = vpack.c.b16 %v813_v55, %v813_v55  ;;  %v750_v38 = vpack.c.bf16 %v654_v1, %v654_v1  ;;  %v723_v13 = vpack.c.bf16 %v3989_v2, %v3989_v2 }
 0x1f6   : > { %v1073_v58 = vpop.permute.xlu1 %1072  ;;  %v974_v63 = vunpack.c.l.b16 %v750_v38 }
 0x1f7   : > { %v1257_v62 = vsel %vm1189_vm2, %v1161_v60, %v1073_v58  ;;  %v3151_v50 = vld [vmem:[#allocation2 + $0x64] sm:$0xff]  ;;  %v814_v60 = vunpack.c.l.b16 %v718_v32  ;;  %v1077_v58 = vpop.permute.xlu2 %1076  ;;  %v847_v32 = vpack.c.b16 %v815_v24, %v815_v24  ;;  %v571_v24 = vrot.slane %v3684_v27, 7 }
 0x1f8   : > { %1319 = vst.msk [vmem:[#allocation2 + $0x6c] sm:$0xf] %vm1286_vm4, %v1257_v62  ;;  %2853 = vmatmul.msk.bf16.gmra.mxu2 %vm1545_vm5, %v3151_v50  ;;  %v568_v62 = vrot.slane %v3669_v3, 7  ;;  %v3948_v50 = vmax.f32 %v461_v42, 0.0  ;;  %v622_v3 = vrot.slane %v3923_v30, 1  ;;  %v1007_v42 = vpack.c.b16 %v975_v17, %v975_v17  ;;  %v3123_v27 = vld [vmem:[%s4484_s3 + $0x80] sm:$0xff] }
 0x1f9   : > { %1040 = vrot.lane.b32.xlu2 %v1002_v35, %s3352_s15 }
 0x1fa   : > { %v602_v39 = vsel %vm542_vm1, 0.0, %v568_v62  ;;  %v623_v38 = vrot.slane %v3948_v50, 1  ;;  %v3995_v62 = vmax.f32 %v469_v48, 0.0 }
 0x1fb   : > { %v915_v23 = vpop.permute.xlu0 %914 }
 0x1fc   : > { %v1164_v25 = vsel %vm1092_vm3, %v699_v45, %v915_v23  ;;  %1044 = vrot.lane.b32.xlu0 %v1004_v36, %s3352_s15  ;;  %1042 = vrot.lane.b32.xlu1 %v1003_v4, %s3352_s15  ;;  %v3953_v4 = vmax.f32 %v464_v49, 0.0  ;;  %v846_v36 = vpack.c.b16 %v814_v60, %v814_v60  ;;  %v721_v45 = vpack.c.bf16 %v3948_v50, %v3948_v50 }
 0x1fd   : > { %v1260_v51 = vsel %vm1189_vm2, %v1164_v25, %v1075_v19  ;;  %v1006_v19 = vpack.c.b16 %v974_v63, %v974_v63  ;;  %v701_v25 = vpack.c.bf16 %v602_v39, %v602_v39  ;;  %v657_v9 = vsel %vm609_vm0, 0.0, %v623_v38 }
 0x1fe   : > { %1320 = vst.msk [vmem:[#allocation2 + $0x70] sm:$0xf] %vm1286_vm4, %v1260_v51  ;;  %v624_v22 = vrot.slane %v3953_v4, 1  ;;  %v656_v51 = vsel %vm609_vm0, 0.0, %v622_v3  ;;  %v722_v60 = vpack.c.bf16 %v3953_v4, %v3953_v4  ;;  %v3997_v63 = vmax.f32 %v471_v7, 0.0 }
 0x1ff   : > { %v753_v0 = vpack.c.bf16 %v657_v9, %v657_v9  ;;  %v724_v39 = vpack.c.bf16 %v3995_v62, %v3995_v62  ;;  %v570_v7 = vrot.slane %v3693_v37, 7 }
 0x200   : > { %v818_v6 = vunpack.c.l.b16 %v722_v60  ;;  %v572_v60 = vrot.slane %v3698_v52, 7 }
 0x201   : > { %884 = vrot.lane.b32.xlu2 %v844_v47, %s3351_s19  ;;  %v817_v47 = vunpack.c.l.b16 %v721_v45 }
 0x202   : > { %v850_v3 = vpack.c.b16 %v818_v6, %v818_v6 }
 0x203   : > { %v917_v53 = vpop.permute.xlu0 %916  ;;  %v849_v49 = vpack.c.b16 %v817_v47, %v817_v47 }
 0x204   : > { %v1167_v29 = vsel %vm1092_vm3, %v700_v41, %v917_v53  ;;  %1046 = vrot.lane.b32.xlu0 %v1005_v33, %s3352_s15  ;;  %886 = vrot.lane.b32.xlu1 %v845_v34, %s3351_s19  ;;  %v752_v33 = vpack.c.bf16 %v656_v51, %v656_v51  ;;  %v658_v34 = vsel %vm609_vm0, 0.0, %v624_v22  ;;  %v3109_v41 = vld [vmem:[%s4484_s3 + $0x10] sm:$0xff]  ;;  %v977_v22 = vunpack.c.l.b16 %v753_v0 }
 0x205   : > { %v1263_v35 = vsel %vm1189_vm2, %v1167_v29, %v1077_v58  ;;  %v3152_v40 = vld [vmem:[#allocation2 + $0x6c] sm:$0xff]  ;;  %v754_v53 = vpack.c.bf16 %v658_v34, %v658_v34  ;;  %1852 = vmatpush.bf16.msrb.mxu2 %v3109_v41  ;;  %v819_v51 = vunpack.c.l.b16 %v723_v13  ;;  %v725_v0 = vpack.c.bf16 %v3997_v63, %v3997_v63 }
 0x206   : > { %1321 = vst.msk [vmem:[#allocation2 + $0x7c] sm:$0xf] %vm1286_vm4, %v1263_v35  ;;  %v976_v29 = vunpack.c.l.b16 %v752_v33  ;;  %v1009_v17 = vpack.c.b16 %v977_v22, %v977_v22 }
 0x207   : > { %v978_v35 = vunpack.c.l.b16 %v754_v53  ;;  %v851_v34 = vpack.c.b16 %v819_v51, %v819_v51  ;;  %v3122_v53 = vld [vmem:[%s4484_s3 + $0x78] sm:$0xff] }
 0x208   : > { %2854 = vmatmul.msk.bf16.gmra.mxu2 %vm1545_vm5, %v3152_v40  ;;  %v1008_v10 = vpack.c.b16 %v976_v29, %v976_v29  ;;  %v3124_v40 = vld [vmem:[%s4484_s3 + $0x88] sm:$0xff] }
 0x209   : > { %888 = vrot.lane.b32.xlu2 %v846_v36, %s3351_s19  ;;  %v625_v36 = vrot.slane %v3989_v2, 1  ;;  %v1010_v8 = vpack.c.b16 %v978_v35, %v978_v35  ;;  %2135 = vmatpush.bf16.msrb.mxu3 %v3124_v40  ;;  %v604_v40 = vsel %vm542_vm1, 0.0, %v570_v7  ;;  %v543_v7 = vrot.slane %v3745_v5, 7 }
 0x20a   : > { %v703_v22 = vpack.c.bf16 %v604_v40, %v604_v40 }
 0x20b   : > { %v919_v23 = vpop.permute.xlu1 %918 }
 0x20c   : > { %892 = vrot.lane.b32.xlu0 %v848_v14, %s3351_s19  ;;  %1048 = vrot.lane.b32.xlu1 %v1006_v19, %s3352_s15  ;;  %v1170_v55 = vsel %vm1092_vm3, %v701_v25, %v919_v23  ;;  %v626_v14 = vrot.slane %v3995_v62, 1  ;;  %v627_v19 = vrot.slane %v3997_v63, 1  ;;  %v659_v23 = vsel %vm609_vm0, 0.0, %v625_v36 }
 0x20d   : > { %v820_v25 = vunpack.c.l.b16 %v724_v39  ;;  %2136 = vmatpush.bf16.msrb.mxu3 %v3123_v27  ;;  %v606_v36 = vsel %vm542_vm1, 0.0, %v572_v60  ;;  %v821_v39 = vunpack.c.l.b16 %v725_v0 }
 0x20e   : > { %v1079_v1 = vpop.permute.xlu0 %1078  ;;  %v660_v47 = vsel %vm609_vm0, 0.0, %v626_v14  ;;  %v705_v13 = vpack.c.bf16 %v606_v36, %v606_v36  ;;  %v3107_v14 = vld [vmem:[%s4484_s3] sm:$0xff]  ;;  %v577_v36 = vsel %vm542_vm1, 0.0, %v543_v7 }
 0x20f   : > { %v1266_v26 = vsel %vm1189_vm2, %v1170_v55, %v1079_v1  ;;  %v755_v55 = vpack.c.bf16 %v659_v23, %v659_v23  ;;  %v661_v1 = vsel %vm609_vm0, 0.0, %v627_v19  ;;  %v852_v33 = vpack.c.b16 %v820_v25, %v820_v25 }
 0x210   : > { %1322 = vst.msk [vmem:[#allocation2 + $0x80] sm:$0xf] %vm1286_vm4, %v1266_v26  ;;  %v605_v26 = vsel %vm542_vm1, 0.0, %v571_v24  ;;  %v757_v38 = vpack.c.bf16 %v661_v1, %v661_v1  ;;  %v756_v59 = vpack.c.bf16 %v660_v47, %v660_v47  ;;  %v569_v19 = vrot.slane %v3695_v43, 7 }
 0x211   : > { %890 = vrot.lane.b32.xlu2 %v847_v32, %s3351_s19  ;;  %v3108_v32 = vld [vmem:[%s4484_s3 + $0x8] sm:$0xff]  ;;  %v979_v48 = vunpack.c.l.b16 %v755_v55  ;;  %2137 = vmatpush.bf16.msrb.mxu3 %v3122_v53  ;;  %v573_v23 = vrot.slane %v3716_v21, 7  ;;  %v853_v1 = vpack.c.b16 %v821_v39, %v821_v39 }
 0x212   : > { %1853 = vmatpush.bf16.msrb.mxu2 %v3108_v32  ;;  %v981_v35 = vunpack.c.l.b16 %v757_v38  ;;  %v980_v6 = vunpack.c.l.b16 %v756_v59  ;;  %v603_v43 = vsel %vm542_vm1, 0.0, %v569_v19  ;;  %v3120_v21 = vld [vmem:[%s4484_s3 + $0x68] sm:$0xff]  ;;  %v3119_v32 = vld [vmem:[%s4484_s3 + $0x60] sm:$0xff] }
 0x213   : > { %v3987_v58 = vpop.permute.xlu2 %926  ;;  %v702_v27 = vpack.c.bf16 %v603_v43, %v603_v43 }
 0x214   : > { %894 = vrot.lane.b32.xlu0 %v849_v49, %s3351_s19  ;;  %1050 = vrot.lane.b32.xlu1 %v1007_v42, %s3352_s15  ;;  %v704_v49 = vpack.c.bf16 %v605_v26, %v605_v26  ;;  %v1013_v37 = vpack.c.b16 %v981_v35, %v981_v35  ;;  %v1012_v52 = vpack.c.b16 %v980_v6, %v980_v6 }
 0x215   : > { %v1182_v24 = vsel %vm1092_vm3, %v705_v13, %v3987_v58  ;;  %v607_v58 = vsel %vm542_vm1, 0.0, %v573_v23 }
 0x216   : > { %1854 = vmatpush.bf16.msrb.mxu2 %v3107_v14 }
 0x217   : > { %v3153_v12 = vld [vmem:[#allocation2 + $0x7c] sm:$0xff] }
 0x218   : > { %2855 = vmatmul.msk.bf16.gmra.mxu2 %vm1545_vm5, %v3153_v12  ;;  %v1011_v12 = vpack.c.b16 %v979_v48, %v979_v48 }
 0x219   : > { %1052 = vrot.lane.b32.xlu2 %v1008_v10, %s3352_s15 }
 0x21b   : > { %v4011_v45 = vpop.permute.xlu2 %920 }
 0x21c   : > { %1056 = vrot.lane.b32.xlu0 %v1010_v8, %s3352_s15  ;;  %896 = vrot.lane.b32.xlu1 %v850_v3, %s3351_s19  ;;  %v3121_v8 = vld [vmem:[%s4484_s3 + $0x70] sm:$0xff]  ;;  %v1173_v38 = vsel %vm1092_vm3, %v702_v27, %v4011_v45 }
 0x21d   : > { %2138 = vmatpush.bf16.msrb.mxu3 %v3121_v8 }
 0x221   : > { %1054 = vrot.lane.b32.xlu2 %v1009_v17, %s3352_s15  ;;  %2139 = vmatpush.bf16.msrb.mxu3 %v3120_v21  ;;  %v547_v21 = vrot.slane %v3793_v20, 7 }
 0x223   : > { %v1083_v42 = vpop.permute.xlu2 %1082  ;;  %v925_v41 = vpop.permute.xlu1 %924 }
 0x224   : > { %900 = vrot.lane.b32.xlu0 %v852_v33, %s3351_s19  ;;  %898 = vrot.lane.b32.xlu1 %v851_v34, %s3351_s19  ;;  %v1179_v29 = vsel %vm1092_vm3, %v704_v49, %v925_v41  ;;  %v706_v33 = vpack.c.bf16 %v607_v58, %v607_v58  ;;  %v574_v34 = vrot.slane %v3735_v54, 7 }
 0x225   : > { %2140 = vmatpush.bf16.msrb.mxu3 %v3119_v32 }
 0x226   : > { %v1085_v9 = vpop.permute.xlu0 %1084  ;;  %v608_v54 = vsel %vm542_vm1, 0.0, %v574_v34 }
 0x227   : > { %v1275_v10 = vsel %vm1189_vm2, %v1179_v29, %v1085_v9  ;;  %v707_v60 = vpack.c.bf16 %v608_v54, %v608_v54  ;;  %v544_v29 = vrot.slane %v3756_v11, 7  ;;  %v676_v11 = vpack.c.bf16 %v577_v36, %v577_v36 }
 0x228   : > { %1325 = vst.msk [vmem:[#allocation2 + $0x8c] sm:$0xf] %vm1286_vm4, %v1275_v10 }
 0x229   : > { %1058 = vrot.lane.b32.xlu2 %v1011_v12, %s3352_s15  ;;  %v578_v0 = vsel %vm542_vm1, 0.0, %v544_v29 }
 0x22b   : > { %v1089_v3 = vpop.permute.xlu2 %1088 }
 0x22c   : > { %1062 = vrot.lane.b32.xlu0 %v1013_v37, %s3352_s15  ;;  %1060 = vrot.lane.b32.xlu1 %v1012_v52, %s3352_s15  ;;  %v677_v37 = vpack.c.bf16 %v578_v0, %v578_v0  ;;  %v545_v52 = vrot.slane %v3758_v18, 7  ;;  %s4317_s15 = scalar_lea.vmem [#allocation6], %s2721_s10  ;;  %s3176_s10 = sshll.u32 %s3417_s28, 8 }
 0x22d   : > { %s2636_s21 = scalar_lea.hbm %s4488_s7, %s3176_s10 }
 0x22e   : > { %v923_v25 = vpop.permute.xlu0 %922  ;;  %v1087_v51 = vpop.permute.xlu1 %1086  ;;  %v579_v18 = vsel %vm542_vm1, 0.0, %v545_v52  ;;  %s2639_s23 = sshll.u32 %s2636_s21, 4  ;;  %s2640_s23 = int_to_ptr.hbm [resolvable:$true] %s2639_s23 }
 0x22f   : > { %v1176_v17 = vsel %vm1092_vm3, %v703_v22, %v923_v25  ;;  %v1278_v55 = vsel %vm1189_vm2, %v1182_v24, %v1087_v51  ;;  %v678_v23 = vpack.c.bf16 %v579_v18, %v579_v18  ;;  %v546_v24 = vrot.slane %v3774_v44, 7  ;;  %s3295_s28 = sshra.s32 %s2640_s23, 4  ;;  %s3296_s28 = int_to_ptr.hbm [resolvable:$true] %s3295_s28 }
 0x230   : > { %v1272_v47 = vsel %vm1189_vm2, %v1176_v17, %v1083_v42  ;;  %1326 = vst.msk [vmem:[#allocation2 + $0x90] sm:$0xf] %vm1286_vm4, %v1278_v55  ;;  %s3297_s8 = scalar_lea.hbm %s3296_s28, 256  ;;  %p3302_p0 = scmp.lt.s32.totalorder %s3296_s28, %s4488_s7 }
 0x231   : > { %1324 = vst.msk [vmem:[#allocation2 + $0x88] sm:$0xf] %vm1286_vm4, %v1272_v47  ;;  %902 = vrot.lane.b32.xlu2 %v853_v1, %s3351_s19  ;;  %v580_v43 = vsel %vm542_vm1, 0.0, %v546_v24  ;;  %s2637_s19 = sshll.u32 %s4317_s15, 4  ;;  %p3298_p6 = scmp.ne.s32.totalorder %s3296_s28, %s3297_s8  ;;  %s2638_s19 = int_to_ptr.vmem [resolvable:$true] %s2637_s19 }
 0x232   : > { %v679_v58 = vpack.c.bf16 %v580_v43, %v580_v43 }
 0x233   : > { %v1029_v26 = vpop.permute.xlu2 %1028  ;;  %p3299_p9 = pnand %p3298_p6, %p3446_p11 }
 0x235   : > { %p3300_p13 = pneg %p3299_p9 }
 0x236   : > { %v929_v59 = vpop.permute.xlu0 %928  ;;  %v1081_v42 = vpop.permute.xlu1 %1080 }
 0x237   : > { %v1185_v41 = vsel %vm1092_vm3, %v706_v33, %v929_v59  ;;  %v1269_v48 = vsel %vm1189_vm2, %v1173_v38, %v1081_v42  ;;  %v3155_v49 = vld [vmem:[#allocation2 + $0x8c] sm:$0xff]  ;;  %v581_v59 = vsel %vm542_vm1, 0.0, %v547_v21 }
 0x238   : > { %v1281_v53 = vsel %vm1189_vm2, %v1185_v41, %v1089_v3  ;;  %1323 = vst.msk [vmem:[#allocation2 + $0x84] sm:$0xf] %vm1286_vm4, %v1269_v48  ;;  %2857 = vmatmul.msk.bf16.vlgmr.msra.gmra.mxu3 %vm1545_vm5, %v3155_v49  ;;  %v680_v42 = vpack.c.bf16 %v581_v59, %v581_v59 }
 0x239   : > { %1327 = vst.msk [vmem:[#allocation2 + $0x94] sm:$0xf] %vm1286_vm4, %v1281_v53 }
 0x23b   : > { %v1031_v45 = vpop.permute.xlu2 %1030 }
 0x23e   : > { %v1091_v9 = vpop.permute.xlu0 %1090  ;;  %v931_v35 = vpop.permute.xlu1 %930 }
 0x23f   : > { %v1188_v6 = vsel %vm1092_vm3, %v707_v60, %v931_v35  ;;  %v3154_v10 = vld [vmem:[#allocation2 + $0x84] sm:$0xff] }
 0x240   : > { %v1284_v12 = vsel %vm1189_vm2, %v1188_v6, %v1091_v9  ;;  %2856 = vmatmul.msk.bf16.gmra.mxu2 %vm1545_vm5, %v3154_v10  ;;  %v550_v6 = vrot.slane %v3841_v28, 7  ;;  %v551_v10 = vrot.slane %v3847_v31, 7 }
 0x241   : > { %1328 = vst.msk [vmem:[#allocation2 + $0x98] sm:$0xf] %vm1286_vm4, %v1284_v12 }
 0x243   : > { %v877_v5 = vpop.permute.xlu2 %876 }
 0x244   : > { %v1107_v48 = vsel %vm1092_vm3, %v680_v42, %v877_v5 }
 0x246   : > { %v871_v40 = vpop.permute.xlu0 %870  ;;  %v869_v8 = vpop.permute.xlu1 %868 }
 0x247   : > { %v1098_v3 = vsel %vm1092_vm3, %v677_v37, %v871_v40  ;;  %v1095_v39 = vsel %vm1092_vm3, %v676_v11, %v869_v8  ;;  %v585_v11 = vsel %vm542_vm1, 0.0, %v551_v10  ;;  %v584_v40 = vsel %vm542_vm1, 0.0, %v550_v6 }
 0x248   : > { %v1194_v13 = vsel %vm1189_vm2, %v1098_v3, %v1031_v45  ;;  %v1191_v14 = vsel %vm1189_vm2, %v1095_v39, %v1029_v26  ;;  %v3156_v19 = vld [vmem:[#allocation2 + $0x94] sm:$0xff]  ;;  %v549_v26 = vrot.slane %v3815_v16, 7  ;;  %v548_v16 = vrot.slane %v3812_v46, 7 }
 0x249   : > { %1298 = vst.msk [vmem:[#allocation2 + $0x8] sm:$0xf] %vm1286_vm4, %v1194_v13  ;;  %2858 = vmatmul.msk.bf16.gmra.mxu3 %vm1545_vm5, %v3156_v19  ;;  %v684_v28 = vpack.c.bf16 %v585_v11, %v585_v11  ;;  %v683_v31 = vpack.c.bf16 %v584_v40, %v584_v40  ;;  %v552_v8 = vrot.slane %v3877_v56, 7 }
 0x24a   : > { %1297 = vst.msk [vmem:[#allocation2 + $0x4] sm:$0xf] %vm1286_vm4, %v1191_v14  ;;  %v583_v20 = vsel %vm542_vm1, 0.0, %v549_v26  ;;  %v582_v9 = vsel %vm542_vm1, 0.0, %v548_v16 }
 0x24b   : > { %v879_v22 = vpop.permute.xlu2 %878  ;;  %v682_v41 = vpack.c.bf16 %v583_v20, %v583_v20  ;;  %v681_v35 = vpack.c.bf16 %v582_v9, %v582_v9  ;;  %v586_v24 = vsel %vm542_vm1, 0.0, %v552_v8 }
 0x24d   : > { %v1110_v12 = vsel %vm1092_vm3, %v681_v35, %v879_v22 }
 0x24e   : > { %v1033_v25 = vpop.permute.xlu0 %1032  ;;  %v873_v51 = vpop.permute.xlu1 %872 }
 0x24f   : > { %v1101_v17 = vsel %vm1092_vm3, %v678_v23, %v873_v51 }
 0x250   : > { %v1197_v55 = vsel %vm1189_vm2, %v1101_v17, %v1033_v25  ;;  %v553_v25 = vrot.slane %v3896_v57, 7  ;;  %v685_v17 = vpack.c.bf16 %v586_v24, %v586_v24 }
 0x251   : > { %1299 = vst.msk [vmem:[#allocation2 + $0xc] sm:$0xf] %vm1286_vm4, %v1197_v55  ;;  %v3141_v1 = vld [vmem:[#allocation2 + $0x4] sm:$0xff]  ;;  %v555_v55 = vrot.slane %v3923_v30, 7  ;;  %v554_v30 = vrot.slane %v3921_v61, 7 }
 0x252   : > { %v3125_v47 = vld [vmem:[#allocation2] sm:$0xff]  ;;  %2843 = vmatmul.msk.bf16.vlgmr.msrb.gmra.mxu0 %vm1545_vm5, %v3141_v1 }
 0x253   : > { %2947 = vmatmul.msk.bf16.vlgmr.msrb.gmra.mxu2 %vm1545_vm5, %v3125_v47  ;;  %v1041_v44 = vpop.permute.xlu2 %1040  ;;  %v589_v57 = vsel %vm542_vm1, 0.0, %v555_v55  ;;  %v588_v61 = vsel %vm542_vm1, 0.0, %v554_v30  ;;  %v3173_v30 = vld [vmem:[%s4486_s5] sm:$0xff] }
 0x256   : > { %v1035_v32 = vpop.permute.xlu0 %1034  ;;  %v875_v27 = vpop.permute.xlu1 %874 }
 0x257   : > { %v1104_v33 = vsel %vm1092_vm3, %v679_v58, %v875_v27  ;;  %v587_v58 = vsel %vm542_vm1, 0.0, %v553_v25  ;;  %v688_v27 = vpack.c.bf16 %v589_v57, %v589_v57 }
 0x258   : > { %v1200_v34 = vsel %vm1189_vm2, %v1104_v33, %v1035_v32  ;;  %v3157_v38 = vld [vmem:[#allocation2 + $0x8] sm:$0xff]  ;;  %v686_v26 = vpack.c.bf16 %v587_v58, %v587_v58  ;;  %v556_v33 = vrot.slane %v3948_v50, 7 }
 0x259   : > { %1300 = vst.msk [vmem:[#allocation2 + $0x10] sm:$0xf] %vm1286_vm4, %v1200_v34  ;;  %3051 = vmatmul.msk.bf16.vlgmr.msrb.gmra.mxu3 %vm1545_vm5, %v3157_v38  ;;  %v3126_v46 = vld [vmem:[#allocation2 + $0x8] sm:$0xff] }
 0x25b   : > { %v885_v54 = vpop.permute.xlu2 %884 }
 0x25c   : > { %v1119_v3 = vsel %vm1092_vm3, %v684_v28, %v885_v54  ;;  %v590_v54 = vsel %vm542_vm1, 0.0, %v556_v33 }
 0x25e   : > { %v881_v49 = vpop.permute.xlu0 %880  ;;  %v1037_v53 = vpop.permute.xlu1 %1036 }
 0x25f   : > { %v1113_v45 = vsel %vm1092_vm3, %v682_v41, %v881_v49  ;;  %v1203_v60 = vsel %vm1189_vm2, %v1107_v48, %v1037_v53  ;;  %v3174_v53 = vld [vmem:[%s4486_s5 + $0x8] sm:$0xff] }
 0x260   : > { %v1209_v7 = vsel %vm1189_vm2, %v1113_v45, %v1041_v44  ;;  %1301 = vst.msk [vmem:[#allocation2 + $0x14] sm:$0xf] %vm1286_vm4, %v1203_v60  ;;  %v3142_v29 = vld [vmem:[#allocation2 + $0xc] sm:$0xff]  ;;  %v687_v45 = vpack.c.bf16 %v588_v61, %v588_v61  ;;  %2412 = vmatpush.bf16.msrb.mxu1 %v3174_v53  ;;  %v689_v60 = vpack.c.bf16 %v590_v54, %v590_v54 }
 0x261   : > { %1303 = vst.msk [vmem:[#allocation2 + $0x1c] sm:$0xf] %vm1286_vm4, %v1209_v7  ;;  %v557_v7 = vrot.slane %v3953_v4, 7 }
 0x262   : > { %2844 = vmatmul.msk.bf16.gmra.mxu0 %vm1545_vm5, %v3142_v29 }
 0x263   : > { %2948 = vmatmul.msk.bf16.gmra.mxu2 %vm1545_vm5, %v3126_v46  ;;  %v889_v52 = vpop.permute.xlu2 %888  ;;  %v591_v4 = vsel %vm542_vm1, 0.0, %v557_v7 }
 0x264   : > { %v1125_v34 = vsel %vm1092_vm3, %v686_v26, %v889_v52  ;;  %2413 = vmatpush.bf16.msrb.mxu1 %v3173_v30 }
 0x266   : > { %v883_v0 = vpop.permute.xlu0 %882  ;;  %v1039_v36 = vpop.permute.xlu1 %1038 }
 0x267   : > { %v1206_v5 = vsel %vm1189_vm2, %v1110_v12, %v1039_v36  ;;  %v3158_v37 = vld [vmem:[#allocation2 + $0x10] sm:$0xff]  ;;  %v1116_v39 = vsel %vm1092_vm3, %v683_v31, %v883_v0 }
 0x268   : > { %1302 = vst.msk [vmem:[#allocation2 + $0x18] sm:$0xf] %vm1286_vm4, %v1206_v5  ;;  %v3127_v23 = vld [vmem:[#allocation2 + $0x10] sm:$0xff]  ;;  %v690_v5 = vpack.c.bf16 %v591_v4, %v591_v4 }
 0x269   : > { %3052 = vmatmul.msk.bf16.gmra.mxu3 %vm1545_vm5, %v3158_v37  ;;  %v558_v37 = vrot.slane %v3989_v2, 7  ;;  %v559_v2 = vrot.slane %v3995_v62, 7 }
 0x26b   : > { %v891_v56 = vpop.permute.xlu2 %890  ;;  %v4158_v51 = vpop.f32.mrf.mxu2 }
 0x26c   : > { %v1128_v29 = vsel %vm1092_vm3, %v687_v45, %v891_v56 }
 0x26e   : > { %v1045_v13 = vpop.permute.xlu0 %1044  ;;  %v1043_v14 = vpop.permute.xlu1 %1042 }
 0x26f   : > { %v1215_v19 = vsel %vm1189_vm2, %v1119_v3, %v1045_v13  ;;  %v1212_v18 = vsel %vm1189_vm2, %v1116_v39, %v1043_v14  ;;  %v3143_v22 = vld [vmem:[#allocation2 + $0x14] sm:$0xff]  ;;  %v592_v39 = vsel %vm542_vm1, 0.0, %v558_v37  ;;  %v560_v14 = vrot.slane %v3997_v63, 7 }
 0x270   : > { %1305 = vst.msk [vmem:[#allocation2 + $0x2c] sm:$0xf] %vm1286_vm4, %v1215_v19  ;;  %v3159_v44 = vld [vmem:[#allocation2 + $0x18] sm:$0xff]  ;;  %v691_v19 = vpack.c.bf16 %v592_v39, %v592_v39 }
 0x271   : > { %1304 = vst.msk [vmem:[#allocation2 + $0x20] sm:$0xf] %vm1286_vm4, %v1212_v18  ;;  %v3128_v49 = vld [vmem:[#allocation2 + $0x18] sm:$0xff]  ;;  %v594_v25 = vsel %vm542_vm1, 0.0, %v560_v14 }
 0x272   : > { %2845 = vmatmul.msk.bf16.gmra.mxu0 %vm1545_vm5, %v3143_v22  ;;  %v693_v63 = vpack.c.bf16 %v594_v25, %v594_v25 }
 0x273   : > { %2949 = vmatmul.msk.bf16.gmra.mxu2 %vm1545_vm5, %v3127_v23  ;;  %v1053_v32 = vpop.permute.xlu2 %1052  ;;  %v4172_v20 = vpop.f32.mrf.mxu2 }
 0x276   : > { %v1047_v1 = vpop.permute.xlu0 %1046  ;;  %v887_v47 = vpop.permute.xlu1 %886 }
 0x277   : > { %v1122_v43 = vsel %vm1092_vm3, %v685_v17, %v887_v47  ;;  %v3129_v3 = vld [vmem:[#allocation2 + $0x28] sm:$0xff]  ;;  %v593_v17 = vsel %vm542_vm1, 0.0, %v559_v2 }
 0x278   : > { %v1218_v21 = vsel %vm1189_vm2, %v1122_v43, %v1047_v1  ;;  %v3144_v50 = vld [vmem:[#allocation2 + $0x1c] sm:$0xff]  ;;  %v692_v55 = vpack.c.bf16 %v593_v17, %v593_v17 }
 0x279   : > { %1306 = vst.msk [vmem:[#allocation2 + $0x30] sm:$0xf] %vm1286_vm4, %v1218_v21  ;;  %3053 = vmatmul.msk.bf16.gmra.mxu3 %vm1545_vm5, %v3159_v44  ;;  %v3160_v0 = vld [vmem:[#allocation2 + $0x20] sm:$0xff] }
 0x27b   : > { %v1055_v35 = vpop.permute.xlu2 %1054  ;;  %v4195_v36 = vpop.f32.mrf.mxu2 }
 0x27e   : > { %v893_v38 = vpop.permute.xlu0 %892  ;;  %v1049_v59 = vpop.permute.xlu1 %1048 }
 0x27f   : > { %v1131_v42 = vsel %vm1092_vm3, %v688_v27, %v893_v38  ;;  %v1221_v16 = vsel %vm1189_vm2, %v1125_v34, %v1049_v59 }
 0x280   : > { %v1227_v41 = vsel %vm1189_vm2, %v1131_v42, %v1053_v32  ;;  %1307 = vst.msk [vmem:[#allocation2 + $0x34] sm:$0xf] %vm1286_vm4, %v1221_v16  ;;  %v3145_v48 = vld [vmem:[#allocation2 + $0x2c] sm:$0xff] }
 0x281   : > { %1309 = vst.msk [vmem:[#allocation2 + $0x3c] sm:$0xf] %vm1286_vm4, %v1227_v41  ;;  %2847 = vmatmul.msk.bf16.vlgmr.msra.gmra.mxu1 %vm1545_vm5, %v3145_v48 }
 0x282   : > { %2846 = vmatmul.msk.bf16.gmra.mxu0 %vm1545_vm5, %v3144_v50 }
 0x283   : > { %2950 = vmatmul.msk.bf16.gmra.mxu2 %vm1545_vm5, %v3128_v49  ;;  %v1059_v8 = vpop.permute.xlu2 %1058  ;;  %v4208_v13 = vpop.f32.mrf.mxu2 }
 0x286   : > { %v895_v9 = vpop.permute.xlu0 %894  ;;  %v1051_v46 = vpop.permute.xlu1 %1050 }
 0x287   : > { %v1134_v6 = vsel %vm1092_vm3, %v689_v60, %v895_v9  ;;  %v1224_v10 = vsel %vm1189_vm2, %v1128_v29, %v1051_v46  ;;  %v3161_v56 = vld [vmem:[#allocation2 + $0x30] sm:$0xff] }
 0x288   : > { %v1230_v12 = vsel %vm1189_vm2, %v1134_v6, %v1055_v35  ;;  %1308 = vst.msk [vmem:[#allocation2 + $0x38] sm:$0xf] %vm1286_vm4, %v1224_v10  ;;  %v3130_v26 = vld [vmem:[#allocation2 + $0x30] sm:$0xff] }
 0x289   : > { %1310 = vst.msk [vmem:[#allocation2 + $0x40] sm:$0xf] %vm1286_vm4, %v1230_v12  ;;  %3054 = vmatmul.msk.bf16.gmra.mxu3 %vm1545_vm5, %v3160_v0 }
 0x28b   : > { %v903_v62 = vpop.permute.xlu2 %902  ;;  %v4221_v1 = vpop.f32.mrf.mxu2 }
 0x28c   : > { %v1146_v47 = vsel %vm1092_vm3, %v693_v63, %v903_v62 }
 0x28e   : > { %v1057_v11 = vpop.permute.xlu0 %1056  ;;  %v897_v52 = vpop.permute.xlu1 %896 }
 0x28f   : > { %v1137_v40 = vsel %vm1092_vm3, %v690_v5, %v897_v52  ;;  %v3146_v28 = vld [vmem:[#allocation2 + $0x34] sm:$0xff]  ;;  %v4264_v5 = vld [vmem:[%s4485_s4] ss:$0 sm:$0xff] }
 0x290   : > { %v1233_v31 = vsel %vm1189_vm2, %v1137_v40, %v1057_v11  ;;  %v3147_v57 = vld [vmem:[#allocation2 + $0x3c] sm:$0xff] }
 0x291   : > { %1311 = vst.msk [vmem:[#allocation2 + $0x44] sm:$0xf] %vm1286_vm4, %v1233_v31  ;;  %2848 = vmatmul.msk.bf16.gmra.mxu1 %vm1545_vm5, %v3146_v28  ;;  %v3162_v27 = vld [vmem:[#allocation2 + $0x38] sm:$0xff] }
 0x292   : > { %v3131_v34 = vld [vmem:[#allocation2 + $0x38] sm:$0xff] }
 0x293   : > { %2951 = vmatmul.msk.bf16.gmra.mxu2 %vm1545_vm5, %v3129_v3  ;;  %v4234_v32 = vpop.f32.mrf.mxu2 }
 0x296   : > { %v901_v18 = vpop.permute.xlu0 %900  ;;  %v899_v22 = vpop.permute.xlu1 %898 }
 0x297   : > { %v1140_v23 = vsel %vm1092_vm3, %v691_v19, %v899_v22  ;;  %v1143_v43 = vsel %vm1092_vm3, %v692_v55, %v901_v18 }
 0x298   : > { %v1236_v24 = vsel %vm1189_vm2, %v1140_v23, %v1059_v8  ;;  %v3163_v59 = vld [vmem:[#allocation2 + $0x40] sm:$0xff] }
 0x299   : > { %1312 = vst.msk [vmem:[#allocation2 + $0x48] sm:$0xf] %vm1286_vm4, %v1236_v24  ;;  %3055 = vmatmul.msk.bf16.gmra.mxu3 %vm1545_vm5, %v3161_v56  ;;  %v3132_v48 = vld [vmem:[#allocation2 + $0x40] sm:$0xff] }
 0x29a   : > { %v3166_v8 = vld [vmem:[#allocation2 + $0x60] sm:$0xff] }
 0x29b   : > { %v4237_v38 = vpop.f32.mrf.mxu2  ;;  %v3135_v23 = vld [vmem:[#allocation2 + $0x60] sm:$0xff] }
 0x29e   : > { %v1063_v21 = vpop.permute.xlu0 %1062  ;;  %v1061_v44 = vpop.permute.xlu1 %1060 }
 0x29f   : > { %v1242_v58 = vsel %vm1189_vm2, %v1146_v47, %v1063_v21  ;;  %v1239_v15 = vsel %vm1189_vm2, %v1143_v43, %v1061_v44  ;;  %v3167_v43 = vld [vmem:[#allocation2 + $0x68] sm:$0xff] }
 0x2a0   : > { %1314 = vst.msk [vmem:[#allocation2 + $0x58] sm:$0xf] %vm1286_vm4, %v1242_v58  ;;  %v3148_v33 = vld [vmem:[#allocation2 + $0x44] sm:$0xff] }
 0x2a1   : > { %1313 = vst.msk [vmem:[#allocation2 + $0x54] sm:$0xf] %vm1286_vm4, %v1239_v15  ;;  %2849 = vmatmul.msk.bf16.gmra.mxu1 %vm1545_vm5, %v3147_v57  ;;  %v3164_v49 = vld [vmem:[#allocation2 + $0x48] sm:$0xff] }
 0x2a3   : > { %2952 = vmatmul.msk.bf16.gmra.mxu2 %vm1545_vm5, %v3130_v26  ;;  %v4242_v42 = vpop.f32.mrf.mxu2 }
 0x2a7   : > { %v3165_v46 = vld [vmem:[#allocation2 + $0x58] sm:$0xff] }
 0x2a8   : > { %v3149_v41 = vld [vmem:[#allocation2 + $0x54] sm:$0xff] }
 0x2a9   : > { %3056 = vmatmul.msk.bf16.gmra.mxu3 %vm1545_vm5, %v3162_v27  ;;  %v3133_v60 = vld [vmem:[#allocation2 + $0x50] sm:$0xff]  ;;  %v3134_v0 = vld [vmem:[#allocation2 + $0x58] sm:$0xff]  ;;  %v3136_v27 = vld [vmem:[#allocation2 + $0x68] sm:$0xff] }
 0x2b1   : > { %2850 = vmatmul.msk.bf16.gmra.mxu1 %vm1545_vm5, %v3148_v33 }
 0x2b3   : > { %2953 = vmatmul.msk.bf16.gmra.mxu2 %vm1545_vm5, %v3131_v34 }
 0x2b9   : > { %3057 = vmatmul.msk.bf16.gmra.mxu3 %vm1545_vm5, %v3163_v59 }
 0x2bb   : > { %v4244_v16 = vpop.f32.mrf.mxu3 }
 0x2c1   : > { %2851 = vmatmul.msk.bf16.gmra.mxu1 %vm1545_vm5, %v3149_v41 }
 0x2c3   : > { %2954 = vmatmul.msk.bf16.gmra.mxu2 %vm1545_vm5, %v3132_v48  ;;  %v4248_v61 = vpop.f32.mrf.mxu2  ;;  %v4250_v50 = vpop.f32.mrf.mxu3 }
 0x2c9   : > { %3058 = vmatmul.msk.bf16.gmra.mxu3 %vm1545_vm5, %v3164_v49 }
 0x2cb   : > { %v4253_v53 = vpop.f32.mrf.mxu2 }
 0x2cc   : > { %v4255_v54 = vpop.f32.mrf.mxu3 }
 0x2cf   : > { %v1603_v45 = vpop.f32.mrf.mxu0 }
 0x2d3   : > { %2955 = vmatmul.msk.bf16.gmra.mxu2 %vm1545_vm5, %v3133_v60  ;;  %v3168_v60 = vld [vmem:[#allocation2 + $0x70] sm:$0xff] }
 0x2d4   : > { %v4258_v7 = vpop.f32.mrf.mxu3 }
 0x2d6   : > { %v1856_v29 = vpop.f32.mrf.mxu2 }
 0x2d7   : > { %v1605_v9 = vpop.f32.mrf.mxu0  ;;  %v1857_v10 = vadd.f32 %v1856_v29, %v1603_v45 }
 0x2d9   : > { %3059 = vmatmul.msk.bf16.gmra.mxu3 %vm1545_vm5, %v3165_v46 }
 0x2dc   : > { %v2142_v35 = vpop.f32.mrf.mxu3 }
 0x2dd   : > { %v2222_v4 = vadd.f32 %v2142_v35, %v1857_v10 }
 0x2de   : > { %v1858_v6 = vpop.f32.mrf.mxu2 }
 0x2df   : > { %v1608_v12 = vpop.f32.mrf.mxu0  ;;  %v1859_v37 = vadd.f32 %v1858_v6, %v1605_v9  ;;  %v2258_v52 = vadd.f32 %v4264_v5, %v2222_v4  ;;  %v3137_v4 = vld [vmem:[#allocation2 + $0x78] sm:$0xff] }
 0x2e1   : > { %v2290_v3 = vmax.f32 %v2258_v52, 0.0 }
 0x2e3   : > { %2956 = vmatmul.msk.bf16.gmra.mxu2 %vm1545_vm5, %v3134_v0 }
 0x2e4   : > { %v2144_v11 = vpop.f32.mrf.mxu3 }
 0x2e5   : > { %v2223_v28 = vadd.f32 %v2144_v11, %v1859_v37 }
 0x2e6   : > { %v1861_v40 = vpop.f32.mrf.mxu2 }
 0x2e7   : > { %v2259_v31 = vadd.f32 %v4264_v5, %v2223_v28  ;;  %v1610_v2 = vpop.f32.mrf.mxu0  ;;  %v1862_v22 = vadd.f32 %v1861_v40, %v1608_v12 }
 0x2e9   : > { %v2291_v39 = vmax.f32 %v2259_v31, 0.0  ;;  %3060 = vmatmul.msk.bf16.gmra.mxu3 %vm1545_vm5, %v3166_v8 }
 0x2eb   : > { %v2322_v14 = vpack.c.bf16 %v2291_v39, %v2290_v3 }
 0x2ec   : > { %v2147_v19 = vpop.f32.mrf.mxu3 }
 0x2ed   : > { %3075 = vmatmul.msk.bf16.vlgmr.msrb.gmra.mxu1 %vm1092_vm3, %v2322_v14  ;;  %v2224_v24 = vadd.f32 %v2147_v19, %v1862_v22 }
 0x2ee   : > { %v1863_v18 = vpop.f32.mrf.mxu2 }
 0x2ef   : > { %v1864_v56 = vadd.f32 %v1863_v18, %v1610_v2  ;;  %v1613_v25 = vpop.f32.mrf.mxu0  ;;  %v2260_v62 = vadd.f32 %v4264_v5, %v2224_v24  ;;  %v3169_v2 = vld [vmem:[#allocation2 + $0x80] sm:$0xff] }
 0x2f1   : > { %v2292_v21 = vmax.f32 %v2260_v62, 0.0 }
 0x2f3   : > { %2957 = vmatmul.msk.bf16.gmra.mxu2 %vm1545_vm5, %v3135_v23 }
 0x2f4   : > { %v2149_v17 = vpop.f32.mrf.mxu3 }
 0x2f5   : > { %v2225_v55 = vadd.f32 %v2149_v17, %v1864_v56 }
 0x2f6   : > { %v1866_v63 = vpop.f32.mrf.mxu2 }
 0x2f7   : > { %v2261_v47 = vadd.f32 %v4264_v5, %v2225_v55  ;;  %v1615_v26 = vpop.f32.mrf.mxu0  ;;  %v1867_v30 = vadd.f32 %v1866_v63, %v1613_v25  ;;  %v3138_v25 = vld [vmem:[#allocation2 + $0x80] sm:$0xff] }
 0x2f9   : > { %v2293_v44 = vmax.f32 %v2261_v47, 0.0  ;;  %3061 = vmatmul.msk.bf16.gmra.mxu3 %vm1545_vm5, %v3167_v43 }
 0x2fb   : > { %v2323_v58 = vpack.c.bf16 %v2293_v44, %v2292_v21 }
 0x2fc   : > { %v2152_v15 = vpop.f32.mrf.mxu3 }
 0x2fd   : > { %3076 = vmatmul.msk.bf16.gmra.mxu1 %vm1092_vm3, %v2323_v58  ;;  %v2226_v33 = vadd.f32 %v2152_v15, %v1867_v30  ;;  %v3170_v58 = vld [vmem:[#allocation2 + $0x88] sm:$0xff] }
 0x2fe   : > { %v1868_v57 = vpop.f32.mrf.mxu2  ;;  %v1623_v9 = vpop.f32.mrf.mxu1 }
 0x2ff   : > { %v1869_v34 = vadd.f32 %v1868_v57, %v1615_v26  ;;  %v2262_v41 = vadd.f32 %v4264_v5, %v2226_v33  ;;  %v1618_v29 = vpop.f32.mrf.mxu0 }
 0x301   : > { %v2294_v46 = vmax.f32 %v2262_v41, 0.0 }
 0x303   : > { %2958 = vmatmul.msk.bf16.gmra.mxu2 %vm1545_vm5, %v3136_v27 }
 0x304   : > { %v2154_v59 = vpop.f32.mrf.mxu3 }
 0x305   : > { %v2227_v49 = vadd.f32 %v2154_v59, %v1869_v34  ;;  %v3139_v59 = vld [vmem:[#allocation2 + $0x88] sm:$0xff] }
 0x306   : > { %v1871_v48 = vpop.f32.mrf.mxu2  ;;  %v1625_v52 = vpop.f32.mrf.mxu1 }
 0x307   : > { %v2263_v45 = vadd.f32 %v4264_v5, %v2227_v49  ;;  %v1872_v0 = vadd.f32 %v1871_v48, %v1618_v29  ;;  %v1620_v11 = vpop.f32.mrf.mxu0 }
 0x309   : > { %v2295_v35 = vmax.f32 %v2263_v45, 0.0  ;;  %3062 = vmatmul.msk.bf16.gmra.mxu3 %vm1545_vm5, %v3168_v60 }
 0x30b   : > { %v2324_v6 = vpack.c.bf16 %v2295_v35, %v2294_v46  ;;  %v3171_v46 = vld [vmem:[#allocation2 + $0x90] sm:$0xff] }
 0x30c   : > { %v2157_v10 = vpop.f32.mrf.mxu3 }
 0x30d   : > { %3077 = vmatmul.msk.bf16.gmra.mxu1 %vm1092_vm3, %v2324_v6  ;;  %v2228_v37 = vadd.f32 %v2157_v10, %v1872_v0 }
 0x30e   : > { %v1873_v12 = vpop.f32.mrf.mxu2  ;;  %v1628_v22 = vpop.f32.mrf.mxu1 }
 0x30f   : > { %v1874_v40 = vadd.f32 %v1873_v12, %v1620_v11  ;;  %v2264_v31 = vadd.f32 %v4264_v5, %v2228_v37  ;;  %v3140_v11 = vld [vmem:[#allocation2 + $0x90] sm:$0xff] }
 0x311   : > { %v2296_v14 = vmax.f32 %v2264_v31, 0.0 }
 0x313   : > { %2959 = vmatmul.msk.bf16.gmra.mxu2 %vm1545_vm5, %v3137_v4 }
 0x314   : > { %v2159_v28 = vpop.f32.mrf.mxu3 }
 0x315   : > { %v2229_v3 = vadd.f32 %v2159_v28, %v1874_v40 }
 0x316   : > { %v1876_v8 = vpop.f32.mrf.mxu2  ;;  %v1630_v21 = vpop.f32.mrf.mxu1 }
 0x317   : > { %v2265_v39 = vadd.f32 %v4264_v5, %v2229_v3  ;;  %v1877_v56 = vadd.f32 %v1876_v8, %v1623_v9 }
 0x319   : > { %v2297_v19 = vmax.f32 %v2265_v39, 0.0  ;;  %3063 = vmatmul.msk.bf16.gmra.mxu3 %vm1545_vm5, %v3169_v2 }
 0x31b   : > { %v2325_v18 = vpack.c.bf16 %v2297_v19, %v2296_v14  ;;  %v3172_v14 = vld [vmem:[#allocation2 + $0x98] sm:$0xff] }
 0x31c   : > { %v2162_v23 = vpop.f32.mrf.mxu3 }
 0x31d   : > { %3078 = vmatmul.msk.bf16.gmra.mxu1 %vm1092_vm3, %v2325_v18  ;;  %v2230_v17 = vadd.f32 %v2162_v23, %v1877_v56 }
 0x31e   : > { %v1878_v24 = vpop.f32.mrf.mxu2  ;;  %v1633_v34 = vpop.f32.mrf.mxu1 }
 0x31f   : > { %v1879_v62 = vadd.f32 %v1878_v24, %v1625_v52  ;;  %v2266_v55 = vadd.f32 %v4264_v5, %v2230_v17 }
 0x321   : > { %v2298_v15 = vmax.f32 %v2266_v55, 0.0 }
 0x323   : > { %2960 = vmatmul.msk.bf16.gmra.mxu2 %vm1545_vm5, %v3138_v25 }
 0x324   : > { %v2164_v63 = vpop.f32.mrf.mxu3 }
 0x325   : > { %v2231_v43 = vadd.f32 %v2164_v63, %v1879_v62 }
 0x326   : > { %v1881_v47 = vpop.f32.mrf.mxu2  ;;  %v1635_v10 = vpop.f32.mrf.mxu1 }
 0x327   : > { %v2267_v44 = vadd.f32 %v4264_v5, %v2231_v43  ;;  %v1882_v33 = vadd.f32 %v1881_v47, %v1628_v22 }
 0x329   : > { %v2299_v57 = vmax.f32 %v2267_v44, 0.0  ;;  %3064 = vmatmul.msk.bf16.gmra.mxu3 %vm1545_vm5, %v3170_v58 }
 0x32b   : > { %v2326_v26 = vpack.c.bf16 %v2299_v57, %v2298_v15 }
 0x32c   : > { %v2167_v30 = vpop.f32.mrf.mxu3 }
 0x32d   : > { %3079 = vmatmul.msk.bf16.gmra.mxu1 %vm1092_vm3, %v2326_v26  ;;  %v2232_v41 = vadd.f32 %v2167_v30, %v1882_v33 }
 0x32e   : > { %v1883_v27 = vpop.f32.mrf.mxu2  ;;  %v1638_v28 = vpop.f32.mrf.mxu1 }
 0x32f   : > { %v1884_v48 = vadd.f32 %v1883_v27, %v1630_v21  ;;  %v2268_v45 = vadd.f32 %v4264_v5, %v2232_v41 }
 0x331   : > { %v2300_v35 = vmax.f32 %v2268_v45, 0.0 }
 0x333   : > { %2961 = vmatmul.msk.bf16.gmra.mxu2 %vm1545_vm5, %v3139_v59 }
 0x334   : > { %v2169_v49 = vpop.f32.mrf.mxu3 }
 0x335   : > { %v2233_v29 = vadd.f32 %v2169_v49, %v1884_v48 }
 0x336   : > { %v1886_v60 = vpop.f32.mrf.mxu2  ;;  %v1640_v56 = vpop.f32.mrf.mxu1 }
 0x337   : > { %v2269_v9 = vadd.f32 %v4264_v5, %v2233_v29  ;;  %v1887_v37 = vadd.f32 %v1886_v60, %v1633_v34  ;;  %v4309_v29 = vld [vmem:[%s4487_s6] ss:$0 sm:$0xff] }
 0x339   : > { %v2301_v6 = vmax.f32 %v2269_v9, 0.0  ;;  %3065 = vmatmul.msk.bf16.gmra.mxu3 %vm1545_vm5, %v3171_v46 }
 0x33b   : > { %v2327_v12 = vpack.c.bf16 %v2301_v6, %v2300_v35  ;;  %v2495_v6 = vld [vmem:[%s3488_s16] sm:$0xff] }
 0x33c   : > { %v2172_v0 = vpop.f32.mrf.mxu3 }
 0x33d   : > { %3080 = vmatmul.msk.bf16.gmra.mxu1 %vm1092_vm3, %v2327_v12  ;;  %v2234_v52 = vadd.f32 %v2172_v0, %v1887_v37 }
 0x33e   : > { %v1888_v4 = vpop.f32.mrf.mxu2  ;;  %v1643_v44 = vpop.f32.mrf.mxu1 }
 0x33f   : > { %v1889_v40 = vadd.f32 %v1888_v4, %v1635_v10  ;;  %v2270_v8 = vadd.f32 %v4264_v5, %v2234_v52 }
 0x341   : > { %v2302_v19 = vmax.f32 %v2270_v8, 0.0 }
 0x343   : > { %2962 = vmatmul.msk.bf16.gmra.mxu2 %vm1545_vm5, %v3140_v11 }
 0x344   : > { %v2174_v31 = vpop.f32.mrf.mxu3 }
 0x345   : > { %v2235_v39 = vadd.f32 %v2174_v31, %v1889_v40  ;;  %v2496_v31 = vld [vmem:[%s3488_s16 + $0x8] sm:$0xff] }
 0x346   : > { %v1891_v3 = vpop.f32.mrf.mxu2  ;;  %v1645_v34 = vpop.f32.mrf.mxu1 }
 0x347   : > { %v2271_v2 = vadd.f32 %v4264_v5, %v2235_v39  ;;  %v1892_v25 = vadd.f32 %v1891_v3, %v1638_v28 }
 0x349   : > { %v2303_v18 = vmax.f32 %v2271_v2, 0.0  ;;  %3066 = vmatmul.msk.bf16.gmra.mxu3 %vm1545_vm5, %v3172_v14 }
 0x34b   : > { %v2328_v22 = vpack.c.bf16 %v2303_v18, %v2302_v19 }
 0x34c   : > { %v2177_v23 = vpop.f32.mrf.mxu3 }
 0x34d   : > { %3081 = vmatmul.msk.bf16.gmra.mxu1 %vm1092_vm3, %v2328_v22  ;;  %v2236_v17 = vadd.f32 %v2177_v23, %v1892_v25  ;;  %v2497_v25 = vld [vmem:[%s3488_s16 + $0x10] sm:$0xff] }
 0x34e   : > { %v1893_v24 = vpop.f32.mrf.mxu2 }
 0x34f   : > { %v1894_v62 = vadd.f32 %v1893_v24, %v1640_v56  ;;  %v2272_v55 = vadd.f32 %v4264_v5, %v2236_v17 }
 0x351   : > { %v2304_v58 = vmax.f32 %v2272_v55, 0.0 }
 0x354   : > { %v2179_v63 = vpop.f32.mrf.mxu3 }
 0x355   : > { %v2237_v43 = vadd.f32 %v2179_v63, %v1894_v62 }
 0x356   : > { %v1896_v47 = vpop.f32.mrf.mxu2 }
 0x357   : > { %v2273_v21 = vadd.f32 %v4264_v5, %v2237_v43  ;;  %v1897_v27 = vadd.f32 %v1896_v47, %v1643_v44 }
 0x359   : > { %v2305_v15 = vmax.f32 %v2273_v21, 0.0 }
 0x35b   : > { %v2329_v57 = vpack.c.bf16 %v2305_v15, %v2304_v58  ;;  %v2498_v58 = vld [vmem:[%s3488_s16 + $0x18] sm:$0xff] }
 0x35c   : > { %v2182_v26 = vpop.f32.mrf.mxu3 }
 0x35d   : > { %3082 = vmatmul.msk.bf16.gmra.mxu1 %vm1092_vm3, %v2329_v57  ;;  %v2238_v33 = vadd.f32 %v2182_v26, %v1897_v27 }
 0x35e   : > { %v1898_v30 = vpop.f32.mrf.mxu2 }
 0x35f   : > { %v1899_v59 = vadd.f32 %v1898_v30, %v1645_v34  ;;  %v2274_v48 = vadd.f32 %v4264_v5, %v2238_v33 }
 0x361   : > { %v2306_v9 = vmax.f32 %v2274_v48, 0.0 }
 0x364   : > { %v2184_v41 = vpop.f32.mrf.mxu3 }
 0x365   : > { %v2239_v45 = vadd.f32 %v2184_v41, %v1899_v59 }
 0x366   : > { %v1901_v49 = vpop.f32.mrf.mxu2 }
 0x367   : > { %v2275_v60 = vadd.f32 %v4264_v5, %v2239_v45  ;;  %v1902_v11 = vadd.f32 %v1901_v49, %v4158_v51  ;;  %v2499_v45 = vld [vmem:[%s3488_s16 + $0x20] sm:$0xff] }
 0x369   : > { %v2307_v46 = vmax.f32 %v2275_v60, 0.0 }
 0x36a   : > { %v2415_v35 = vpop.f32.mrf.mxu1 }
 0x36b   : > { %v2330_v10 = vpack.c.bf16 %v2307_v46, %v2306_v9  ;;  %v2416_v12 = vadd.f32 %v4309_v29, %v2415_v35 }
 0x36c   : > { %v2187_v0 = vpop.f32.mrf.mxu3 }
 0x36d   : > { %v2527_v4 = vadd.f32 %v2495_v6, %v2416_v12  ;;  %3083 = vmatmul.msk.bf16.gmra.mxu1 %vm1092_vm3, %v2330_v10  ;;  %v2240_v40 = vadd.f32 %v2187_v0, %v1902_v11 }
 0x36e   : > { %v1903_v37 = vpop.f32.mrf.mxu2 }
 0x36f   : > { %v2559_v52 = vmax.f32 %v2527_v4, 0.0  ;;  %v1904_v8 = vadd.f32 %v1903_v37, %v4172_v20  ;;  %v2276_v2 = vadd.f32 %v4264_v5, %v2240_v40  ;;  %v2500_v4 = vld [vmem:[%s3488_s16 + $0x28] sm:$0xff] }
 0x371   : > { %2591 = vst [vmem:[%s4317_s15] sm:$0xff] %v2559_v52  ;;  %v2308_v23 = vmax.f32 %v2276_v2, 0.0 }
 0x372   : > { %v2417_v28 = vpop.f32.mrf.mxu1 }
 0x373   : > { %v2418_v3 = vadd.f32 %v4309_v29, %v2417_v28 }
 0x374   : > { %v2189_v39 = vpop.f32.mrf.mxu3 }
 0x375   : > { %v2528_v14 = vadd.f32 %v2496_v31, %v2418_v3  ;;  %v2241_v19 = vadd.f32 %v2189_v39, %v1904_v8 }
 0x376   : > { %v1906_v51 = vpop.f32.mrf.mxu2 }
 0x377   : > { %v2560_v18 = vmax.f32 %v2528_v14, 0.0  ;;  %v2277_v22 = vadd.f32 %v4264_v5, %v2241_v19  ;;  %v1907_v47 = vadd.f32 %v1906_v51, %v4195_v36  ;;  %v2501_v51 = vld [vmem:[%s3488_s16 + $0x30] sm:$0xff] }
 0x379   : > { %2592 = vst [vmem:[%s4317_s15 + $0x8] sm:$0xff] %v2560_v18  ;;  %v2309_v24 = vmax.f32 %v2277_v22, 0.0 }
 0x37a   : > { %v2420_v56 = vpop.f32.mrf.mxu1 }
 0x37b   : > { %v2331_v17 = vpack.c.bf16 %v2309_v24, %v2308_v23  ;;  %v2421_v20 = vadd.f32 %v4309_v29, %v2420_v56 }
 0x37c   : > { %v2192_v62 = vpop.f32.mrf.mxu3 }
 0x37d   : > { %v2529_v63 = vadd.f32 %v2497_v25, %v2421_v20  ;;  %3084 = vmatmul.msk.bf16.gmra.mxu1 %vm1092_vm3, %v2331_v17  ;;  %v2242_v21 = vadd.f32 %v2192_v62, %v1907_v47  ;;  %v2502_v20 = vld [vmem:[%s3488_s16 + $0x38] sm:$0xff] }
 0x37e   : > { %v1908_v55 = vpop.f32.mrf.mxu2 }
 0x37f   : > { %v2561_v43 = vmax.f32 %v2529_v63, 0.0  ;;  %v1909_v15 = vadd.f32 %v1908_v55, %v4208_v13  ;;  %v2278_v30 = vadd.f32 %v4264_v5, %v2242_v21 }
 0x381   : > { %2593 = vst [vmem:[%s4317_s15 + $0x10] sm:$0xff] %v2561_v43  ;;  %v2310_v41 = vmax.f32 %v2278_v30, 0.0  ;;  %v2503_v30 = vld [vmem:[%s3488_s16 + $0x40] sm:$0xff] }
 0x382   : > { %v2422_v44 = vpop.f32.mrf.mxu1 }
 0x383   : > { %v2423_v57 = vadd.f32 %v4309_v29, %v2422_v44 }
 0x384   : > { %v2194_v26 = vpop.f32.mrf.mxu3 }
 0x385   : > { %v2530_v27 = vadd.f32 %v2498_v58, %v2423_v57  ;;  %v2243_v34 = vadd.f32 %v2194_v26, %v1909_v15 }
 0x386   : > { %v1911_v33 = vpop.f32.mrf.mxu2 }
 0x387   : > { %v2562_v59 = vmax.f32 %v2530_v27, 0.0  ;;  %v2279_v36 = vadd.f32 %v4264_v5, %v2243_v34  ;;  %v1912_v6 = vadd.f32 %v1911_v33, %v4221_v1 }
 0x389   : > { %2594 = vst [vmem:[%s4317_s15 + $0x18] sm:$0xff] %v2562_v59  ;;  %v2311_v48 = vmax.f32 %v2279_v36, 0.0 }
 0x38a   : > { %v2425_v49 = vpop.f32.mrf.mxu1 }
 0x38b   : > { %v2332_v60 = vpack.c.bf16 %v2311_v48, %v2310_v41  ;;  %v2426_v13 = vadd.f32 %v4309_v29, %v2425_v49 }
 0x38c   : > { %v2197_v9 = vpop.f32.mrf.mxu3 }
 0x38d   : > { %v2531_v46 = vadd.f32 %v2499_v45, %v2426_v13  ;;  %3085 = vmatmul.msk.bf16.gmra.mxu1 %vm1092_vm3, %v2332_v60  ;;  %v2244_v12 = vadd.f32 %v2197_v9, %v1912_v6  ;;  %v2504_v45 = vld [vmem:[%s3488_s16 + $0x48] sm:$0xff] }
 0x38e   : > { %v1913_v35 = vpop.f32.mrf.mxu2 }
 0x38f   : > { %v2563_v10 = vmax.f32 %v2531_v46, 0.0  ;;  %v1914_v37 = vadd.f32 %v1913_v35, %v4234_v32  ;;  %v2280_v40 = vadd.f32 %v4264_v5, %v2244_v12 }
 0x391   : > { %2595 = vst [vmem:[%s4317_s15 + $0x20] sm:$0xff] %v2563_v10  ;;  %v2312_v39 = vmax.f32 %v2280_v40, 0.0 }
 0x392   : > { %v2427_v0 = vpop.f32.mrf.mxu1 }
 0x393   : > { %v2428_v11 = vadd.f32 %v4309_v29, %v2427_v0 }
 0x394   : > { %v2199_v52 = vpop.f32.mrf.mxu3 }
 0x395   : > { %v2532_v28 = vadd.f32 %v2500_v4, %v2428_v11  ;;  %v2245_v8 = vadd.f32 %v2199_v52, %v1914_v37  ;;  %v2505_v11 = vld [vmem:[%s3488_s16 + $0x50] sm:$0xff] }
 0x396   : > { %v1916_v31 = vpop.f32.mrf.mxu2 }
 0x397   : > { %v2564_v3 = vmax.f32 %v2532_v28, 0.0  ;;  %v2281_v1 = vadd.f32 %v4264_v5, %v2245_v8  ;;  %v1917_v24 = vadd.f32 %v1916_v31, %v4237_v38 }
 0x399   : > { %2596 = vst [vmem:[%s4317_s15 + $0x28] sm:$0xff] %v2564_v3  ;;  %v2313_v2 = vmax.f32 %v2281_v1, 0.0 }
 0x39a   : > { %v2430_v14 = vpop.f32.mrf.mxu1 }
 0x39b   : > { %v2333_v19 = vpack.c.bf16 %v2313_v2, %v2312_v39  ;;  %v2431_v32 = vadd.f32 %v4309_v29, %v2430_v14  ;;  %v2506_v2 = vld [vmem:[%s3488_s16 + $0x58] sm:$0xff] }
 0x39c   : > { %v2202_v18 = vpop.f32.mrf.mxu3 }
 0x39d   : > { %v2533_v22 = vadd.f32 %v2501_v51, %v2431_v32  ;;  %3086 = vmatmul.msk.bf16.gmra.mxu1 %vm1092_vm3, %v2333_v19  ;;  %v2246_v25 = vadd.f32 %v2202_v18, %v1917_v24 }
 0x39e   : > { %v1918_v23 = vpop.f32.mrf.mxu2 }
 0x39f   : > { %v2565_v56 = vmax.f32 %v2533_v22, 0.0  ;;  %v1919_v62 = vadd.f32 %v1918_v23, %v4242_v42  ;;  %v2282_v47 = vadd.f32 %v4264_v5, %v2246_v25 }
 0x3a1   : > { %2597 = vst [vmem:[%s4317_s15 + $0x30] sm:$0xff] %v2565_v56  ;;  %v2314_v15 = vmax.f32 %v2282_v47, 0.0 }
 0x3a2   : > { %v2432_v17 = vpop.f32.mrf.mxu1 }
 0x3a3   : > { %v2433_v63 = vadd.f32 %v4309_v29, %v2432_v17 }
 0x3a4   : > { %v2204_v55 = vpop.f32.mrf.mxu3 }
 0x3a5   : > { %v2534_v43 = vadd.f32 %v2502_v20, %v2433_v63  ;;  %v2247_v44 = vadd.f32 %v2204_v55, %v1919_v62  ;;  %v2507_v20 = vld [vmem:[%s3488_s16 + $0x60] sm:$0xff] }
 0x3a6   : > { %v1921_v21 = vpop.f32.mrf.mxu2 }
 0x3a7   : > { %v2566_v58 = vmax.f32 %v2534_v43, 0.0  ;;  %v2283_v38 = vadd.f32 %v4264_v5, %v2247_v44  ;;  %v1922_v36 = vadd.f32 %v1921_v21, %v4248_v61 }
 0x3a9   : > { %2598 = vst [vmem:[%s4317_s15 + $0x38] sm:$0xff] %v2566_v58  ;;  %v2315_v57 = vmax.f32 %v2283_v38, 0.0  ;;  %v2508_v38 = vld [vmem:[%s3488_s16 + $0x68] sm:$0xff] }
 0x3aa   : > { %v2435_v26 = vpop.f32.mrf.mxu1 }
 0x3ab   : > { %v2334_v27 = vpack.c.bf16 %v2315_v57, %v2314_v15  ;;  %v2436_v42 = vadd.f32 %v4309_v29, %v2435_v26 }
 0x3ac   : > { %v2207_v33 = vpop.f32.mrf.mxu3 }
 0x3ad   : > { %v2535_v34 = vadd.f32 %v2503_v30, %v2436_v42  ;;  %3087 = vmatmul.msk.bf16.gmra.mxu1 %vm1092_vm3, %v2334_v27  ;;  %v2248_v48 = vadd.f32 %v2207_v33, %v1922_v36 }
 0x3ae   : > { %v1923_v59 = vpop.f32.mrf.mxu2 }
 0x3af   : > { %v2567_v41 = vmax.f32 %v2535_v34, 0.0  ;;  %v1924_v60 = vadd.f32 %v1923_v59, %v4253_v53  ;;  %v2284_v46 = vadd.f32 %v4264_v5, %v2248_v48 }
 0x3b1   : > { %2599 = vst [vmem:[%s4317_s15 + $0x40] sm:$0xff] %v2567_v41  ;;  %v2316_v0 = vmax.f32 %v2284_v46, 0.0  ;;  %v2509_v41 = vld [vmem:[%s3488_s16 + $0x70] sm:$0xff] }
 0x3b2   : > { %v2437_v49 = vpop.f32.mrf.mxu1 }
 0x3b3   : > { %v2438_v13 = vadd.f32 %v4309_v29, %v2437_v49 }
 0x3b4   : > { %v2209_v9 = vpop.f32.mrf.mxu3 }
 0x3b5   : > { %v2536_v35 = vadd.f32 %v2504_v45, %v2438_v13  ;;  %v2249_v10 = vadd.f32 %v2209_v9, %v1924_v60  ;;  %v2510_v13 = vld [vmem:[%s3488_s16 + $0x78] sm:$0xff] }
 0x3b6   : > { %v1926_v6 = vpop.f32.mrf.mxu2 }
 0x3b7   : > { %v2568_v12 = vmax.f32 %v2536_v35, 0.0  ;;  %v2285_v61 = vadd.f32 %v4264_v5, %v2249_v10  ;;  %v1927_v8 = vadd.f32 %v1926_v6, %v4244_v16  ;;  %v2511_v6 = vld [vmem:[%s3488_s16 + $0x80] sm:$0xff] }
 0x3b9   : > { %2600 = vst [vmem:[%s4317_s15 + $0x48] sm:$0xff] %v2568_v12  ;;  %v2317_v4 = vmax.f32 %v2285_v61, 0.0 }
 0x3ba   : > { %v2440_v37 = vpop.f32.mrf.mxu1 }
 0x3bb   : > { %v2335_v52 = vpack.c.bf16 %v2317_v4, %v2316_v0  ;;  %v2441_v53 = vadd.f32 %v4309_v29, %v2440_v37  ;;  %v2512_v4 = vld [vmem:[%s3488_s16 + $0x88] sm:$0xff] }
 0x3bc   : > { %v2212_v40 = vpop.f32.mrf.mxu3 }
 0x3bd   : > { %v2537_v28 = vadd.f32 %v2505_v11, %v2441_v53  ;;  %3088 = vmatmul.msk.bf16.gmra.mxu1 %vm1092_vm3, %v2335_v52  ;;  %v2250_v1 = vadd.f32 %v2212_v40, %v1927_v8  ;;  %v2513_v40 = vld [vmem:[%s3488_s16 + $0x90] sm:$0xff] }
 0x3be   : > { %v1928_v31 = vpop.f32.mrf.mxu2 }
 0x3bf   : > { %v2569_v3 = vmax.f32 %v2537_v28, 0.0  ;;  %v1929_v14 = vadd.f32 %v1928_v31, %v4250_v50  ;;  %v2286_v32 = vadd.f32 %v4264_v5, %v2250_v1  ;;  %v2514_v1 = vld [vmem:[%s3488_s16 + $0x98] sm:$0xff] }
 0x3c1   : > { %2601 = vst [vmem:[%s4317_s15 + $0x50] sm:$0xff] %v2569_v3  ;;  %v2318_v56 = vmax.f32 %v2286_v32, 0.0 }
 0x3c2   : > { %v2442_v39 = vpop.f32.mrf.mxu1 }
 0x3c3   : > { %v2443_v51 = vadd.f32 %v4309_v29, %v2442_v39 }
 0x3c4   : > { %v2214_v19 = vpop.f32.mrf.mxu3 }
 0x3c5   : > { %v2538_v18 = vadd.f32 %v2506_v2, %v2443_v51  ;;  %v2251_v22 = vadd.f32 %v2214_v19, %v1929_v14  ;;  %v2515_v19 = vld [vmem:[%s3488_s16 + $0xa0] sm:$0xff] }
 0x3c6   : > { %v1931_v23 = vpop.f32.mrf.mxu2 }
 0x3c7   : > { %v2570_v24 = vmax.f32 %v2538_v18, 0.0  ;;  %v2287_v16 = vadd.f32 %v4264_v5, %v2251_v22  ;;  %v1932_v47 = vadd.f32 %v1931_v23, %v4255_v54 }
 0x3c9   : > { %2602 = vst [vmem:[%s4317_s15 + $0x58] sm:$0xff] %v2570_v24  ;;  %v2319_v25 = vmax.f32 %v2287_v16, 0.0  ;;  %v2516_v24 = vld [vmem:[%s3488_s16 + $0xa8] sm:$0xff] }
 0x3ca   : > { %v2445_v17 = vpop.f32.mrf.mxu1 }
 0x3cb   : > { %v2336_v62 = vpack.c.bf16 %v2319_v25, %v2318_v56  ;;  %v2446_v50 = vadd.f32 %v4309_v29, %v2445_v17 }
 0x3cc   : > { %v2217_v63 = vpop.f32.mrf.mxu3 }
 0x3cd   : > { %v2539_v55 = vadd.f32 %v2507_v20, %v2446_v50  ;;  %3089 = vmatmul.msk.bf16.gmra.mxu1 %vm1092_vm3, %v2336_v62  ;;  %v2252_v44 = vadd.f32 %v2217_v63, %v1932_v47  ;;  %v2517_v20 = vld [vmem:[%s3488_s16 + $0xb0] sm:$0xff]  ;;  %v2518_v47 = vld [vmem:[%s3488_s16 + $0xb8] sm:$0xff] }
 0x3ce   : > { %v1933_v21 = vpop.f32.mrf.mxu2 }
 0x3cf   : > { %v2571_v43 = vmax.f32 %v2539_v55, 0.0  ;;  %v1934_v15 = vadd.f32 %v1933_v21, %v4258_v7  ;;  %v2288_v30 = vadd.f32 %v4264_v5, %v2252_v44 }
 0x3d1   : > { %2603 = vst [vmem:[%s4317_s15 + $0x60] sm:$0xff] %v2571_v43  ;;  %v2320_v34 = vmax.f32 %v2288_v30, 0.0 }
 0x3d2   : > { %v2447_v58 = vpop.f32.mrf.mxu1 }
 0x3d3   : > { %v2448_v57 = vadd.f32 %v4309_v29, %v2447_v58 }
 0x3d4   : > { %v2219_v26 = vpop.f32.mrf.mxu3 }
 0x3d5   : > { %v2540_v27 = vadd.f32 %v2508_v38, %v2448_v57  ;;  %v2253_v42 = vadd.f32 %v2219_v26, %v1934_v15  ;;  %v2519_v38 = vld [vmem:[%s3488_s16 + $0xc0] sm:$0xff] }
 0x3d7   : > { %v2572_v54 = vmax.f32 %v2540_v27, 0.0  ;;  %v2289_v33 = vadd.f32 %v4264_v5, %v2253_v42  ;;  %v2520_v27 = vld [vmem:[%s3488_s16 + $0xc8] sm:$0xff] }
 0x3d9   : > { %2604 = vst [vmem:[%s4317_s15 + $0x68] sm:$0xff] %v2572_v54  ;;  %v2321_v59 = vmax.f32 %v2289_v33, 0.0 }
 0x3da   : > { %v2450_v36 = vpop.f32.mrf.mxu1 }
 0x3db   : > { %v2337_v7 = vpack.c.bf16 %v2321_v59, %v2320_v34  ;;  %v2451_v48 = vadd.f32 %v4309_v29, %v2450_v36  ;;  %v2521_v59 = vld [vmem:[%s3488_s16 + $0xd0] sm:$0xff] }
 0x3dd   : > { %v2541_v49 = vadd.f32 %v2509_v41, %v2451_v48  ;;  %3090 = vmatmul.msk.bf16.gmra.mxu1 %vm1092_vm3, %v2337_v7 }
 0x3df   : > { %v2573_v45 = vmax.f32 %v2541_v49, 0.0  ;;  %v2522_v49 = vld [vmem:[%s3488_s16 + $0xd8] sm:$0xff] }
 0x3e1   : > { %2605 = vst [vmem:[%s4317_s15 + $0x70] sm:$0xff] %v2573_v45 }
 0x3e2   : > { %v2452_v60 = vpop.f32.mrf.mxu1 }
 0x3e3   : > { %v2453_v5 = vadd.f32 %v4309_v29, %v2452_v60 }
 0x3e5   : > { %v2542_v9 = vadd.f32 %v2510_v13, %v2453_v5 }
 0x3e7   : > { %v2574_v46 = vmax.f32 %v2542_v9, 0.0  ;;  %v2523_v9 = vld [vmem:[%s3488_s16 + $0xe0] sm:$0xff] }
 0x3e9   : > { %2606 = vst [vmem:[%s4317_s15 + $0x78] sm:$0xff] %v2574_v46 }
 0x3ea   : > { %v2455_v35 = vpop.f32.mrf.mxu1 }
 0x3eb   : > { %v2456_v10 = vadd.f32 %v4309_v29, %v2455_v35 }
 0x3ed   : > { %v2543_v12 = vadd.f32 %v2511_v6, %v2456_v10 }
 0x3ef   : > { %v2575_v61 = vmax.f32 %v2543_v12, 0.0  ;;  %v2524_v12 = vld [vmem:[%s3488_s16 + $0xe8] sm:$0xff] }
 0x3f1   : > { %2607 = vst [vmem:[%s4317_s15 + $0x80] sm:$0xff] %v2575_v61 }
 0x3f2   : > { %v2457_v0 = vpop.f32.mrf.mxu1 }
 0x3f3   : > { %v2458_v37 = vadd.f32 %v4309_v29, %v2457_v0 }
 0x3f5   : > { %v2544_v11 = vadd.f32 %v2512_v4, %v2458_v37 }
 0x3f7   : > { %v2576_v52 = vmax.f32 %v2544_v11, 0.0  ;;  %v2525_v11 = vld [vmem:[%s3488_s16 + $0xf0] sm:$0xff] }
 0x3f9   : > { %2608 = vst [vmem:[%s4317_s15 + $0x88] sm:$0xff] %v2576_v52 }
 0x3fa   : > { %v2460_v53 = vpop.f32.mrf.mxu1 }
 0x3fb   : > { %v2461_v28 = vadd.f32 %v4309_v29, %v2460_v53 }
 0x3fd   : > { %v2545_v31 = vadd.f32 %v2513_v40, %v2461_v28 }
 0x3ff   : > { %v2577_v8 = vmax.f32 %v2545_v31, 0.0  ;;  %v2526_v31 = vld [vmem:[%s3488_s16 + $0xf8] sm:$0xff]  ;;  %s3301_s16 = scalar_lea.hbm %s4488_s7, 512 }
 0x400   : > { %p3303_p1 = scmp.lt.s32.totalorder %s3301_s16, %s3297_s8 }
 0x401   : > { %2609 = vst [vmem:[%s4317_s15 + $0x90] sm:$0xff] %v2577_v8 }
 0x402   : > { %v2462_v3 = vpop.f32.mrf.mxu1  ;;  %p3304_p3 = por %p3303_p1, %p3302_p0 }
 0x403   : > { %v2463_v39 = vadd.f32 %v4309_v29, %v2462_v3 }
 0x404   : > { %p3305_p4 = pnand %p3304_p3, %p3300_p13 }
 0x405   : > { %v2546_v2 = vadd.f32 %v2514_v1, %v2463_v39 }
 0x407   : > { %v2578_v14 = vmax.f32 %v2546_v2, 0.0 }
 0x409   : > { %2610 = vst [vmem:[%s4317_s15 + $0x98] sm:$0xff] %v2578_v14 }
 0x40a   : > { %v2465_v51 = vpop.f32.mrf.mxu1 }
 0x40b   : > { %v2466_v32 = vadd.f32 %v4309_v29, %v2465_v51 }
 0x40d   : > { %v2547_v18 = vadd.f32 %v2515_v19, %v2466_v32 }
 0x40f   : > { %v2579_v22 = vmax.f32 %v2547_v18, 0.0 }
 0x411   : > { %2611 = vst [vmem:[%s4317_s15 + $0xa0] sm:$0xff] %v2579_v22 }
 0x412   : > { %v2467_v23 = vpop.f32.mrf.mxu1 }
 0x413   : > { %v2468_v16 = vadd.f32 %v4309_v29, %v2467_v23 }
 0x415   : > { %v2548_v56 = vadd.f32 %v2516_v24, %v2468_v16 }
 0x417   : > { %v2580_v25 = vmax.f32 %v2548_v56, 0.0 }
 0x419   : > { %2612 = vst [vmem:[%s4317_s15 + $0xa8] sm:$0xff] %v2580_v25 }
 0x41a   : > { %v2470_v17 = vpop.f32.mrf.mxu1 }
 0x41b   : > { %v2471_v62 = vadd.f32 %v4309_v29, %v2470_v17 }
 0x41d   : > { %v2549_v50 = vadd.f32 %v2517_v20, %v2471_v62 }
 0x41f   : > { %v2581_v63 = vmax.f32 %v2549_v50, 0.0 }
 0x421   : > { %2613 = vst [vmem:[%s4317_s15 + $0xb0] sm:$0xff] %v2581_v63 }
 0x422   : > { %v2472_v55 = vpop.f32.mrf.mxu1 }
 0x423   : > { %v2473_v43 = vadd.f32 %v4309_v29, %v2472_v55 }
 0x425   : > { %v2550_v21 = vadd.f32 %v2518_v47, %v2473_v43 }
 0x427   : > { %v2582_v44 = vmax.f32 %v2550_v21, 0.0 }
 0x429   : > { %2614 = vst [vmem:[%s4317_s15 + $0xb8] sm:$0xff] %v2582_v44 }
 0x42a   : > { %v2475_v58 = vpop.f32.mrf.mxu1 }
 0x42b   : > { %v2476_v15 = vadd.f32 %v4309_v29, %v2475_v58 }
 0x42d   : > { %v2551_v57 = vadd.f32 %v2519_v38, %v2476_v15 }
 0x42f   : > { %v2583_v26 = vmax.f32 %v2551_v57, 0.0 }
 0x431   : > { %2615 = vst [vmem:[%s4317_s15 + $0xc0] sm:$0xff] %v2583_v26 }
 0x432   : > { %v2477_v30 = vpop.f32.mrf.mxu1 }
 0x433   : > { %v2478_v42 = vadd.f32 %v4309_v29, %v2477_v30 }
 0x435   : > { %v2552_v54 = vadd.f32 %v2520_v27, %v2478_v42 }
 0x437   : > { %v2584_v33 = vmax.f32 %v2552_v54, 0.0 }
 0x439   : > { %2616 = vst [vmem:[%s4317_s15 + $0xc8] sm:$0xff] %v2584_v33 }
 0x43a   : > { %v2480_v34 = vpop.f32.mrf.mxu1 }
 0x43b   : > { %v2481_v36 = vadd.f32 %v4309_v29, %v2480_v34 }
 0x43d   : > { %v2553_v41 = vadd.f32 %v2521_v59, %v2481_v36 }
 0x43f   : > { %v2585_v7 = vmax.f32 %v2553_v41, 0.0 }
 0x441   : > { %2617 = vst [vmem:[%s4317_s15 + $0xd0] sm:$0xff] %v2585_v7 }
 0x442   : > { %v2482_v48 = vpop.f32.mrf.mxu1 }
 0x443   : > { %v2483_v45 = vadd.f32 %v4309_v29, %v2482_v48 }
 0x445   : > { %v2554_v60 = vadd.f32 %v2522_v49, %v2483_v45 }
 0x447   : > { %v2586_v13 = vmax.f32 %v2554_v60, 0.0 }
 0x449   : > { %2618 = vst [vmem:[%s4317_s15 + $0xd8] sm:$0xff] %v2586_v13 }
 0x44a   : > { %v2485_v5 = vpop.f32.mrf.mxu1 }
 0x44b   : > { %v2486_v46 = vadd.f32 %v4309_v29, %v2485_v5 }
 0x44d   : > { %v2555_v35 = vadd.f32 %v2523_v9, %v2486_v46 }
 0x44f   : > { %v2587_v6 = vmax.f32 %v2555_v35, 0.0 }
 0x451   : > { %2619 = vst [vmem:[%s4317_s15 + $0xe0] sm:$0xff] %v2587_v6 }
 0x452   : > { %v2487_v10 = vpop.f32.mrf.mxu1 }
 0x453   : > { %v2488_v61 = vadd.f32 %v4309_v29, %v2487_v10 }
 0x455   : > { %v2556_v0 = vadd.f32 %v2524_v12, %v2488_v61 }
 0x457   : > { %v2588_v4 = vmax.f32 %v2556_v0, 0.0 }
 0x459   : > { %2620 = vst [vmem:[%s4317_s15 + $0xe8] sm:$0xff] %v2588_v4 }
 0x45a   : > { %v2490_v37 = vpop.f32.mrf.mxu1 }
 0x45b   : > { %v2491_v52 = vadd.f32 %v4309_v29, %v2490_v37 }
 0x45d   : > { %v2557_v53 = vadd.f32 %v2525_v11, %v2491_v52 }
 0x45f   : > { %v2589_v40 = vmax.f32 %v2557_v53, 0.0 }
 0x461   : > { %2621 = vst [vmem:[%s4317_s15 + $0xf0] sm:$0xff] %v2589_v40 }
 0x462   : > { %v2492_v28 = vpop.f32.mrf.mxu1 }
 0x463   : > { %v2493_v8 = vadd.f32 %v4309_v29, %v2492_v28 }
 0x465   : > { %v2558_v3 = vadd.f32 %v2526_v31, %v2493_v8 }
 0x467   : > { %v2590_v1 = vmax.f32 %v2558_v3, 0.0 }
 0x469   : > { %2622 = vst [vmem:[%s4317_s15 + $0xf8] sm:$0xff] %v2590_v1 }
 0x46a   : > { %3308 = shalt.err (!%p3305_p4)
}
 0x46b   : > { %s3354_s22 = smov 128   ;;  %s3355_s15 = smov 8  }
 0x46c   : > { %3197 = dma.vmem_to_hbm [thread:$0]  (%p3446_p11), %s2638_s19, 4096, %s2640_s23, %s2624_s29, %s3354_s22, %s3354_s22, %s3355_s15  }
 0x46d PF: > { %s2654_s10 = sand.u32 1, %s3335_s24   ;;  %p4495_p7 = scmp.ge.s32.totalorder %s3347_s27, 2 }
 0x46e   : > { %s2655_s20 = scalar_lea.sflag [#allocation5], %s2654_s10 }
 0x46f   : > { %p3204_p5 = pnand %p4495_p7, %p3450_p12 }
 0x471   : > { %p3205_p8 = pneg %p3204_p5 }
 0x473   : > { %3330 = dma.done.wait (%p3205_p8), %s2655_s20, 4096  }
 0x474   : > { %3332 = vsyncadd (%p3205_p8), %s2655_s20, 4294963200  ;;  %s4496_s9 = sld [smem:[#allocation9_spill]]  ;;  %p20_p10 = scmp.ge.s32.totalorder %s3421_s30, 4  }
 0x475   : > { %s4497_s24 = smov %s3339_s25  ;;  %s4498_s25 = smov %s3343_s26 }
 0x476   : > { %s4500_s27 = smov %s3421_s30  ;;  %22 = sbr.rel (!%p20_p10) target bundleno = 5 (0x5), region = 96 }
 0x47a   : > { %s4499_s26 = smov %s4496_s9 }
 0x47b   :  { %2661 = vsyncpa [#allocation4], 1 }
 0x47c   :  { %2663 = vsyncpa [#allocation4 + $0x1], 1 }
 0x47d   :  { %2664 = vsyncpa [#allocation5], 1 }
 0x47e   :  { %2666 = vsyncpa [#allocation5 + $0x1], 1 }

// kernel: tpu_custom_call.1
= control target key start
LH: loop header
LB: loop body
LE: loop exit
PB: predicated region body
PF: predicated region fallthrough
CT: control target
= control target key end

     0   :  { %12 = vsyncpa [#allocation4], 0  ;;  %s4481_s0 = inlined_call_operand.hbm [shape: f32[8,8,8,128], index: 0, kind: input, shape index: {}]   ;;  %s4482_s1 = inlined_call_operand.vmem [shape: bf16[128,32], index: 1, kind: input, shape index: {}]   ;;  %s4483_s2 = inlined_call_operand.vmem [shape: f32[1,32], index: 2, kind: input, shape index: {}]   ;;  %s4484_s3 = inlined_call_operand.vmem [shape: bf16[3,96,32], index: 3, kind: input, shape index: {}]   ;;  %s4485_s4 = inlined_call_operand.vmem [shape: f32[1,32], index: 4, kind: input, shape index: {}]   ;;  %s4486_s5 = inlined_call_operand.vmem [shape: bf16[32,128], index: 5, kind: input, shape index: {}]   ;;  %s4487_s6 = inlined_call_operand.vmem [shape: f32[1,128], index: 6, kind: input, shape index: {}]   ;;  %s4488_s7 = inlined_call_operand.hbm [shape: f32[8,8,8,128], index: 7, kind: output, shape index: {}]  }
   0x1   :  { %14 = vsyncpa [#allocation4 + $0x1], 0 }
   0x2   :  { %15 = vsyncpa [#allocation5], 0 }
   0x3   :  { %17 = vsyncpa [#allocation5 + $0x1], 0  ;;  %s3396_s24 = smov 0   ;;  %s3398_s25 = smov 0  }
   0x4   :  { %s3400_s26 = smov 0   ;;  %s3402_s27 = smov 0  }
   0x5 LB: > { %s3417_s28 = sadd.s32 4294967295, %s3347_s27   ;;  %s2713_s29 = sadd.s32 4294967294, %s3347_s27   ;;  %s3347_s27 = sphi %s3402_s27, %s4500_s27   ;;  %s3343_s26 = sphi %s3400_s26, %s4499_s26   ;;  %s3339_s25 = sphi %s3398_s25, %s4498_s25   ;;  %s3335_s24 = sphi %s3396_s24, %s4497_s24  }
   0x6   : > { %s3421_s30 = sadd.s32 1, %s3347_s27   ;;  %s30_s8 = sadd.s32 1, %s3343_s26 }
   0x7   : > { %s27_s9 = ssub.s32 %s3347_s27, %s3421_s30  ;;  %p37_p0 = scmp.ne.s32.totalorder %s3343_s26, %s3339_s25 }
   0x8   : > { %p28_p1 = scmp.eq.s32.totalorder %s27_s9, 0  ;;  %p38_p2 = scmp.eq.s32.totalorder %s3347_s27, 0 }
   0x9   : > { %p43_p3 = scmp.ne.s32.totalorder %s3339_s25, %s3335_s24  ;;  %p44_p4 = scmp.eq.s32.totalorder %s3417_s28, 0 }
   0xa   : > { %s3433_s10 = scalar_select %p28_p1, %s3343_s26, %s30_s8  }
   0xb   : > { %p3435_p5 = por %p38_p2, %p37_p0  ;;  %p3439_p6 = por %p44_p4, %p43_p3 }
   0xc   : > { %4489 = sst [smem:[#allocation9_spill]] %s3433_s10  ;;  %p193_p7 = scmp.eq.s32.totalorder %s3417_s28, 1 }
   0xd   : > { %p199_p8 = scmp.eq.s32.totalorder %s2713_s29, 1  ;;  %p3207_p10 = scmp.lt.s32.totalorder %s3347_s27, 2 }
   0xe   : > { %p3446_p11 = por %p193_p7, %p37_p0  ;;  %s237_s15 = sand.u32 1, %s3343_s26  }
   0xf   : > { %p3450_p12 = por %p199_p8, %p43_p3  ;;  %s3098_s16 = sshll.u32 %s3347_s27, 8 }
  0x10   : > { %s2716_s17 = sshll.u32 %s237_s15, 8  ;;  %s247_s20 = scalar_lea.hbm %s4481_s0, %s3098_s16 }
  0x11   : > { %s248_s21 = sshll.u32 %s247_s20, 4  ;;  %s241_s22 = scalar_lea.vmem [#allocation3], %s2716_s17  ;;  %s249_s21 = int_to_ptr.hbm [resolvable:$true] %s248_s21 }
  0x12   : > { %s250_s23 = sshll.u32 %s241_s22, 4  ;;  %p3461_p13 = pnand %p3207_p10, %p3435_p5  ;;  %s251_s23 = int_to_ptr.vmem [resolvable:$true] %s250_s23 }
  0x13   : > { %p2720_p0 = scmp.ge.s32.totalorder %s3347_s27, 1  ;;  %p258_p1 = scmp.lt.s32.totalorder %s3347_s27, 3 }
  0x14   : > { %s238_s8 = scalar_lea.sflag [#allocation4], %s237_s15  ;;  %s3251_s9 = sshra.s32 %s249_s21, 4  ;;  %s3252_s9 = int_to_ptr.hbm [resolvable:$true] %s3251_s9 }
  0x15   : > { %s3253_s10 = scalar_lea.hbm %s3252_s9, 256  ;;  %p3255_p3 = pneg %p3461_p13 }
  0x16   : > { %p3254_p2 = scmp.ne.s32.totalorder %s3252_s9, %s3253_s10  ;;  %s3258_s11 = scalar_lea.hbm %s4481_s0, 512 }
  0x17   : > { %p3259_p5 = scmp.lt.s32.totalorder %s3252_s9, %s4481_s0  ;;  %p3260_p8 = scmp.lt.s32.totalorder %s3258_s11, %s3253_s10 }
  0x18   : > { %p3256_p4 = pnand %p3255_p3, %p3254_p2 }
  0x19   : > { %p3261_p10 = por %p3260_p8, %p3259_p5 }
  0x1a   : > { %p3257_p7 = pneg %p3256_p4 }
  0x1c   : > { %p3262_p9 = pnand %p3261_p10, %p3257_p7 }
  0x1e   : > { %3265 = shalt.err (!%p3262_p9)
}
  0x1f   : > { %s3349_s15 = smov 128   ;;  %s3350_s20 = smov 8  }
  0x20   : > { %3202 = dma.hbm_to_vmem [thread:$0]  (!%p3461_p13), %s249_s21, 4096, %s251_s23, %s238_s8, %s3349_s15, %s3349_s15, %s3350_s20  }
  0x21   : > { %p259_p2 = pnand %p2720_p0, %p258_p1 }
  0x22   : > { %s3482_s22 = sand.u32 (!%p259_p2), 1, %s3339_s25  }
  0x23   : > { %262 = sbr.rel (%p259_p2) target bundleno = 1133 (0x46d), region = 48  ;;  %s2721_s10 = sshll.u32 (!%p259_p2), %s3482_s22, 8 }
  0x24   : > { %s265_s9 = scalar_lea.sflag (!%p259_p2), [#allocation4], %s3482_s22  ;;  %s3488_s16 = scalar_lea.vmem (!%p259_p2), [#allocation3], %s2721_s10 }
  0x28   : > { %3326 = dma.done.wait (%p3439_p6), %s265_s9, 4096  }
  0x29   : > { %3328 = vsyncadd (%p3439_p6), %s265_s9, 4294963200  ;;  %v3106_v0 = vld [vmem:[%s4482_s1 + $0x38] sm:$0xff]  ;;  %v3105_v1 = vld [vmem:[%s4482_s1 + $0x30] sm:$0xff]  ;;  %s3351_s19 = smov 32   ;;  %s3352_s15 = smov 64   ;;  %vm1189_vm2 = vcmask 523264  }
  0x2a   : > { %419 = vmatpush.bf16.msra.mxu0 %v3106_v0  ;;  %v3104_v2 = vld [vmem:[%s4482_s1 + $0x28] sm:$0xff]  ;;  %v3103_v3 = vld [vmem:[%s4482_s1 + $0x20] sm:$0xff]  ;;  %v3102_v4 = vld [vmem:[%s4482_s1 + $0x18] sm:$0xff]  ;;  %vm1092_vm3 = vcmask 261120   ;;  %vm1286_vm4 = vcmask 781312   ;;  %vm1545_vm5 = vcmask 785408  }
  0x2b   : > { %v3101_v5 = vld [vmem:[%s4482_s1 + $0x10] sm:$0xff]  ;;  %v3100_v6 = vld [vmem:[%s4482_s1 + $0x8] sm:$0xff]  ;;  %v3099_v7 = vld [vmem:[%s4482_s1] sm:$0xff]  ;;  %s2624_s29 = scalar_lea.sflag [#allocation5], %s3482_s22 }
  0x2c   : > { %v303_v8 = vld [vmem:[%s3488_s16] sm:$0xff]  ;;  %v304_v9 = vld [vmem:[%s3488_s16 + $0x8] sm:$0xff]  ;;  %v305_v11 = vld [vmem:[%s3488_s16 + $0x10] sm:$0xff] }
  0x2d   : > { %v335_v10 = vpack.c.bf16 %v304_v9, %v303_v8  ;;  %v306_v12 = vld [vmem:[%s3488_s16 + $0x18] sm:$0xff]  ;;  %v307_v14 = vld [vmem:[%s3488_s16 + $0x20] sm:$0xff]  ;;  %v308_v15 = vld [vmem:[%s3488_s16 + $0x28] sm:$0xff] }
  0x2e   : > { %420 = vmatpush.bf16.msra.mxu0 %v3105_v1  ;;  %v336_v13 = vpack.c.bf16 %v306_v12, %v305_v11  ;;  %v337_v16 = vpack.c.bf16 %v308_v15, %v307_v14  ;;  %v309_v17 = vld [vmem:[%s3488_s16 + $0x30] sm:$0xff]  ;;  %v310_v18 = vld [vmem:[%s3488_s16 + $0x38] sm:$0xff]  ;;  %v311_v20 = vld [vmem:[%s3488_s16 + $0x40] sm:$0xff]  ;;  %v540_v11 = vlaneseq }
  0x2f   : > { %v338_v19 = vpack.c.bf16 %v310_v18, %v309_v17  ;;  %v312_v21 = vld [vmem:[%s3488_s16 + $0x48] sm:$0xff]  ;;  %v313_v23 = vld [vmem:[%s3488_s16 + $0x50] sm:$0xff]  ;;  %v314_v24 = vld [vmem:[%s3488_s16 + $0x58] sm:$0xff] }
  0x30   : > { %v339_v22 = vpack.c.bf16 %v312_v21, %v311_v20  ;;  %v340_v25 = vpack.c.bf16 %v314_v24, %v313_v23  ;;  %v315_v26 = vld [vmem:[%s3488_s16 + $0x60] sm:$0xff]  ;;  %v316_v27 = vld [vmem:[%s3488_s16 + $0x68] sm:$0xff]  ;;  %v317_v29 = vld [vmem:[%s3488_s16 + $0x70] sm:$0xff]  ;;  %v3595_v15 = vshrl.u32 %v540_v11, 7 }
  0x31   : > { %v341_v28 = vpack.c.bf16 %v316_v27, %v315_v26  ;;  %v318_v30 = vld [vmem:[%s3488_s16 + $0x78] sm:$0xff]  ;;  %v319_v32 = vld [vmem:[%s3488_s16 + $0x80] sm:$0xff]  ;;  %v320_v33 = vld [vmem:[%s3488_s16 + $0x88] sm:$0xff] }
  0x32   : > { %421 = vmatpush.bf16.msra.mxu0 %v3104_v2  ;;  %v342_v31 = vpack.c.bf16 %v318_v30, %v317_v29  ;;  %v343_v34 = vpack.c.bf16 %v320_v33, %v319_v32  ;;  %v321_v37 = vld [vmem:[%s3488_s16 + $0x90] sm:$0xff]  ;;  %v322_v38 = vld [vmem:[%s3488_s16 + $0x98] sm:$0xff]  ;;  %v323_v42 = vld [vmem:[%s3488_s16 + $0xa0] sm:$0xff]  ;;  %vm609_vm0 = vcmp.eq.s32.totalorder %v3595_v15, 7  ;;  %vm542_vm1 = vcmp.eq.s32.totalorder %v3595_v15, 0 }
  0x33   : > { %v344_v39 = vpack.c.bf16 %v322_v38, %v321_v37  ;;  %v324_v43 = vld [vmem:[%s3488_s16 + $0xa8] sm:$0xff]  ;;  %v325_v47 = vld [vmem:[%s3488_s16 + $0xb0] sm:$0xff]  ;;  %v326_v48 = vld [vmem:[%s3488_s16 + $0xb8] sm:$0xff] }
  0x34   : > { %v345_v44 = vpack.c.bf16 %v324_v43, %v323_v42  ;;  %v346_v49 = vpack.c.bf16 %v326_v48, %v325_v47  ;;  %v327_v52 = vld [vmem:[%s3488_s16 + $0xc0] sm:$0xff]  ;;  %v328_v53 = vld [vmem:[%s3488_s16 + $0xc8] sm:$0xff]  ;;  %v329_v57 = vld [vmem:[%s3488_s16 + $0xd0] sm:$0xff] }
  0x35   : > { %v347_v54 = vpack.c.bf16 %v328_v53, %v327_v52  ;;  %v330_v58 = vld [vmem:[%s3488_s16 + $0xd8] sm:$0xff]  ;;  %v331_v62 = vld [vmem:[%s3488_s16 + $0xe0] sm:$0xff]  ;;  %v332_v63 = vld [vmem:[%s3488_s16 + $0xe8] sm:$0xff] }
  0x36   : > { %422 = vmatpush.bf16.msra.mxu0 %v3103_v3  ;;  %v348_v59 = vpack.c.bf16 %v330_v58, %v329_v57  ;;  %v349_v0 = vpack.c.bf16 %v332_v63, %v331_v62  ;;  %v333_v3 = vld [vmem:[%s3488_s16 + $0xf0] sm:$0xff]  ;;  %v3118_v8 = vld [vmem:[%s4484_s3 + $0x58] sm:$0xff]  ;;  %v3592_v12 = vld [vmem:[%s4483_s2] ss:$0 sm:$0xff] }
  0x37   : > { %3178 = vmatpush.bf16.msra.mxu2 %v3118_v8  ;;  %3179 = vmatpush.bf16.msra.mxu3 %v3118_v8  ;;  %v3117_v47 = vld [vmem:[%s4484_s3 + $0x50] sm:$0xff] }
  0x38   : > { %3177 = vmatpush.bf16.msra.mxu1 %v3118_v8 }
  0x3a   : > { %423 = vmatpush.bf16.msra.mxu0 %v3102_v4  ;;  %v334_v4 = vld [vmem:[%s3488_s16 + $0xf8] sm:$0xff] }
  0x3b   : > { %3181 = vmatpush.bf16.msra.mxu2 %v3117_v47  ;;  %3182 = vmatpush.bf16.msra.mxu3 %v3117_v47 }
  0x3c   : > { %3180 = vmatpush.bf16.msra.mxu1 %v3117_v47 }
  0x3e   : > { %424 = vmatpush.bf16.msra.mxu0 %v3101_v5  ;;  %v350_v5 = vpack.c.bf16 %v334_v4, %v333_v3 }
  0x42   : > { %425 = vmatpush.bf16.msra.mxu0 %v3100_v6 }
  0x46   : > { %426 = vmatpush.bf16.msra.mxu0 %v3099_v7 }
  0x49   : > { %427 = vmatmul.bf16.vlgmr.msra.gmra.mxu0 %v335_v10 }
  0x4a   : > { %1596 = vmatpush.bf16.msrb.mxu0 %v3118_v8 }
  0x4e   : > { %1597 = vmatpush.bf16.msrb.mxu0 %v3117_v47 }
  0x59   : > { %432 = vmatmul.bf16.gmra.mxu0 %v336_v13 }
  0x69   : > { %437 = vmatmul.bf16.gmra.mxu0 %v337_v16 }
  0x79   : > { %442 = vmatmul.bf16.gmra.mxu0 %v338_v19 }
  0x89   : > { %447 = vmatmul.bf16.gmra.mxu0 %v339_v22 }
  0x99   : > { %452 = vmatmul.bf16.gmra.mxu0 %v340_v25 }
  0xa9   : > { %457 = vmatmul.bf16.gmra.mxu0 %v341_v28 }
  0xb9   : > { %462 = vmatmul.bf16.gmra.mxu0 %v342_v31 }
  0xc6   : > { %v3536_v35 = vpop.f32.mrf.mxu0 }
  0xc9   : > { %467 = vmatmul.bf16.gmra.mxu0 %v343_v34 }
  0xce   : > { %v3538_v36 = vpop.f32.mrf.mxu0 }
  0xd6   : > { %v3542_v40 = vpop.f32.mrf.mxu0 }
  0xd9   : > { %472 = vmatmul.bf16.gmra.mxu0 %v344_v39 }
  0xde   : > { %v3544_v41 = vpop.f32.mrf.mxu0 }
  0xe6   : > { %v3548_v45 = vpop.f32.mrf.mxu0 }
  0xe9   : > { %477 = vmatmul.bf16.gmra.mxu0 %v345_v44 }
  0xee   : > { %v3550_v46 = vpop.f32.mrf.mxu0 }
  0xf6   : > { %v3554_v50 = vpop.f32.mrf.mxu0 }
  0xf9   : > { %482 = vmatmul.bf16.gmra.mxu0 %v346_v49 }
  0xfe   : > { %v3556_v51 = vpop.f32.mrf.mxu0 }
 0x106   : > { %v3560_v55 = vpop.f32.mrf.mxu0 }
 0x109   : > { %487 = vmatmul.bf16.gmra.mxu0 %v347_v54 }
 0x10e   : > { %v3562_v56 = vpop.f32.mrf.mxu0 }
 0x116   : > { %v3566_v60 = vpop.f32.mrf.mxu0 }
 0x119   : > { %492 = vmatmul.bf16.gmra.mxu0 %v348_v59 }
 0x11e   : > { %v3568_v61 = vpop.f32.mrf.mxu0 }
 0x126   : > { %v3572_v1 = vpop.f32.mrf.mxu0 }
 0x129   : > { %497 = vmatmul.bf16.gmra.mxu0 %v349_v0 }
 0x12e   : > { %v3574_v2 = vpop.f32.mrf.mxu0 }
 0x136   : > { %v3578_v6 = vpop.f32.mrf.mxu0 }
 0x139   : > { %502 = vmatmul.bf16.gmra.mxu0 %v350_v5 }
 0x13e   : > { %v3580_v7 = vpop.f32.mrf.mxu0 }
 0x146   : > { %v3585_v9 = vpop.f32.mrf.mxu0 }
 0x14e   : > { %v3587_v10 = vpop.f32.mrf.mxu0 }
 0x156   : > { %v473_v13 = vpop.f32.mrf.mxu0 }
 0x157   : > { %v474_v14 = vadd.f32 %v3592_v12, %v473_v13 }
 0x159   : > { %v3597_v16 = vmax.f32 %v474_v14, 0.0 }
 0x15b   : > { %v726_v17 = vpack.c.bf16 %v3597_v16, %v3597_v16  ;;  %v628_v18 = vrot.slane %v3597_v16, 1 }
 0x15d   : > { %v822_v19 = vunpack.c.l.b16 %v726_v17  ;;  %v662_v20 = vsel %vm609_vm0, 0.0, %v628_v18 }
 0x15e   : > { %v475_v21 = vpop.f32.mrf.mxu0  ;;  %v758_v22 = vpack.c.bf16 %v662_v20, %v662_v20 }
 0x15f   : > { %v476_v23 = vadd.f32 %v3592_v12, %v475_v21  ;;  %v854_v24 = vpack.c.b16 %v822_v19, %v822_v19 }
 0x160   : > { %v982_v25 = vunpack.c.l.b16 %v758_v22 }
 0x161   : > { %v3606_v26 = vmax.f32 %v476_v23, 0.0  ;;  %904 = vrot.lane.b32.xlu0 %v854_v24, %s3351_s19 }
 0x162   : > { %v1014_v27 = vpack.c.b16 %v982_v25, %v982_v25 }
 0x163   : > { %v629_v28 = vrot.slane %v3606_v26, 1  ;;  %v727_v29 = vpack.c.bf16 %v3606_v26, %v3606_v26 }
 0x164   : > { %1064 = vrot.lane.b32.xlu1 %v1014_v27, %s3352_s15 }
 0x165   : > { %v823_v30 = vunpack.c.l.b16 %v727_v29  ;;  %v663_v31 = vsel %vm609_vm0, 0.0, %v629_v28 }
 0x166   : > { %v478_v32 = vpop.f32.mrf.mxu0  ;;  %v759_v33 = vpack.c.bf16 %v663_v31, %v663_v31 }
 0x167   : > { %v479_v34 = vadd.f32 %v3592_v12, %v478_v32  ;;  %v855_v37 = vpack.c.b16 %v823_v30, %v823_v30 }
 0x168   : > { %v983_v38 = vunpack.c.l.b16 %v759_v33 }
 0x169   : > { %v3616_v39 = vmax.f32 %v479_v34, 0.0  ;;  %906 = vrot.lane.b32.xlu0 %v855_v37, %s3351_s19 }
 0x16a   : > { %v1015_v42 = vpack.c.b16 %v983_v38, %v983_v38 }
 0x16b   : > { %v630_v43 = vrot.slane %v3616_v39, 1  ;;  %v728_v44 = vpack.c.bf16 %v3616_v39, %v3616_v39 }
 0x16c   : > { %1066 = vrot.lane.b32.xlu1 %v1015_v42, %s3352_s15 }
 0x16d   : > { %v824_v48 = vunpack.c.l.b16 %v728_v44  ;;  %v664_v49 = vsel %vm609_vm0, 0.0, %v630_v43 }
 0x16e   : > { %v480_v52 = vpop.f32.mrf.mxu0  ;;  %v760_v53 = vpack.c.bf16 %v664_v49, %v664_v49 }
 0x16f   : > { %v481_v54 = vadd.f32 %v3592_v12, %v480_v52  ;;  %v856_v57 = vpack.c.b16 %v824_v48, %v824_v48 }
 0x170   : > { %v984_v58 = vunpack.c.l.b16 %v760_v53 }
 0x171   : > { %v3629_v59 = vmax.f32 %v481_v54, 0.0  ;;  %908 = vrot.lane.b32.xlu2 %v856_v57, %s3351_s19 }
 0x172   : > { %v1016_v62 = vpack.c.b16 %v984_v58, %v984_v58 }
 0x173   : > { %v631_v63 = vrot.slane %v3629_v59, 1  ;;  %v729_v0 = vpack.c.bf16 %v3629_v59, %v3629_v59 }
 0x174   : > { %1068 = vrot.lane.b32.xlu0 %v1016_v62, %s3352_s15 }
 0x175   : > { %v825_v3 = vunpack.c.l.b16 %v729_v0  ;;  %v665_v4 = vsel %vm609_vm0, 0.0, %v631_v63 }
 0x176   : > { %v483_v5 = vpop.f32.mrf.mxu0  ;;  %v761_v8 = vpack.c.bf16 %v665_v4, %v665_v4 }
 0x177   : > { %v484_v11 = vadd.f32 %v3592_v12, %v483_v5  ;;  %v857_v13 = vpack.c.b16 %v825_v3, %v825_v3 }
 0x178   : > { %v985_v14 = vunpack.c.l.b16 %v761_v8 }
 0x179   : > { %v3639_v17 = vmax.f32 %v484_v11, 0.0  ;;  %910 = vrot.lane.b32.xlu2 %v857_v13, %s3351_s19  ;;  %v3116_v11 = vld [vmem:[%s4484_s3 + $0x48] sm:$0xff] }
 0x17a   : > { %v1017_v18 = vpack.c.b16 %v985_v14, %v985_v14  ;;  %1598 = vmatpush.bf16.msrb.mxu0 %v3116_v11  ;;  %3184 = vmatpush.bf16.msra.mxu2 %v3116_v11 }
 0x17b   : > { %v632_v19 = vrot.slane %v3639_v17, 1  ;;  %v730_v20 = vpack.c.bf16 %v3639_v17, %v3639_v17  ;;  %3185 = vmatpush.bf16.msra.mxu3 %v3116_v11  ;;  %3183 = vmatpush.bf16.msra.mxu1 %v3116_v11 }
 0x17c   : > { %1070 = vrot.lane.b32.xlu1 %v1017_v18, %s3352_s15 }
 0x17d   : > { %v826_v21 = vunpack.c.l.b16 %v730_v20  ;;  %v666_v22 = vsel %vm609_vm0, 0.0, %v632_v19 }
 0x17e   : > { %v485_v23 = vpop.f32.mrf.mxu0  ;;  %v762_v24 = vpack.c.bf16 %v666_v22, %v666_v22 }
 0x17f   : > { %v486_v25 = vadd.f32 %v3592_v12, %v485_v23  ;;  %v858_v27 = vpack.c.b16 %v826_v21, %v826_v21 }
 0x180   : > { %v986_v28 = vunpack.c.l.b16 %v762_v24 }
 0x181   : > { %v3649_v29 = vmax.f32 %v486_v25, 0.0  ;;  %912 = vrot.lane.b32.xlu2 %v858_v27, %s3351_s19 }
 0x182   : > { %v1018_v30 = vpack.c.b16 %v986_v28, %v986_v28 }
 0x183   : > { %v633_v31 = vrot.slane %v3649_v29, 1  ;;  %v731_v32 = vpack.c.bf16 %v3649_v29, %v3649_v29 }
 0x184   : > { %1072 = vrot.lane.b32.xlu1 %v1018_v30, %s3352_s15 }
 0x185   : > { %v827_v33 = vunpack.c.l.b16 %v731_v32  ;;  %v667_v34 = vsel %vm609_vm0, 0.0, %v633_v31 }
 0x186   : > { %v488_v37 = vpop.f32.mrf.mxu0  ;;  %v763_v38 = vpack.c.bf16 %v667_v34, %v667_v34 }
 0x187   : > { %v489_v42 = vadd.f32 %v3592_v12, %v488_v37  ;;  %v859_v43 = vpack.c.b16 %v827_v33, %v827_v33 }
 0x188   : > { %v987_v44 = vunpack.c.l.b16 %v763_v38 }
 0x189   : > { %v3659_v47 = vmax.f32 %v489_v42, 0.0  ;;  %914 = vrot.lane.b32.xlu0 %v859_v43, %s3351_s19 }
 0x18a   : > { %v1019_v48 = vpack.c.b16 %v987_v44, %v987_v44 }
 0x18b   : > { %v634_v49 = vrot.slane %v3659_v47, 1  ;;  %v732_v52 = vpack.c.bf16 %v3659_v47, %v3659_v47 }
 0x18c   : > { %1074 = vrot.lane.b32.xlu2 %v1019_v48, %s3352_s15 }
 0x18d   : > { %v828_v53 = vunpack.c.l.b16 %v732_v52  ;;  %v668_v54 = vsel %vm609_vm0, 0.0, %v634_v49 }
 0x18e   : > { %v490_v57 = vpop.f32.mrf.mxu0  ;;  %v764_v58 = vpack.c.bf16 %v668_v54, %v668_v54 }
 0x18f   : > { %v491_v62 = vadd.f32 %v3592_v12, %v490_v57  ;;  %v860_v63 = vpack.c.b16 %v828_v53, %v828_v53 }
 0x190   : > { %v988_v0 = vunpack.c.l.b16 %v764_v58 }
 0x191   : > { %v3669_v3 = vmax.f32 %v491_v62, 0.0  ;;  %916 = vrot.lane.b32.xlu0 %v860_v63, %s3351_s19 }
 0x192   : > { %v1020_v4 = vpack.c.b16 %v988_v0, %v988_v0 }
 0x193   : > { %v635_v5 = vrot.slane %v3669_v3, 1  ;;  %v733_v8 = vpack.c.bf16 %v3669_v3, %v3669_v3 }
 0x194   : > { %1076 = vrot.lane.b32.xlu2 %v1020_v4, %s3352_s15 }
 0x195   : > { %v829_v13 = vunpack.c.l.b16 %v733_v8  ;;  %v669_v14 = vsel %vm609_vm0, 0.0, %v635_v5 }
 0x196   : > { %v493_v18 = vpop.f32.mrf.mxu0  ;;  %v765_v19 = vpack.c.bf16 %v669_v14, %v669_v14 }
 0x197   : > { %v861_v20 = vpack.c.b16 %v829_v13, %v829_v13  ;;  %v494_v30 = vadd.f32 %v3592_v12, %v493_v18 }
 0x198   : > { %v989_v21 = vunpack.c.l.b16 %v765_v19 }
 0x199   : > { %918 = vrot.lane.b32.xlu1 %v861_v20, %s3351_s19  ;;  %v3695_v43 = vmax.f32 %v494_v30, 0.0 }
 0x19a   : > { %v1021_v22 = vpack.c.b16 %v989_v21, %v989_v21 }
 0x19b   : > { %v636_v57 = vrot.slane %v3695_v43, 1  ;;  %v734_v14 = vpack.c.bf16 %v3695_v43, %v3695_v43 }
 0x19c   : > { %1078 = vrot.lane.b32.xlu0 %v1021_v22, %s3352_s15 }
 0x19d   : > { %v670_v18 = vsel %vm609_vm0, 0.0, %v636_v57  ;;  %v431_v57 = vadd.f32 %v3592_v12, %v3538_v36 }
 0x19e   : > { %v495_v23 = vpop.f32.mrf.mxu0 }
 0x19f   : > { %v496_v28 = vadd.f32 %v3592_v12, %v495_v23 }
 0x1a1   : > { %v3693_v37 = vmax.f32 %v496_v28, 0.0 }
 0x1a3   : > { %v735_v54 = vpack.c.bf16 %v3693_v37, %v3693_v37  ;;  %v637_v19 = vrot.slane %v3693_v37, 1 }
 0x1a5   : > { %v831_v5 = vunpack.c.l.b16 %v735_v54  ;;  %v671_v30 = vsel %vm609_vm0, 0.0, %v637_v19 }
 0x1a6   : > { %v498_v24 = vpop.f32.mrf.mxu0 }
 0x1a7   : > { %v499_v25 = vadd.f32 %v3592_v12, %v498_v24  ;;  %v863_v22 = vpack.c.b16 %v831_v5, %v831_v5  ;;  %v766_v24 = vpack.c.bf16 %v670_v18, %v670_v18 }
 0x1a9   : > { %v3684_v27 = vmax.f32 %v499_v25, 0.0  ;;  %v830_v25 = vunpack.c.l.b16 %v734_v14 }
 0x1ab   : > { %v638_v31 = vrot.slane %v3684_v27, 1  ;;  %v736_v32 = vpack.c.bf16 %v3684_v27, %v3684_v27 }
 0x1ad   : > { %v832_v33 = vunpack.c.l.b16 %v736_v32  ;;  %v672_v34 = vsel %vm609_vm0, 0.0, %v638_v31  ;;  %v3115_v31 = vld [vmem:[%s4484_s3 + $0x40] sm:$0xff] }
 0x1ae   : > { %v500_v38 = vpop.f32.mrf.mxu0  ;;  %v768_v42 = vpack.c.bf16 %v672_v34, %v672_v34  ;;  %v990_v34 = vunpack.c.l.b16 %v766_v24  ;;  %1599 = vmatpush.bf16.msrb.mxu0 %v3115_v31  ;;  %3187 = vmatpush.bf16.msra.mxu2 %v3115_v31 }
 0x1af   : > { %v501_v44 = vadd.f32 %v3592_v12, %v500_v38  ;;  %v864_v48 = vpack.c.b16 %v832_v33, %v832_v33  ;;  %3188 = vmatpush.bf16.msra.mxu3 %v3115_v31  ;;  %3186 = vmatpush.bf16.msra.mxu1 %v3115_v31 }
 0x1b0   : > { %v992_v49 = vunpack.c.l.b16 %v768_v42  ;;  %v862_v42 = vpack.c.b16 %v830_v25, %v830_v25  ;;  %v436_v25 = vadd.f32 %v3592_v12, %v3544_v41 }
 0x1b1   : > { %v3698_v52 = vmax.f32 %v501_v44, 0.0  ;;  %924 = vrot.lane.b32.xlu1 %v864_v48, %s3351_s19  ;;  %v767_v44 = vpack.c.bf16 %v671_v30, %v671_v30  ;;  %v429_v48 = vadd.f32 %v3592_v12, %v3536_v35  ;;  %v434_v35 = vadd.f32 %v3592_v12, %v3542_v40  ;;  %v3113_v40 = vld [vmem:[%s4484_s3 + $0x30] sm:$0xff] }
 0x1b2   : > { %v1024_v53 = vpack.c.b16 %v992_v49, %v992_v49 }
 0x1b3   : > { %v639_v58 = vrot.slane %v3698_v52, 1  ;;  %v737_v62 = vpack.c.bf16 %v3698_v52, %v3698_v52  ;;  %v3745_v5 = vmax.f32 %v429_v48, 0.0  ;;  %v3758_v18 = vmax.f32 %v434_v35, 0.0 }
 0x1b4   : > { %1084 = vrot.lane.b32.xlu0 %v1024_v53, %s3352_s15  ;;  %v3114_v53 = vld [vmem:[%s4484_s3 + $0x38] sm:$0xff] }
 0x1b5   : > { %v833_v63 = vunpack.c.l.b16 %v737_v62  ;;  %v673_v0 = vsel %vm609_vm0, 0.0, %v639_v58  ;;  %v1022_v62 = vpack.c.b16 %v990_v34, %v990_v34  ;;  %3190 = vmatpush.bf16.msra.mxu2 %v3114_v53  ;;  %1600 = vmatpush.bf16.msrb.mxu0 %v3114_v53  ;;  %v708_v24 = vpack.c.bf16 %v3745_v5, %v3745_v5 }
 0x1b6   : > { %v503_v4 = vpop.f32.mrf.mxu0  ;;  %v769_v8 = vpack.c.bf16 %v673_v0, %v673_v0  ;;  %v991_v0 = vunpack.c.l.b16 %v767_v44  ;;  %3191 = vmatpush.bf16.msra.mxu3 %v3114_v53  ;;  %3189 = vmatpush.bf16.msra.mxu1 %v3114_v53  ;;  %v3774_v44 = vmax.f32 %v436_v25, 0.0 }
 0x1b7   : > { %v504_v11 = vadd.f32 %v3592_v12, %v503_v4  ;;  %v865_v13 = vpack.c.b16 %v833_v63, %v833_v63 }
 0x1b8   : > { %v993_v20 = vunpack.c.l.b16 %v769_v8  ;;  %v1023_v19 = vpack.c.b16 %v991_v0, %v991_v0  ;;  %v613_v35 = vrot.slane %v3774_v44, 1 }
 0x1b9   : > { %v3716_v21 = vmax.f32 %v504_v11, 0.0  ;;  %926 = vrot.lane.b32.xlu2 %v865_v13, %s3351_s19  ;;  %v3756_v11 = vmax.f32 %v431_v57, 0.0  ;;  %3193 = vmatpush.bf16.msra.mxu2 %v3113_v40 }
 0x1ba   : > { %v1025_v23 = vpack.c.b16 %v993_v20, %v993_v20  ;;  %1601 = vmatpush.bf16.msrb.mxu0 %v3113_v40  ;;  %3194 = vmatpush.bf16.msra.mxu3 %v3113_v40 }
 0x1bb   : > { %v738_v28 = vpack.c.bf16 %v3716_v21, %v3716_v21  ;;  %v640_v49 = vrot.slane %v3716_v21, 1  ;;  %3192 = vmatpush.bf16.msra.mxu1 %v3113_v40  ;;  %v709_v31 = vpack.c.bf16 %v3756_v11, %v3756_v11  ;;  %v611_v57 = vrot.slane %v3756_v11, 1 }
 0x1bc   : > { %922 = vrot.lane.b32.xlu0 %v863_v22, %s3351_s19  ;;  %1086 = vrot.lane.b32.xlu1 %v1025_v23, %s3352_s15  ;;  %v610_v22 = vrot.slane %v3745_v5, 1 }
 0x1bd   : > { %v834_v33 = vunpack.c.l.b16 %v738_v28  ;;  %v674_v36 = vsel %vm609_vm0, 0.0, %v640_v49  ;;  %v805_v41 = vunpack.c.l.b16 %v709_v31 }
 0x1be   : > { %v505_v32 = vpop.f32.mrf.mxu0  ;;  %v770_v20 = vpack.c.bf16 %v674_v36, %v674_v36  ;;  %v644_v34 = vsel %vm609_vm0, 0.0, %v610_v22 }
 0x1bf   : > { %v506_v38 = vadd.f32 %v3592_v12, %v505_v32  ;;  %v866_v58 = vpack.c.b16 %v834_v33, %v834_v33  ;;  %v612_v32 = vrot.slane %v3758_v18, 1  ;;  %v740_v49 = vpack.c.bf16 %v644_v34, %v644_v34 }
 0x1c0   : > { %v994_v33 = vunpack.c.l.b16 %v770_v20  ;;  %v837_v0 = vpack.c.b16 %v805_v41, %v805_v41 }
 0x1c1   : > { %v3735_v54 = vmax.f32 %v506_v38, 0.0  ;;  %920 = vrot.lane.b32.xlu2 %v862_v42, %s3351_s19  ;;  %v561_v38 = vrot.slane %v3597_v16, 7  ;;  %v804_v42 = vunpack.c.l.b16 %v708_v24  ;;  %v646_v53 = vsel %vm609_vm0, 0.0, %v612_v32 }
 0x1c2   : > { %v1026_v48 = vpack.c.b16 %v994_v33, %v994_v33  ;;  %v710_v16 = vpack.c.bf16 %v3758_v18, %v3758_v18  ;;  %v964_v40 = vunpack.c.l.b16 %v740_v49  ;;  %v647_v24 = vsel %vm609_vm0, 0.0, %v613_v35 }
 0x1c3   : > { %v641_v63 = vrot.slane %v3735_v54, 1  ;;  %v739_v4 = vpack.c.bf16 %v3735_v54, %v3735_v54  ;;  %v743_v32 = vpack.c.bf16 %v647_v24, %v647_v24  ;;  %v711_v33 = vpack.c.bf16 %v3774_v44, %v3774_v44 }
 0x1c4   : > { %928 = vrot.lane.b32.xlu0 %v866_v58, %s3351_s19  ;;  %1080 = vrot.lane.b32.xlu1 %v1022_v62, %s3352_s15  ;;  %v595_v58 = vsel %vm542_vm1, 0.0, %v561_v38  ;;  %v836_v62 = vpack.c.b16 %v804_v42, %v804_v42  ;;  %v444_v38 = vadd.f32 %v3592_v12, %v3554_v50 }
 0x1c5   : > { %v675_v8 = vsel %vm609_vm0, 0.0, %v641_v63  ;;  %v835_v14 = vunpack.c.l.b16 %v739_v4  ;;  %v439_v63 = vadd.f32 %v3592_v12, %v3548_v45  ;;  %v742_v4 = vpack.c.bf16 %v646_v53, %v646_v53 }
 0x1c6   : > { %v771_v13 = vpack.c.bf16 %v675_v8, %v675_v8  ;;  %v694_v8 = vpack.c.bf16 %v595_v58, %v595_v58  ;;  %v967_v58 = vunpack.c.l.b16 %v743_v32 }
 0x1c7   : > { %v867_v30 = vpack.c.b16 %v835_v14, %v835_v14  ;;  %v562_v14 = vrot.slane %v3606_v26, 7  ;;  %v3793_v20 = vmax.f32 %v439_v63, 0.0  ;;  %v441_v26 = vadd.f32 %v3592_v12, %v3550_v46 }
 0x1c8   : > { %v995_v23 = vunpack.c.l.b16 %v771_v13  ;;  %v645_v13 = vsel %vm609_vm0, 0.0, %v611_v57  ;;  %v563_v57 = vrot.slane %v3616_v39, 7 }
 0x1c9   : > { %1082 = vrot.lane.b32.xlu2 %v1023_v19, %s3352_s15  ;;  %v806_v19 = vunpack.c.l.b16 %v710_v16  ;;  %v596_v31 = vsel %vm542_vm1, 0.0, %v562_v14  ;;  %v614_v34 = vrot.slane %v3793_v20, 1  ;;  %v3812_v46 = vmax.f32 %v441_v26, 0.0 }
 0x1ca   : > { %v1027_v28 = vpack.c.b16 %v995_v23, %v995_v23  ;;  %v966_v23 = vunpack.c.l.b16 %v742_v4  ;;  %v695_v53 = vpack.c.bf16 %v596_v31, %v596_v31  ;;  %v3815_v16 = vmax.f32 %v444_v38, 0.0  ;;  %v3112_v38 = vld [vmem:[%s4484_s3 + $0x28] sm:$0xff] }
 0x1cb   : > { %v838_v41 = vpack.c.b16 %v806_v19, %v806_v19  ;;  %v909_v35 = vpop.permute.xlu2 %908  ;;  %v615_v39 = vrot.slane %v3812_v46, 1  ;;  %v597_v14 = vsel %vm542_vm1, 0.0, %v563_v57  ;;  %1849 = vmatpush.bf16.msrb.mxu2 %v3112_v38 }
 0x1cc   : > { %1090 = vrot.lane.b32.xlu0 %v1027_v28, %s3352_s15  ;;  %930 = vrot.lane.b32.xlu1 %v867_v30, %s3351_s19  ;;  %v996_v28 = vpack.c.b16 %v964_v40, %v964_v40  ;;  %v741_v30 = vpack.c.bf16 %v645_v13, %v645_v13  ;;  %v998_v42 = vpack.c.b16 %v966_v23, %v966_v23 }
 0x1cd   : > { %v712_v40 = vpack.c.bf16 %v3793_v20, %v3793_v20  ;;  %v446_v13 = vadd.f32 %v3592_v12, %v3556_v51  ;;  %v714_v24 = vpack.c.bf16 %v3815_v16, %v3815_v16  ;;  %v696_v51 = vpack.c.bf16 %v597_v14, %v597_v14 }
 0x1ce   : > { %v965_v49 = vunpack.c.l.b16 %v741_v30  ;;  %v649_v26 = vsel %vm609_vm0, 0.0, %v615_v39  ;;  %v565_v39 = vrot.slane %v3639_v17, 7 }
 0x1cf   : > { %v1155_v32 = vsel %vm1092_vm3, %v696_v51, %v909_v35  ;;  %v745_v35 = vpack.c.bf16 %v649_v26, %v649_v26 }
 0x1d1   : > { %1088 = vrot.lane.b32.xlu2 %v1026_v48, %s3352_s15 }
 0x1d3   : > { %v905_v36 = vpop.permute.xlu0 %904 }
 0x1d4   : > { %870 = vrot.lane.b32.xlu0 %v837_v0, %s3351_s19  ;;  %868 = vrot.lane.b32.xlu1 %v836_v62, %s3351_s19  ;;  %v1149_v45 = vsel %vm1092_vm3, %v694_v8, %v905_v36  ;;  %v807_v62 = vunpack.c.l.b16 %v711_v33  ;;  %v648_v0 = vsel %vm609_vm0, 0.0, %v614_v34  ;;  %v997_v36 = vpack.c.b16 %v965_v49, %v965_v49 }
 0x1d5   : > { %v3353_v8 = vmov 0   ;;  %v744_v19 = vpack.c.bf16 %v648_v0, %v648_v0  ;;  %v810_v34 = vunpack.c.l.b16 %v714_v24  ;;  %v616_v49 = vrot.slane %v3815_v16, 1 }
 0x1d6   : > { %v1065_v22 = vpop.permute.xlu1 %1064  ;;  %1287 = vst.msk [vmem:[#allocation2] sm:$0xf] %vm1286_vm4, %v3353_v8  ;;  %v839_v23 = vpack.c.b16 %v807_v62, %v807_v62 }
 0x1d7   : > { %v1245_v25 = vsel %vm1189_vm2, %v1149_v45, %v1065_v22  ;;  %1288 = vst.msk [vmem:[#allocation2 + $0x28] sm:$0xf] %vm1286_vm4, %v3353_v8  ;;  %v449_v45 = vadd.f32 %v3592_v12, %v3560_v55  ;;  %v999_v22 = vpack.c.b16 %v967_v58, %v967_v58  ;;  %v564_v55 = vrot.slane %v3629_v59, 7 }
 0x1d8   : > { %1315 = vst.msk [vmem:[#allocation2 + $0x5c] sm:$0xf] %vm1286_vm4, %v1245_v25  ;;  %v808_v25 = vunpack.c.l.b16 %v712_v40  ;;  %v968_v30 = vunpack.c.l.b16 %v744_v19  ;;  %v842_v0 = vpack.c.b16 %v810_v34, %v810_v34 }
 0x1d9   : > { %1028 = vrot.lane.b32.xlu2 %v996_v28, %s3352_s15  ;;  %1289 = vst.msk [vmem:[#allocation2 + $0x50] sm:$0xf] %vm1286_vm4, %v3353_v8  ;;  %v3841_v28 = vmax.f32 %v446_v13, 0.0  ;;  %v3847_v31 = vmax.f32 %v449_v45, 0.0  ;;  %v598_v58 = vsel %vm542_vm1, 0.0, %v564_v55  ;;  %v969_v13 = vunpack.c.l.b16 %v745_v35 }
 0x1da   : > { %1290 = vst.msk [vmem:[#allocation2 + $0x78] sm:$0xf] %vm1286_vm4, %v3353_v8  ;;  %v1000_v62 = vpack.c.b16 %v968_v30, %v968_v30  ;;  %v697_v40 = vpack.c.bf16 %v598_v58, %v598_v58  ;;  %v599_v55 = vsel %vm542_vm1, 0.0, %v565_v39 }
 0x1db   : > { %v907_v48 = vpop.permute.xlu0 %906  ;;  %1292 = vst.msk [vmem:[#allocation2 + $0x24] sm:$0xf] %vm1286_vm4, %v3353_v8  ;;  %v617_v57 = vrot.slane %v3841_v28, 1  ;;  %v1001_v38 = vpack.c.b16 %v969_v13, %v969_v13  ;;  %v456_v13 = vadd.f32 %v3592_v12, %v3568_v61 }
 0x1dc   : > { %1032 = vrot.lane.b32.xlu0 %v998_v42, %s3352_s15  ;;  %872 = vrot.lane.b32.xlu1 %v838_v41, %s3351_s19  ;;  %v1152_v50 = vsel %vm1092_vm3, %v695_v53, %v907_v48  ;;  %1293 = vst.msk [vmem:[#allocation2 + $0x4c] sm:$0xf] %vm1286_vm4, %v3353_v8  ;;  %v840_v42 = vpack.c.b16 %v808_v25, %v808_v25  ;;  %v911_v53 = vpop.permute.xlu2 %910 }
 0x1dd   : > { %1294 = vst.msk [vmem:[#allocation2 + $0x74] sm:$0xf] %vm1286_vm4, %v3353_v8  ;;  %v713_v48 = vpack.c.bf16 %v3812_v46, %v3812_v46  ;;  %v651_v14 = vsel %vm609_vm0, 0.0, %v617_v57  ;;  %v1158_v19 = vsel %vm1092_vm3, %v697_v40, %v911_v53  ;;  %v3921_v61 = vmax.f32 %v456_v13, 0.0 }
 0x1de   : > { %v1067_v63 = vpop.permute.xlu1 %1066  ;;  %1295 = vst.msk [vmem:[#allocation2 + $0x9c] sm:$0xf] %vm1286_vm4, %v3353_v8  ;;  %v650_v8 = vsel %vm609_vm0, 0.0, %v616_v49  ;;  %v747_v17 = vpack.c.bf16 %v651_v14, %v651_v14  ;;  %v3111_v49 = vld [vmem:[%s4484_s3 + $0x20] sm:$0xff]  ;;  %v459_v14 = vadd.f32 %v3592_v12, %v3572_v1 }
 0x1df   : > { %v1248_v4 = vsel %vm1189_vm2, %v1152_v50, %v1067_v63  ;;  %v618_v50 = vrot.slane %v3847_v31, 1  ;;  %v451_v63 = vadd.f32 %v3592_v12, %v3562_v56  ;;  %v746_v51 = vpack.c.bf16 %v650_v8, %v650_v8  ;;  %1850 = vmatpush.bf16.msrb.mxu2 %v3111_v49 }
 0x1e0   : > { %1316 = vst.msk [vmem:[#allocation2 + $0x60] sm:$0xf] %vm1286_vm4, %v1248_v4  ;;  %v715_v4 = vpack.c.bf16 %v3841_v28, %v3841_v28  ;;  %v464_v49 = vadd.f32 %v3592_v12, %v3578_v6 }
 0x1e1   : > { %1030 = vrot.lane.b32.xlu2 %v997_v36, %s3352_s15  ;;  %v809_v36 = vunpack.c.l.b16 %v713_v48  ;;  %v3877_v56 = vmax.f32 %v451_v63, 0.0  ;;  %v971_v48 = vunpack.c.l.b16 %v747_v17 }
 0x1e3   : > { %v841_v25 = vpack.c.b16 %v809_v36, %v809_v36  ;;  %v619_v26 = vrot.slane %v3877_v56, 1  ;;  %v717_v8 = vpack.c.bf16 %v3877_v56, %v3877_v56 }
 0x1e4   : > { %1034 = vrot.lane.b32.xlu0 %v999_v22, %s3352_s15  ;;  %874 = vrot.lane.b32.xlu1 %v839_v23, %s3351_s19  ;;  %v811_v22 = vunpack.c.l.b16 %v715_v4  ;;  %v652_v23 = vsel %vm609_vm0, 0.0, %v618_v50  ;;  %v1003_v4 = vpack.c.b16 %v971_v48, %v971_v48 }
 0x1e5   : > { %v748_v30 = vpack.c.bf16 %v652_v23, %v652_v23 }
 0x1e6   : > { %v1069_v33 = vpop.permute.xlu0 %1068  ;;  %v843_v34 = vpack.c.b16 %v811_v22, %v811_v22  ;;  %v567_v22 = vrot.slane %v3659_v47, 7 }
 0x1e7   : > { %v1251_v59 = vsel %vm1189_vm2, %v1155_v32, %v1069_v33  ;;  %v3150_v41 = vld [vmem:[#allocation2 + $0x5c] sm:$0xff]  ;;  %v454_v32 = vadd.f32 %v3592_v12, %v3566_v60  ;;  %v913_v33 = vpop.permute.xlu2 %912  ;;  %v972_v53 = vunpack.c.l.b16 %v748_v30  ;;  %v3923_v30 = vmax.f32 %v459_v14, 0.0 }
 0x1e8   : > { %1317 = vst.msk [vmem:[#allocation2 + $0x64] sm:$0xf] %vm1286_vm4, %v1251_v59  ;;  %2852 = vmatmul.msk.bf16.vlgmr.msra.gmra.mxu2 %vm1545_vm5, %v3150_v41  ;;  %v566_v59 = vrot.slane %v3649_v29, 7  ;;  %v698_v41 = vpack.c.bf16 %v599_v55, %v599_v55  ;;  %v653_v29 = vsel %vm609_vm0, 0.0, %v619_v26  ;;  %v813_v55 = vunpack.c.l.b16 %v717_v8 }
 0x1e9   : > { %876 = vrot.lane.b32.xlu2 %v840_v42, %s3351_s19  ;;  %v970_v42 = vunpack.c.l.b16 %v746_v51  ;;  %v3896_v57 = vmax.f32 %v454_v32, 0.0  ;;  %v1004_v36 = vpack.c.b16 %v972_v53, %v972_v53  ;;  %v749_v40 = vpack.c.bf16 %v653_v29, %v653_v29 }
 0x1ea   : > { %v1161_v60 = vsel %vm1092_vm3, %v698_v41, %v913_v33  ;;  %v600_v63 = vsel %vm542_vm1, 0.0, %v566_v59  ;;  %v601_v26 = vsel %vm542_vm1, 0.0, %v567_v22  ;;  %v621_v59 = vrot.slane %v3921_v61, 1 }
 0x1eb   : > { %v1002_v35 = vpack.c.b16 %v970_v42, %v970_v42  ;;  %v620_v39 = vrot.slane %v3896_v57, 1  ;;  %v973_v17 = vunpack.c.l.b16 %v749_v40  ;;  %v718_v32 = vpack.c.bf16 %v3896_v57, %v3896_v57 }
 0x1ec   : > { %880 = vrot.lane.b32.xlu0 %v842_v0, %s3351_s19  ;;  %1036 = vrot.lane.b32.xlu1 %v1000_v62, %s3352_s15  ;;  %v716_v0 = vpack.c.bf16 %v3847_v31, %v3847_v31  ;;  %v461_v42 = vadd.f32 %v3592_v12, %v3574_v2  ;;  %v700_v41 = vpack.c.bf16 %v601_v26, %v601_v26  ;;  %v3110_v2 = vld [vmem:[%s4484_s3 + $0x18] sm:$0xff] }
 0x1ed   : > { %v654_v1 = vsel %vm609_vm0, 0.0, %v620_v39  ;;  %v1005_v33 = vpack.c.b16 %v973_v17, %v973_v17  ;;  %v720_v48 = vpack.c.bf16 %v3923_v30, %v3923_v30  ;;  %1851 = vmatpush.bf16.msrb.mxu2 %v3110_v2  ;;  %v719_v8 = vpack.c.bf16 %v3921_v61, %v3921_v61 }
 0x1ee   : > { %v1071_v45 = vpop.permute.xlu1 %1070 }
 0x1ef   : > { %v1254_v24 = vsel %vm1189_vm2, %v1158_v19, %v1071_v45  ;;  %v1075_v19 = vpop.permute.xlu2 %1074  ;;  %v699_v45 = vpack.c.bf16 %v600_v63, %v600_v63  ;;  %v816_v6 = vunpack.c.l.b16 %v720_v48  ;;  %v469_v48 = vadd.f32 %v3592_v12, %v3585_v9 }
 0x1f0   : > { %1318 = vst.msk [vmem:[#allocation2 + $0x68] sm:$0xf] %vm1286_vm4, %v1254_v24  ;;  %v812_v24 = vunpack.c.l.b16 %v716_v0  ;;  %v655_v0 = vsel %vm609_vm0, 0.0, %v621_v59  ;;  %v466_v59 = vadd.f32 %v3592_v12, %v3580_v7  ;;  %v471_v7 = vadd.f32 %v3592_v12, %v3587_v10 }
 0x1f1   : > { %878 = vrot.lane.b32.xlu2 %v841_v25, %s3351_s19  ;;  %v751_v13 = vpack.c.bf16 %v655_v0, %v655_v0  ;;  %v848_v14 = vpack.c.b16 %v816_v6, %v816_v6 }
 0x1f2   : > { %v844_v47 = vpack.c.b16 %v812_v24, %v812_v24  ;;  %v815_v24 = vunpack.c.l.b16 %v719_v8  ;;  %v3989_v2 = vmax.f32 %v466_v59, 0.0 }
 0x1f3   : > { %v975_v17 = vunpack.c.l.b16 %v751_v13 }
 0x1f4   : > { %882 = vrot.lane.b32.xlu0 %v843_v34, %s3351_s19  ;;  %1038 = vrot.lane.b32.xlu1 %v1001_v38, %s3352_s15  ;;  %v845_v34 = vpack.c.b16 %v813_v55, %v813_v55  ;;  %v750_v38 = vpack.c.bf16 %v654_v1, %v654_v1  ;;  %v723_v13 = vpack.c.bf16 %v3989_v2, %v3989_v2 }
 0x1f6   : > { %v1073_v58 = vpop.permute.xlu1 %1072  ;;  %v974_v63 = vunpack.c.l.b16 %v750_v38 }
 0x1f7   : > { %v1257_v62 = vsel %vm1189_vm2, %v1161_v60, %v1073_v58  ;;  %v3151_v50 = vld [vmem:[#allocation2 + $0x64] sm:$0xff]  ;;  %v814_v60 = vunpack.c.l.b16 %v718_v32  ;;  %v1077_v58 = vpop.permute.xlu2 %1076  ;;  %v847_v32 = vpack.c.b16 %v815_v24, %v815_v24  ;;  %v571_v24 = vrot.slane %v3684_v27, 7 }
 0x1f8   : > { %1319 = vst.msk [vmem:[#allocation2 + $0x6c] sm:$0xf] %vm1286_vm4, %v1257_v62  ;;  %2853 = vmatmul.msk.bf16.gmra.mxu2 %vm1545_vm5, %v3151_v50  ;;  %v568_v62 = vrot.slane %v3669_v3, 7  ;;  %v3948_v50 = vmax.f32 %v461_v42, 0.0  ;;  %v622_v3 = vrot.slane %v3923_v30, 1  ;;  %v1007_v42 = vpack.c.b16 %v975_v17, %v975_v17  ;;  %v3123_v27 = vld [vmem:[%s4484_s3 + $0x80] sm:$0xff] }
 0x1f9   : > { %1040 = vrot.lane.b32.xlu2 %v1002_v35, %s3352_s15 }
 0x1fa   : > { %v602_v39 = vsel %vm542_vm1, 0.0, %v568_v62  ;;  %v623_v38 = vrot.slane %v3948_v50, 1  ;;  %v3995_v62 = vmax.f32 %v469_v48, 0.0 }
 0x1fb   : > { %v915_v23 = vpop.permute.xlu0 %914 }
 0x1fc   : > { %v1164_v25 = vsel %vm1092_vm3, %v699_v45, %v915_v23  ;;  %1044 = vrot.lane.b32.xlu0 %v1004_v36, %s3352_s15  ;;  %1042 = vrot.lane.b32.xlu1 %v1003_v4, %s3352_s15  ;;  %v3953_v4 = vmax.f32 %v464_v49, 0.0  ;;  %v846_v36 = vpack.c.b16 %v814_v60, %v814_v60  ;;  %v721_v45 = vpack.c.bf16 %v3948_v50, %v3948_v50 }
 0x1fd   : > { %v1260_v51 = vsel %vm1189_vm2, %v1164_v25, %v1075_v19  ;;  %v1006_v19 = vpack.c.b16 %v974_v63, %v974_v63  ;;  %v701_v25 = vpack.c.bf16 %v602_v39, %v602_v39  ;;  %v657_v9 = vsel %vm609_vm0, 0.0, %v623_v38 }
 0x1fe   : > { %1320 = vst.msk [vmem:[#allocation2 + $0x70] sm:$0xf] %vm1286_vm4, %v1260_v51  ;;  %v624_v22 = vrot.slane %v3953_v4, 1  ;;  %v656_v51 = vsel %vm609_vm0, 0.0, %v622_v3  ;;  %v722_v60 = vpack.c.bf16 %v3953_v4, %v3953_v4  ;;  %v3997_v63 = vmax.f32 %v471_v7, 0.0 }
 0x1ff   : > { %v753_v0 = vpack.c.bf16 %v657_v9, %v657_v9  ;;  %v724_v39 = vpack.c.bf16 %v3995_v62, %v3995_v62  ;;  %v570_v7 = vrot.slane %v3693_v37, 7 }
 0x200   : > { %v818_v6 = vunpack.c.l.b16 %v722_v60  ;;  %v572_v60 = vrot.slane %v3698_v52, 7 }
 0x201   : > { %884 = vrot.lane.b32.xlu2 %v844_v47, %s3351_s19  ;;  %v817_v47 = vunpack.c.l.b16 %v721_v45 }
 0x202   : > { %v850_v3 = vpack.c.b16 %v818_v6, %v818_v6 }
 0x203   : > { %v917_v53 = vpop.permute.xlu0 %916  ;;  %v849_v49 = vpack.c.b16 %v817_v47, %v817_v47 }
 0x204   : > { %v1167_v29 = vsel %vm1092_vm3, %v700_v41, %v917_v53  ;;  %1046 = vrot.lane.b32.xlu0 %v1005_v33, %s3352_s15  ;;  %886 = vrot.lane.b32.xlu1 %v845_v34, %s3351_s19  ;;  %v752_v33 = vpack.c.bf16 %v656_v51, %v656_v51  ;;  %v658_v34 = vsel %vm609_vm0, 0.0, %v624_v22  ;;  %v3109_v41 = vld [vmem:[%s4484_s3 + $0x10] sm:$0xff]  ;;  %v977_v22 = vunpack.c.l.b16 %v753_v0 }
 0x205   : > { %v1263_v35 = vsel %vm1189_vm2, %v1167_v29, %v1077_v58  ;;  %v3152_v40 = vld [vmem:[#allocation2 + $0x6c] sm:$0xff]  ;;  %v754_v53 = vpack.c.bf16 %v658_v34, %v658_v34  ;;  %1852 = vmatpush.bf16.msrb.mxu2 %v3109_v41  ;;  %v819_v51 = vunpack.c.l.b16 %v723_v13  ;;  %v725_v0 = vpack.c.bf16 %v3997_v63, %v3997_v63 }
 0x206   : > { %1321 = vst.msk [vmem:[#allocation2 + $0x7c] sm:$0xf] %vm1286_vm4, %v1263_v35  ;;  %v976_v29 = vunpack.c.l.b16 %v752_v33  ;;  %v1009_v17 = vpack.c.b16 %v977_v22, %v977_v22 }
 0x207   : > { %v978_v35 = vunpack.c.l.b16 %v754_v53  ;;  %v851_v34 = vpack.c.b16 %v819_v51, %v819_v51  ;;  %v3122_v53 = vld [vmem:[%s4484_s3 + $0x78] sm:$0xff] }
 0x208   : > { %2854 = vmatmul.msk.bf16.gmra.mxu2 %vm1545_vm5, %v3152_v40  ;;  %v1008_v10 = vpack.c.b16 %v976_v29, %v976_v29  ;;  %v3124_v40 = vld [vmem:[%s4484_s3 + $0x88] sm:$0xff] }
 0x209   : > { %888 = vrot.lane.b32.xlu2 %v846_v36, %s3351_s19  ;;  %v625_v36 = vrot.slane %v3989_v2, 1  ;;  %v1010_v8 = vpack.c.b16 %v978_v35, %v978_v35  ;;  %2135 = vmatpush.bf16.msrb.mxu3 %v3124_v40  ;;  %v604_v40 = vsel %vm542_vm1, 0.0, %v570_v7  ;;  %v543_v7 = vrot.slane %v3745_v5, 7 }
 0x20a   : > { %v703_v22 = vpack.c.bf16 %v604_v40, %v604_v40 }
 0x20b   : > { %v919_v23 = vpop.permute.xlu1 %918 }
 0x20c   : > { %892 = vrot.lane.b32.xlu0 %v848_v14, %s3351_s19  ;;  %1048 = vrot.lane.b32.xlu1 %v1006_v19, %s3352_s15  ;;  %v1170_v55 = vsel %vm1092_vm3, %v701_v25, %v919_v23  ;;  %v626_v14 = vrot.slane %v3995_v62, 1  ;;  %v627_v19 = vrot.slane %v3997_v63, 1  ;;  %v659_v23 = vsel %vm609_vm0, 0.0, %v625_v36 }
 0x20d   : > { %v820_v25 = vunpack.c.l.b16 %v724_v39  ;;  %2136 = vmatpush.bf16.msrb.mxu3 %v3123_v27  ;;  %v606_v36 = vsel %vm542_vm1, 0.0, %v572_v60  ;;  %v821_v39 = vunpack.c.l.b16 %v725_v0 }
 0x20e   : > { %v1079_v1 = vpop.permute.xlu0 %1078  ;;  %v660_v47 = vsel %vm609_vm0, 0.0, %v626_v14  ;;  %v705_v13 = vpack.c.bf16 %v606_v36, %v606_v36  ;;  %v3107_v14 = vld [vmem:[%s4484_s3] sm:$0xff]  ;;  %v577_v36 = vsel %vm542_vm1, 0.0, %v543_v7 }
 0x20f   : > { %v1266_v26 = vsel %vm1189_vm2, %v1170_v55, %v1079_v1  ;;  %v755_v55 = vpack.c.bf16 %v659_v23, %v659_v23  ;;  %v661_v1 = vsel %vm609_vm0, 0.0, %v627_v19  ;;  %v852_v33 = vpack.c.b16 %v820_v25, %v820_v25 }
 0x210   : > { %1322 = vst.msk [vmem:[#allocation2 + $0x80] sm:$0xf] %vm1286_vm4, %v1266_v26  ;;  %v605_v26 = vsel %vm542_vm1, 0.0, %v571_v24  ;;  %v757_v38 = vpack.c.bf16 %v661_v1, %v661_v1  ;;  %v756_v59 = vpack.c.bf16 %v660_v47, %v660_v47  ;;  %v569_v19 = vrot.slane %v3695_v43, 7 }
 0x211   : > { %890 = vrot.lane.b32.xlu2 %v847_v32, %s3351_s19  ;;  %v3108_v32 = vld [vmem:[%s4484_s3 + $0x8] sm:$0xff]  ;;  %v979_v48 = vunpack.c.l.b16 %v755_v55  ;;  %2137 = vmatpush.bf16.msrb.mxu3 %v3122_v53  ;;  %v573_v23 = vrot.slane %v3716_v21, 7  ;;  %v853_v1 = vpack.c.b16 %v821_v39, %v821_v39 }
 0x212   : > { %1853 = vmatpush.bf16.msrb.mxu2 %v3108_v32  ;;  %v981_v35 = vunpack.c.l.b16 %v757_v38  ;;  %v980_v6 = vunpack.c.l.b16 %v756_v59  ;;  %v603_v43 = vsel %vm542_vm1, 0.0, %v569_v19  ;;  %v3120_v21 = vld [vmem:[%s4484_s3 + $0x68] sm:$0xff]  ;;  %v3119_v32 = vld [vmem:[%s4484_s3 + $0x60] sm:$0xff] }
 0x213   : > { %v3987_v58 = vpop.permute.xlu2 %926  ;;  %v702_v27 = vpack.c.bf16 %v603_v43, %v603_v43 }
 0x214   : > { %894 = vrot.lane.b32.xlu0 %v849_v49, %s3351_s19  ;;  %1050 = vrot.lane.b32.xlu1 %v1007_v42, %s3352_s15  ;;  %v704_v49 = vpack.c.bf16 %v605_v26, %v605_v26  ;;  %v1013_v37 = vpack.c.b16 %v981_v35, %v981_v35  ;;  %v1012_v52 = vpack.c.b16 %v980_v6, %v980_v6 }
 0x215   : > { %v1182_v24 = vsel %vm1092_vm3, %v705_v13, %v3987_v58  ;;  %v607_v58 = vsel %vm542_vm1, 0.0, %v573_v23 }
 0x216   : > { %1854 = vmatpush.bf16.msrb.mxu2 %v3107_v14 }
 0x217   : > { %v3153_v12 = vld [vmem:[#allocation2 + $0x7c] sm:$0xff] }
 0x218   : > { %2855 = vmatmul.msk.bf16.gmra.mxu2 %vm1545_vm5, %v3153_v12  ;;  %v1011_v12 = vpack.c.b16 %v979_v48, %v979_v48 }
 0x219   : > { %1052 = vrot.lane.b32.xlu2 %v1008_v10, %s3352_s15 }
 0x21b   : > { %v4011_v45 = vpop.permute.xlu2 %920 }
 0x21c   : > { %1056 = vrot.lane.b32.xlu0 %v1010_v8, %s3352_s15  ;;  %896 = vrot.lane.b32.xlu1 %v850_v3, %s3351_s19  ;;  %v3121_v8 = vld [vmem:[%s4484_s3 + $0x70] sm:$0xff]  ;;  %v1173_v38 = vsel %vm1092_vm3, %v702_v27, %v4011_v45 }
 0x21d   : > { %2138 = vmatpush.bf16.msrb.mxu3 %v3121_v8 }
 0x221   : > { %1054 = vrot.lane.b32.xlu2 %v1009_v17, %s3352_s15  ;;  %2139 = vmatpush.bf16.msrb.mxu3 %v3120_v21  ;;  %v547_v21 = vrot.slane %v3793_v20, 7 }
 0x223   : > { %v1083_v42 = vpop.permute.xlu2 %1082  ;;  %v925_v41 = vpop.permute.xlu1 %924 }
 0x224   : > { %900 = vrot.lane.b32.xlu0 %v852_v33, %s3351_s19  ;;  %898 = vrot.lane.b32.xlu1 %v851_v34, %s3351_s19  ;;  %v1179_v29 = vsel %vm1092_vm3, %v704_v49, %v925_v41  ;;  %v706_v33 = vpack.c.bf16 %v607_v58, %v607_v58  ;;  %v574_v34 = vrot.slane %v3735_v54, 7 }
 0x225   : > { %2140 = vmatpush.bf16.msrb.mxu3 %v3119_v32 }
 0x226   : > { %v1085_v9 = vpop.permute.xlu0 %1084  ;;  %v608_v54 = vsel %vm542_vm1, 0.0, %v574_v34 }
 0x227   : > { %v1275_v10 = vsel %vm1189_vm2, %v1179_v29, %v1085_v9  ;;  %v707_v60 = vpack.c.bf16 %v608_v54, %v608_v54  ;;  %v544_v29 = vrot.slane %v3756_v11, 7  ;;  %v676_v11 = vpack.c.bf16 %v577_v36, %v577_v36 }
 0x228   : > { %1325 = vst.msk [vmem:[#allocation2 + $0x8c] sm:$0xf] %vm1286_vm4, %v1275_v10 }
 0x229   : > { %1058 = vrot.lane.b32.xlu2 %v1011_v12, %s3352_s15  ;;  %v578_v0 = vsel %vm542_vm1, 0.0, %v544_v29 }
 0x22b   : > { %v1089_v3 = vpop.permute.xlu2 %1088 }
 0x22c   : > { %1062 = vrot.lane.b32.xlu0 %v1013_v37, %s3352_s15  ;;  %1060 = vrot.lane.b32.xlu1 %v1012_v52, %s3352_s15  ;;  %v677_v37 = vpack.c.bf16 %v578_v0, %v578_v0  ;;  %v545_v52 = vrot.slane %v3758_v18, 7  ;;  %s4317_s15 = scalar_lea.vmem [#allocation6], %s2721_s10  ;;  %s3176_s10 = sshll.u32 %s3417_s28, 8 }
 0x22d   : > { %s2636_s21 = scalar_lea.hbm %s4488_s7, %s3176_s10 }
 0x22e   : > { %v923_v25 = vpop.permute.xlu0 %922  ;;  %v1087_v51 = vpop.permute.xlu1 %1086  ;;  %v579_v18 = vsel %vm542_vm1, 0.0, %v545_v52  ;;  %s2639_s23 = sshll.u32 %s2636_s21, 4  ;;  %s2640_s23 = int_to_ptr.hbm [resolvable:$true] %s2639_s23 }
 0x22f   : > { %v1176_v17 = vsel %vm1092_vm3, %v703_v22, %v923_v25  ;;  %v1278_v55 = vsel %vm1189_vm2, %v1182_v24, %v1087_v51  ;;  %v678_v23 = vpack.c.bf16 %v579_v18, %v579_v18  ;;  %v546_v24 = vrot.slane %v3774_v44, 7  ;;  %s3295_s28 = sshra.s32 %s2640_s23, 4  ;;  %s3296_s28 = int_to_ptr.hbm [resolvable:$true] %s3295_s28 }
 0x230   : > { %v1272_v47 = vsel %vm1189_vm2, %v1176_v17, %v1083_v42  ;;  %1326 = vst.msk [vmem:[#allocation2 + $0x90] sm:$0xf] %vm1286_vm4, %v1278_v55  ;;  %s3297_s8 = scalar_lea.hbm %s3296_s28, 256  ;;  %p3302_p0 = scmp.lt.s32.totalorder %s3296_s28, %s4488_s7 }
 0x231   : > { %1324 = vst.msk [vmem:[#allocation2 + $0x88] sm:$0xf] %vm1286_vm4, %v1272_v47  ;;  %902 = vrot.lane.b32.xlu2 %v853_v1, %s3351_s19  ;;  %v580_v43 = vsel %vm542_vm1, 0.0, %v546_v24  ;;  %s2637_s19 = sshll.u32 %s4317_s15, 4  ;;  %p3298_p6 = scmp.ne.s32.totalorder %s3296_s28, %s3297_s8  ;;  %s2638_s19 = int_to_ptr.vmem [resolvable:$true] %s2637_s19 }
 0x232   : > { %v679_v58 = vpack.c.bf16 %v580_v43, %v580_v43 }
 0x233   : > { %v1029_v26 = vpop.permute.xlu2 %1028  ;;  %p3299_p9 = pnand %p3298_p6, %p3446_p11 }
 0x235   : > { %p3300_p13 = pneg %p3299_p9 }
 0x236   : > { %v929_v59 = vpop.permute.xlu0 %928  ;;  %v1081_v42 = vpop.permute.xlu1 %1080 }
 0x237   : > { %v1185_v41 = vsel %vm1092_vm3, %v706_v33, %v929_v59  ;;  %v1269_v48 = vsel %vm1189_vm2, %v1173_v38, %v1081_v42  ;;  %v3155_v49 = vld [vmem:[#allocation2 + $0x8c] sm:$0xff]  ;;  %v581_v59 = vsel %vm542_vm1, 0.0, %v547_v21 }
 0x238   : > { %v1281_v53 = vsel %vm1189_vm2, %v1185_v41, %v1089_v3  ;;  %1323 = vst.msk [vmem:[#allocation2 + $0x84] sm:$0xf] %vm1286_vm4, %v1269_v48  ;;  %2857 = vmatmul.msk.bf16.vlgmr.msra.gmra.mxu3 %vm1545_vm5, %v3155_v49  ;;  %v680_v42 = vpack.c.bf16 %v581_v59, %v581_v59 }
 0x239   : > { %1327 = vst.msk [vmem:[#allocation2 + $0x94] sm:$0xf] %vm1286_vm4, %v1281_v53 }
 0x23b   : > { %v1031_v45 = vpop.permute.xlu2 %1030 }
 0x23e   : > { %v1091_v9 = vpop.permute.xlu0 %1090  ;;  %v931_v35 = vpop.permute.xlu1 %930 }
 0x23f   : > { %v1188_v6 = vsel %vm1092_vm3, %v707_v60, %v931_v35  ;;  %v3154_v10 = vld [vmem:[#allocation2 + $0x84] sm:$0xff] }
 0x240   : > { %v1284_v12 = vsel %vm1189_vm2, %v1188_v6, %v1091_v9  ;;  %2856 = vmatmul.msk.bf16.gmra.mxu2 %vm1545_vm5, %v3154_v10  ;;  %v550_v6 = vrot.slane %v3841_v28, 7  ;;  %v551_v10 = vrot.slane %v3847_v31, 7 }
 0x241   : > { %1328 = vst.msk [vmem:[#allocation2 + $0x98] sm:$0xf] %vm1286_vm4, %v1284_v12 }
 0x243   : > { %v877_v5 = vpop.permute.xlu2 %876 }
 0x244   : > { %v1107_v48 = vsel %vm1092_vm3, %v680_v42, %v877_v5 }
 0x246   : > { %v871_v40 = vpop.permute.xlu0 %870  ;;  %v869_v8 = vpop.permute.xlu1 %868 }
 0x247   : > { %v1098_v3 = vsel %vm1092_vm3, %v677_v37, %v871_v40  ;;  %v1095_v39 = vsel %vm1092_vm3, %v676_v11, %v869_v8  ;;  %v585_v11 = vsel %vm542_vm1, 0.0, %v551_v10  ;;  %v584_v40 = vsel %vm542_vm1, 0.0, %v550_v6 }
 0x248   : > { %v1194_v13 = vsel %vm1189_vm2, %v1098_v3, %v1031_v45  ;;  %v1191_v14 = vsel %vm1189_vm2, %v1095_v39, %v1029_v26  ;;  %v3156_v19 = vld [vmem:[#allocation2 + $0x94] sm:$0xff]  ;;  %v549_v26 = vrot.slane %v3815_v16, 7  ;;  %v548_v16 = vrot.slane %v3812_v46, 7 }
 0x249   : > { %1298 = vst.msk [vmem:[#allocation2 + $0x8] sm:$0xf] %vm1286_vm4, %v1194_v13  ;;  %2858 = vmatmul.msk.bf16.gmra.mxu3 %vm1545_vm5, %v3156_v19  ;;  %v684_v28 = vpack.c.bf16 %v585_v11, %v585_v11  ;;  %v683_v31 = vpack.c.bf16 %v584_v40, %v584_v40  ;;  %v552_v8 = vrot.slane %v3877_v56, 7 }
 0x24a   : > { %1297 = vst.msk [vmem:[#allocation2 + $0x4] sm:$0xf] %vm1286_vm4, %v1191_v14  ;;  %v583_v20 = vsel %vm542_vm1, 0.0, %v549_v26  ;;  %v582_v9 = vsel %vm542_vm1, 0.0, %v548_v16 }
 0x24b   : > { %v879_v22 = vpop.permute.xlu2 %878  ;;  %v682_v41 = vpack.c.bf16 %v583_v20, %v583_v20  ;;  %v681_v35 = vpack.c.bf16 %v582_v9, %v582_v9  ;;  %v586_v24 = vsel %vm542_vm1, 0.0, %v552_v8 }
 0x24d   : > { %v1110_v12 = vsel %vm1092_vm3, %v681_v35, %v879_v22 }
 0x24e   : > { %v1033_v25 = vpop.permute.xlu0 %1032  ;;  %v873_v51 = vpop.permute.xlu1 %872 }
 0x24f   : > { %v1101_v17 = vsel %vm1092_vm3, %v678_v23, %v873_v51 }
 0x250   : > { %v1197_v55 = vsel %vm1189_vm2, %v1101_v17, %v1033_v25  ;;  %v553_v25 = vrot.slane %v3896_v57, 7  ;;  %v685_v17 = vpack.c.bf16 %v586_v24, %v586_v24 }
 0x251   : > { %1299 = vst.msk [vmem:[#allocation2 + $0xc] sm:$0xf] %vm1286_vm4, %v1197_v55  ;;  %v3141_v1 = vld [vmem:[#allocation2 + $0x4] sm:$0xff]  ;;  %v555_v55 = vrot.slane %v3923_v30, 7  ;;  %v554_v30 = vrot.slane %v3921_v61, 7 }
 0x252   : > { %v3125_v47 = vld [vmem:[#allocation2] sm:$0xff]  ;;  %2843 = vmatmul.msk.bf16.vlgmr.msrb.gmra.mxu0 %vm1545_vm5, %v3141_v1 }
 0x253   : > { %2947 = vmatmul.msk.bf16.vlgmr.msrb.gmra.mxu2 %vm1545_vm5, %v3125_v47  ;;  %v1041_v44 = vpop.permute.xlu2 %1040  ;;  %v589_v57 = vsel %vm542_vm1, 0.0, %v555_v55  ;;  %v588_v61 = vsel %vm542_vm1, 0.0, %v554_v30  ;;  %v3173_v30 = vld [vmem:[%s4486_s5] sm:$0xff] }
 0x256   : > { %v1035_v32 = vpop.permute.xlu0 %1034  ;;  %v875_v27 = vpop.permute.xlu1 %874 }
 0x257   : > { %v1104_v33 = vsel %vm1092_vm3, %v679_v58, %v875_v27  ;;  %v587_v58 = vsel %vm542_vm1, 0.0, %v553_v25  ;;  %v688_v27 = vpack.c.bf16 %v589_v57, %v589_v57 }
 0x258   : > { %v1200_v34 = vsel %vm1189_vm2, %v1104_v33, %v1035_v32  ;;  %v3157_v38 = vld [vmem:[#allocation2 + $0x8] sm:$0xff]  ;;  %v686_v26 = vpack.c.bf16 %v587_v58, %v587_v58  ;;  %v556_v33 = vrot.slane %v3948_v50, 7 }
 0x259   : > { %1300 = vst.msk [vmem:[#allocation2 + $0x10] sm:$0xf] %vm1286_vm4, %v1200_v34  ;;  %3051 = vmatmul.msk.bf16.vlgmr.msrb.gmra.mxu3 %vm1545_vm5, %v3157_v38  ;;  %v3126_v46 = vld [vmem:[#allocation2 + $0x8] sm:$0xff] }
 0x25b   : > { %v885_v54 = vpop.permute.xlu2 %884 }
 0x25c   : > { %v1119_v3 = vsel %vm1092_vm3, %v684_v28, %v885_v54  ;;  %v590_v54 = vsel %vm542_vm1, 0.0, %v556_v33 }
 0x25e   : > { %v881_v49 = vpop.permute.xlu0 %880  ;;  %v1037_v53 = vpop.permute.xlu1 %1036 }
 0x25f   : > { %v1113_v45 = vsel %vm1092_vm3, %v682_v41, %v881_v49  ;;  %v1203_v60 = vsel %vm1189_vm2, %v1107_v48, %v1037_v53  ;;  %v3174_v53 = vld [vmem:[%s4486_s5 + $0x8] sm:$0xff] }
 0x260   : > { %v1209_v7 = vsel %vm1189_vm2, %v1113_v45, %v1041_v44  ;;  %1301 = vst.msk [vmem:[#allocation2 + $0x14] sm:$0xf] %vm1286_vm4, %v1203_v60  ;;  %v3142_v29 = vld [vmem:[#allocation2 + $0xc] sm:$0xff]  ;;  %v687_v45 = vpack.c.bf16 %v588_v61, %v588_v61  ;;  %2412 = vmatpush.bf16.msrb.mxu1 %v3174_v53  ;;  %v689_v60 = vpack.c.bf16 %v590_v54, %v590_v54 }
 0x261   : > { %1303 = vst.msk [vmem:[#allocation2 + $0x1c] sm:$0xf] %vm1286_vm4, %v1209_v7  ;;  %v557_v7 = vrot.slane %v3953_v4, 7 }
 0x262   : > { %2844 = vmatmul.msk.bf16.gmra.mxu0 %vm1545_vm5, %v3142_v29 }
 0x263   : > { %2948 = vmatmul.msk.bf16.gmra.mxu2 %vm1545_vm5, %v3126_v46  ;;  %v889_v52 = vpop.permute.xlu2 %888  ;;  %v591_v4 = vsel %vm542_vm1, 0.0, %v557_v7 }
 0x264   : > { %v1125_v34 = vsel %vm1092_vm3, %v686_v26, %v889_v52  ;;  %2413 = vmatpush.bf16.msrb.mxu1 %v3173_v30 }
 0x266   : > { %v883_v0 = vpop.permute.xlu0 %882  ;;  %v1039_v36 = vpop.permute.xlu1 %1038 }
 0x267   : > { %v1206_v5 = vsel %vm1189_vm2, %v1110_v12, %v1039_v36  ;;  %v3158_v37 = vld [vmem:[#allocation2 + $0x10] sm:$0xff]  ;;  %v1116_v39 = vsel %vm1092_vm3, %v683_v31, %v883_v0 }
 0x268   : > { %1302 = vst.msk [vmem:[#allocation2 + $0x18] sm:$0xf] %vm1286_vm4, %v1206_v5  ;;  %v3127_v23 = vld [vmem:[#allocation2 + $0x10] sm:$0xff]  ;;  %v690_v5 = vpack.c.bf16 %v591_v4, %v591_v4 }
 0x269   : > { %3052 = vmatmul.msk.bf16.gmra.mxu3 %vm1545_vm5, %v3158_v37  ;;  %v558_v37 = vrot.slane %v3989_v2, 7  ;;  %v559_v2 = vrot.slane %v3995_v62, 7 }
 0x26b   : > { %v891_v56 = vpop.permute.xlu2 %890  ;;  %v4158_v51 = vpop.f32.mrf.mxu2 }
 0x26c   : > { %v1128_v29 = vsel %vm1092_vm3, %v687_v45, %v891_v56 }
 0x26e   : > { %v1045_v13 = vpop.permute.xlu0 %1044  ;;  %v1043_v14 = vpop.permute.xlu1 %1042 }
 0x26f   : > { %v1215_v19 = vsel %vm1189_vm2, %v1119_v3, %v1045_v13  ;;  %v1212_v18 = vsel %vm1189_vm2, %v1116_v39, %v1043_v14  ;;  %v3143_v22 = vld [vmem:[#allocation2 + $0x14] sm:$0xff]  ;;  %v592_v39 = vsel %vm542_vm1, 0.0, %v558_v37  ;;  %v560_v14 = vrot.slane %v3997_v63, 7 }
 0x270   : > { %1305 = vst.msk [vmem:[#allocation2 + $0x2c] sm:$0xf] %vm1286_vm4, %v1215_v19  ;;  %v3159_v44 = vld [vmem:[#allocation2 + $0x18] sm:$0xff]  ;;  %v691_v19 = vpack.c.bf16 %v592_v39, %v592_v39 }
 0x271   : > { %1304 = vst.msk [vmem:[#allocation2 + $0x20] sm:$0xf] %vm1286_vm4, %v1212_v18  ;;  %v3128_v49 = vld [vmem:[#allocation2 + $0x18] sm:$0xff]  ;;  %v594_v25 = vsel %vm542_vm1, 0.0, %v560_v14 }
 0x272   : > { %2845 = vmatmul.msk.bf16.gmra.mxu0 %vm1545_vm5, %v3143_v22  ;;  %v693_v63 = vpack.c.bf16 %v594_v25, %v594_v25 }
 0x273   : > { %2949 = vmatmul.msk.bf16.gmra.mxu2 %vm1545_vm5, %v3127_v23  ;;  %v1053_v32 = vpop.permute.xlu2 %1052  ;;  %v4172_v20 = vpop.f32.mrf.mxu2 }
 0x276   : > { %v1047_v1 = vpop.permute.xlu0 %1046  ;;  %v887_v47 = vpop.permute.xlu1 %886 }
 0x277   : > { %v1122_v43 = vsel %vm1092_vm3, %v685_v17, %v887_v47  ;;  %v3129_v3 = vld [vmem:[#allocation2 + $0x28] sm:$0xff]  ;;  %v593_v17 = vsel %vm542_vm1, 0.0, %v559_v2 }
 0x278   : > { %v1218_v21 = vsel %vm1189_vm2, %v1122_v43, %v1047_v1  ;;  %v3144_v50 = vld [vmem:[#allocation2 + $0x1c] sm:$0xff]  ;;  %v692_v55 = vpack.c.bf16 %v593_v17, %v593_v17 }
 0x279   : > { %1306 = vst.msk [vmem:[#allocation2 + $0x30] sm:$0xf] %vm1286_vm4, %v1218_v21  ;;  %3053 = vmatmul.msk.bf16.gmra.mxu3 %vm1545_vm5, %v3159_v44  ;;  %v3160_v0 = vld [vmem:[#allocation2 + $0x20] sm:$0xff] }
 0x27b   : > { %v1055_v35 = vpop.permute.xlu2 %1054  ;;  %v4195_v36 = vpop.f32.mrf.mxu2 }
 0x27e   : > { %v893_v38 = vpop.permute.xlu0 %892  ;;  %v1049_v59 = vpop.permute.xlu1 %1048 }
 0x27f   : > { %v1131_v42 = vsel %vm1092_vm3, %v688_v27, %v893_v38  ;;  %v1221_v16 = vsel %vm1189_vm2, %v1125_v34, %v1049_v59 }
 0x280   : > { %v1227_v41 = vsel %vm1189_vm2, %v1131_v42, %v1053_v32  ;;  %1307 = vst.msk [vmem:[#allocation2 + $0x34] sm:$0xf] %vm1286_vm4, %v1221_v16  ;;  %v3145_v48 = vld [vmem:[#allocation2 + $0x2c] sm:$0xff] }
 0x281   : > { %1309 = vst.msk [vmem:[#allocation2 + $0x3c] sm:$0xf] %vm1286_vm4, %v1227_v41  ;;  %2847 = vmatmul.msk.bf16.vlgmr.msra.gmra.mxu1 %vm1545_vm5, %v3145_v48 }
 0x282   : > { %2846 = vmatmul.msk.bf16.gmra.mxu0 %vm1545_vm5, %v3144_v50 }
 0x283   : > { %2950 = vmatmul.msk.bf16.gmra.mxu2 %vm1545_vm5, %v3128_v49  ;;  %v1059_v8 = vpop.permute.xlu2 %1058  ;;  %v4208_v13 = vpop.f32.mrf.mxu2 }
 0x286   : > { %v895_v9 = vpop.permute.xlu0 %894  ;;  %v1051_v46 = vpop.permute.xlu1 %1050 }
 0x287   : > { %v1134_v6 = vsel %vm1092_vm3, %v689_v60, %v895_v9  ;;  %v1224_v10 = vsel %vm1189_vm2, %v1128_v29, %v1051_v46  ;;  %v3161_v56 = vld [vmem:[#allocation2 + $0x30] sm:$0xff] }
 0x288   : > { %v1230_v12 = vsel %vm1189_vm2, %v1134_v6, %v1055_v35  ;;  %1308 = vst.msk [vmem:[#allocation2 + $0x38] sm:$0xf] %vm1286_vm4, %v1224_v10  ;;  %v3130_v26 = vld [vmem:[#allocation2 + $0x30] sm:$0xff] }
 0x289   : > { %1310 = vst.msk [vmem:[#allocation2 + $0x40] sm:$0xf] %vm1286_vm4, %v1230_v12  ;;  %3054 = vmatmul.msk.bf16.gmra.mxu3 %vm1545_vm5, %v3160_v0 }
 0x28b   : > { %v903_v62 = vpop.permute.xlu2 %902  ;;  %v4221_v1 = vpop.f32.mrf.mxu2 }
 0x28c   : > { %v1146_v47 = vsel %vm1092_vm3, %v693_v63, %v903_v62 }
 0x28e   : > { %v1057_v11 = vpop.permute.xlu0 %1056  ;;  %v897_v52 = vpop.permute.xlu1 %896 }
 0x28f   : > { %v1137_v40 = vsel %vm1092_vm3, %v690_v5, %v897_v52  ;;  %v3146_v28 = vld [vmem:[#allocation2 + $0x34] sm:$0xff]  ;;  %v4264_v5 = vld [vmem:[%s4485_s4] ss:$0 sm:$0xff] }
 0x290   : > { %v1233_v31 = vsel %vm1189_vm2, %v1137_v40, %v1057_v11  ;;  %v3147_v57 = vld [vmem:[#allocation2 + $0x3c] sm:$0xff] }
 0x291   : > { %1311 = vst.msk [vmem:[#allocation2 + $0x44] sm:$0xf] %vm1286_vm4, %v1233_v31  ;;  %2848 = vmatmul.msk.bf16.gmra.mxu1 %vm1545_vm5, %v3146_v28  ;;  %v3162_v27 = vld [vmem:[#allocation2 + $0x38] sm:$0xff] }
 0x292   : > { %v3131_v34 = vld [vmem:[#allocation2 + $0x38] sm:$0xff] }
 0x293   : > { %2951 = vmatmul.msk.bf16.gmra.mxu2 %vm1545_vm5, %v3129_v3  ;;  %v4234_v32 = vpop.f32.mrf.mxu2 }
 0x296   : > { %v901_v18 = vpop.permute.xlu0 %900  ;;  %v899_v22 = vpop.permute.xlu1 %898 }
 0x297   : > { %v1140_v23 = vsel %vm1092_vm3, %v691_v19, %v899_v22  ;;  %v1143_v43 = vsel %vm1092_vm3, %v692_v55, %v901_v18 }
 0x298   : > { %v1236_v24 = vsel %vm1189_vm2, %v1140_v23, %v1059_v8  ;;  %v3163_v59 = vld [vmem:[#allocation2 + $0x40] sm:$0xff] }
 0x299   : > { %1312 = vst.msk [vmem:[#allocation2 + $0x48] sm:$0xf] %vm1286_vm4, %v1236_v24  ;;  %3055 = vmatmul.msk.bf16.gmra.mxu3 %vm1545_vm5, %v3161_v56  ;;  %v3132_v48 = vld [vmem:[#allocation2 + $0x40] sm:$0xff] }
 0x29a   : > { %v3166_v8 = vld [vmem:[#allocation2 + $0x60] sm:$0xff] }
 0x29b   : > { %v4237_v38 = vpop.f32.mrf.mxu2  ;;  %v3135_v23 = vld [vmem:[#allocation2 + $0x60] sm:$0xff] }
 0x29e   : > { %v1063_v21 = vpop.permute.xlu0 %1062  ;;  %v1061_v44 = vpop.permute.xlu1 %1060 }
 0x29f   : > { %v1242_v58 = vsel %vm1189_vm2, %v1146_v47, %v1063_v21  ;;  %v1239_v15 = vsel %vm1189_vm2, %v1143_v43, %v1061_v44  ;;  %v3167_v43 = vld [vmem:[#allocation2 + $0x68] sm:$0xff] }
 0x2a0   : > { %1314 = vst.msk [vmem:[#allocation2 + $0x58] sm:$0xf] %vm1286_vm4, %v1242_v58  ;;  %v3148_v33 = vld [vmem:[#allocation2 + $0x44] sm:$0xff] }
 0x2a1   : > { %1313 = vst.msk [vmem:[#allocation2 + $0x54] sm:$0xf] %vm1286_vm4, %v1239_v15  ;;  %2849 = vmatmul.msk.bf16.gmra.mxu1 %vm1545_vm5, %v3147_v57  ;;  %v3164_v49 = vld [vmem:[#allocation2 + $0x48] sm:$0xff] }
 0x2a3   : > { %2952 = vmatmul.msk.bf16.gmra.mxu2 %vm1545_vm5, %v3130_v26  ;;  %v4242_v42 = vpop.f32.mrf.mxu2 }
 0x2a7   : > { %v3165_v46 = vld [vmem:[#allocation2 + $0x58] sm:$0xff] }
 0x2a8   : > { %v3149_v41 = vld [vmem:[#allocation2 + $0x54] sm:$0xff] }
 0x2a9   : > { %3056 = vmatmul.msk.bf16.gmra.mxu3 %vm1545_vm5, %v3162_v27  ;;  %v3133_v60 = vld [vmem:[#allocation2 + $0x50] sm:$0xff]  ;;  %v3134_v0 = vld [vmem:[#allocation2 + $0x58] sm:$0xff]  ;;  %v3136_v27 = vld [vmem:[#allocation2 + $0x68] sm:$0xff] }
 0x2b1   : > { %2850 = vmatmul.msk.bf16.gmra.mxu1 %vm1545_vm5, %v3148_v33 }
 0x2b3   : > { %2953 = vmatmul.msk.bf16.gmra.mxu2 %vm1545_vm5, %v3131_v34 }
 0x2b9   : > { %3057 = vmatmul.msk.bf16.gmra.mxu3 %vm1545_vm5, %v3163_v59 }
 0x2bb   : > { %v4244_v16 = vpop.f32.mrf.mxu3 }
 0x2c1   : > { %2851 = vmatmul.msk.bf16.gmra.mxu1 %vm1545_vm5, %v3149_v41 }
 0x2c3   : > { %2954 = vmatmul.msk.bf16.gmra.mxu2 %vm1545_vm5, %v3132_v48  ;;  %v4248_v61 = vpop.f32.mrf.mxu2  ;;  %v4250_v50 = vpop.f32.mrf.mxu3 }
 0x2c9   : > { %3058 = vmatmul.msk.bf16.gmra.mxu3 %vm1545_vm5, %v3164_v49 }
 0x2cb   : > { %v4253_v53 = vpop.f32.mrf.mxu2 }
 0x2cc   : > { %v4255_v54 = vpop.f32.mrf.mxu3 }
 0x2cf   : > { %v1603_v45 = vpop.f32.mrf.mxu0 }
 0x2d3   : > { %2955 = vmatmul.msk.bf16.gmra.mxu2 %vm1545_vm5, %v3133_v60  ;;  %v3168_v60 = vld [vmem:[#allocation2 + $0x70] sm:$0xff] }
 0x2d4   : > { %v4258_v7 = vpop.f32.mrf.mxu3 }
 0x2d6   : > { %v1856_v29 = vpop.f32.mrf.mxu2 }
 0x2d7   : > { %v1605_v9 = vpop.f32.mrf.mxu0  ;;  %v1857_v10 = vadd.f32 %v1856_v29, %v1603_v45 }
 0x2d9   : > { %3059 = vmatmul.msk.bf16.gmra.mxu3 %vm1545_vm5, %v3165_v46 }
 0x2dc   : > { %v2142_v35 = vpop.f32.mrf.mxu3 }
 0x2dd   : > { %v2222_v4 = vadd.f32 %v2142_v35, %v1857_v10 }
 0x2de   : > { %v1858_v6 = vpop.f32.mrf.mxu2 }
 0x2df   : > { %v1608_v12 = vpop.f32.mrf.mxu0  ;;  %v1859_v37 = vadd.f32 %v1858_v6, %v1605_v9  ;;  %v2258_v52 = vadd.f32 %v4264_v5, %v2222_v4  ;;  %v3137_v4 = vld [vmem:[#allocation2 + $0x78] sm:$0xff] }
 0x2e1   : > { %v2290_v3 = vmax.f32 %v2258_v52, 0.0 }
 0x2e3   : > { %2956 = vmatmul.msk.bf16.gmra.mxu2 %vm1545_vm5, %v3134_v0 }
 0x2e4   : > { %v2144_v11 = vpop.f32.mrf.mxu3 }
 0x2e5   : > { %v2223_v28 = vadd.f32 %v2144_v11, %v1859_v37 }
 0x2e6   : > { %v1861_v40 = vpop.f32.mrf.mxu2 }
 0x2e7   : > { %v2259_v31 = vadd.f32 %v4264_v5, %v2223_v28  ;;  %v1610_v2 = vpop.f32.mrf.mxu0  ;;  %v1862_v22 = vadd.f32 %v1861_v40, %v1608_v12 }
 0x2e9   : > { %v2291_v39 = vmax.f32 %v2259_v31, 0.0  ;;  %3060 = vmatmul.msk.bf16.gmra.mxu3 %vm1545_vm5, %v3166_v8 }
 0x2eb   : > { %v2322_v14 = vpack.c.bf16 %v2291_v39, %v2290_v3 }
 0x2ec   : > { %v2147_v19 = vpop.f32.mrf.mxu3 }
 0x2ed   : > { %3075 = vmatmul.msk.bf16.vlgmr.msrb.gmra.mxu1 %vm1092_vm3, %v2322_v14  ;;  %v2224_v24 = vadd.f32 %v2147_v19, %v1862_v22 }
 0x2ee   : > { %v1863_v18 = vpop.f32.mrf.mxu2 }
 0x2ef   : > { %v1864_v56 = vadd.f32 %v1863_v18, %v1610_v2  ;;  %v1613_v25 = vpop.f32.mrf.mxu0  ;;  %v2260_v62 = vadd.f32 %v4264_v5, %v2224_v24  ;;  %v3169_v2 = vld [vmem:[#allocation2 + $0x80] sm:$0xff] }
 0x2f1   : > { %v2292_v21 = vmax.f32 %v2260_v62, 0.0 }
 0x2f3   : > { %2957 = vmatmul.msk.bf16.gmra.mxu2 %vm1545_vm5, %v3135_v23 }
 0x2f4   : > { %v2149_v17 = vpop.f32.mrf.mxu3 }
 0x2f5   : > { %v2225_v55 = vadd.f32 %v2149_v17, %v1864_v56 }
 0x2f6   : > { %v1866_v63 = vpop.f32.mrf.mxu2 }
 0x2f7   : > { %v2261_v47 = vadd.f32 %v4264_v5, %v2225_v55  ;;  %v1615_v26 = vpop.f32.mrf.mxu0  ;;  %v1867_v30 = vadd.f32 %v1866_v63, %v1613_v25  ;;  %v3138_v25 = vld [vmem:[#allocation2 + $0x80] sm:$0xff] }
 0x2f9   : > { %v2293_v44 = vmax.f32 %v2261_v47, 0.0  ;;  %3061 = vmatmul.msk.bf16.gmra.mxu3 %vm1545_vm5, %v3167_v43 }
 0x2fb   : > { %v2323_v58 = vpack.c.bf16 %v2293_v44, %v2292_v21 }
 0x2fc   : > { %v2152_v15 = vpop.f32.mrf.mxu3 }
 0x2fd   : > { %3076 = vmatmul.msk.bf16.gmra.mxu1 %vm1092_vm3, %v2323_v58  ;;  %v2226_v33 = vadd.f32 %v2152_v15, %v1867_v30  ;;  %v3170_v58 = vld [vmem:[#allocation2 + $0x88] sm:$0xff] }
 0x2fe   : > { %v1868_v57 = vpop.f32.mrf.mxu2  ;;  %v1623_v9 = vpop.f32.mrf.mxu1 }
 0x2ff   : > { %v1869_v34 = vadd.f32 %v1868_v57, %v1615_v26  ;;  %v2262_v41 = vadd.f32 %v4264_v5, %v2226_v33  ;;  %v1618_v29 = vpop.f32.mrf.mxu0 }
 0x301   : > { %v2294_v46 = vmax.f32 %v2262_v41, 0.0 }
 0x303   : > { %2958 = vmatmul.msk.bf16.gmra.mxu2 %vm1545_vm5, %v3136_v27 }
 0x304   : > { %v2154_v59 = vpop.f32.mrf.mxu3 }
 0x305   : > { %v2227_v49 = vadd.f32 %v2154_v59, %v1869_v34  ;;  %v3139_v59 = vld [vmem:[#allocation2 + $0x88] sm:$0xff] }
 0x306   : > { %v1871_v48 = vpop.f32.mrf.mxu2  ;;  %v1625_v52 = vpop.f32.mrf.mxu1 }
 0x307   : > { %v2263_v45 = vadd.f32 %v4264_v5, %v2227_v49  ;;  %v1872_v0 = vadd.f32 %v1871_v48, %v1618_v29  ;;  %v1620_v11 = vpop.f32.mrf.mxu0 }
 0x309   : > { %v2295_v35 = vmax.f32 %v2263_v45, 0.0  ;;  %3062 = vmatmul.msk.bf16.gmra.mxu3 %vm1545_vm5, %v3168_v60 }
 0x30b   : > { %v2324_v6 = vpack.c.bf16 %v2295_v35, %v2294_v46  ;;  %v3171_v46 = vld [vmem:[#allocation2 + $0x90] sm:$0xff] }
 0x30c   : > { %v2157_v10 = vpop.f32.mrf.mxu3 }
 0x30d   : > { %3077 = vmatmul.msk.bf16.gmra.mxu1 %vm1092_vm3, %v2324_v6  ;;  %v2228_v37 = vadd.f32 %v2157_v10, %v1872_v0 }
 0x30e   : > { %v1873_v12 = vpop.f32.mrf.mxu2  ;;  %v1628_v22 = vpop.f32.mrf.mxu1 }
 0x30f   : > { %v1874_v40 = vadd.f32 %v1873_v12, %v1620_v11  ;;  %v2264_v31 = vadd.f32 %v4264_v5, %v2228_v37  ;;  %v3140_v11 = vld [vmem:[#allocation2 + $0x90] sm:$0xff] }
 0x311   : > { %v2296_v14 = vmax.f32 %v2264_v31, 0.0 }
 0x313   : > { %2959 = vmatmul.msk.bf16.gmra.mxu2 %vm1545_vm5, %v3137_v4 }
 0x314   : > { %v2159_v28 = vpop.f32.mrf.mxu3 }
 0x315   : > { %v2229_v3 = vadd.f32 %v2159_v28, %v1874_v40 }
 0x316   : > { %v1876_v8 = vpop.f32.mrf.mxu2  ;;  %v1630_v21 = vpop.f32.mrf.mxu1 }
 0x317   : > { %v2265_v39 = vadd.f32 %v4264_v5, %v2229_v3  ;;  %v1877_v56 = vadd.f32 %v1876_v8, %v1623_v9 }
 0x319   : > { %v2297_v19 = vmax.f32 %v2265_v39, 0.0  ;;  %3063 = vmatmul.msk.bf16.gmra.mxu3 %vm1545_vm5, %v3169_v2 }
 0x31b   : > { %v2325_v18 = vpack.c.bf16 %v2297_v19, %v2296_v14  ;;  %v3172_v14 = vld [vmem:[#allocation2 + $0x98] sm:$0xff] }
 0x31c   : > { %v2162_v23 = vpop.f32.mrf.mxu3 }
 0x31d   : > { %3078 = vmatmul.msk.bf16.gmra.mxu1 %vm1092_vm3, %v2325_v18  ;;  %v2230_v17 = vadd.f32 %v2162_v23, %v1877_v56 }
 0x31e   : > { %v1878_v24 = vpop.f32.mrf.mxu2  ;;  %v1633_v34 = vpop.f32.mrf.mxu1 }
 0x31f   : > { %v1879_v62 = vadd.f32 %v1878_v24, %v1625_v52  ;;  %v2266_v55 = vadd.f32 %v4264_v5, %v2230_v17 }
 0x321   : > { %v2298_v15 = vmax.f32 %v2266_v55, 0.0 }
 0x323   : > { %2960 = vmatmul.msk.bf16.gmra.mxu2 %vm1545_vm5, %v3138_v25 }
 0x324   : > { %v2164_v63 = vpop.f32.mrf.mxu3 }
 0x325   : > { %v2231_v43 = vadd.f32 %v2164_v63, %v1879_v62 }
 0x326   : > { %v1881_v47 = vpop.f32.mrf.mxu2  ;;  %v1635_v10 = vpop.f32.mrf.mxu1 }
 0x327   : > { %v2267_v44 = vadd.f32 %v4264_v5, %v2231_v43  ;;  %v1882_v33 = vadd.f32 %v1881_v47, %v1628_v22 }
 0x329   : > { %v2299_v57 = vmax.f32 %v2267_v44, 0.0  ;;  %3064 = vmatmul.msk.bf16.gmra.mxu3 %vm1545_vm5, %v3170_v58 }
 0x32b   : > { %v2326_v26 = vpack.c.bf16 %v2299_v57, %v2298_v15 }
 0x32c   : > { %v2167_v30 = vpop.f32.mrf.mxu3 }
 0x32d   : > { %3079 = vmatmul.msk.bf16.gmra.mxu1 %vm1092_vm3, %v2326_v26  ;;  %v2232_v41 = vadd.f32 %v2167_v30, %v1882_v33 }
 0x32e   : > { %v1883_v27 = vpop.f32.mrf.mxu2  ;;  %v1638_v28 = vpop.f32.mrf.mxu1 }
 0x32f   : > { %v1884_v48 = vadd.f32 %v1883_v27, %v1630_v21  ;;  %v2268_v45 = vadd.f32 %v4264_v5, %v2232_v41 }
 0x331   : > { %v2300_v35 = vmax.f32 %v2268_v45, 0.0 }
 0x333   : > { %2961 = vmatmul.msk.bf16.gmra.mxu2 %vm1545_vm5, %v3139_v59 }
 0x334   : > { %v2169_v49 = vpop.f32.mrf.mxu3 }
 0x335   : > { %v2233_v29 = vadd.f32 %v2169_v49, %v1884_v48 }
 0x336   : > { %v1886_v60 = vpop.f32.mrf.mxu2  ;;  %v1640_v56 = vpop.f32.mrf.mxu1 }
 0x337   : > { %v2269_v9 = vadd.f32 %v4264_v5, %v2233_v29  ;;  %v1887_v37 = vadd.f32 %v1886_v60, %v1633_v34  ;;  %v4309_v29 = vld [vmem:[%s4487_s6] ss:$0 sm:$0xff] }
 0x339   : > { %v2301_v6 = vmax.f32 %v2269_v9, 0.0  ;;  %3065 = vmatmul.msk.bf16.gmra.mxu3 %vm1545_vm5, %v3171_v46 }
 0x33b   : > { %v2327_v12 = vpack.c.bf16 %v2301_v6, %v2300_v35  ;;  %v2495_v6 = vld [vmem:[%s3488_s16] sm:$0xff] }
 0x33c   : > { %v2172_v0 = vpop.f32.mrf.mxu3 }
 0x33d   : > { %3080 = vmatmul.msk.bf16.gmra.mxu1 %vm1092_vm3, %v2327_v12  ;;  %v2234_v52 = vadd.f32 %v2172_v0, %v1887_v37 }
 0x33e   : > { %v1888_v4 = vpop.f32.mrf.mxu2  ;;  %v1643_v44 = vpop.f32.mrf.mxu1 }
 0x33f   : > { %v1889_v40 = vadd.f32 %v1888_v4, %v1635_v10  ;;  %v2270_v8 = vadd.f32 %v4264_v5, %v2234_v52 }
 0x341   : > { %v2302_v19 = vmax.f32 %v2270_v8, 0.0 }
 0x343   : > { %2962 = vmatmul.msk.bf16.gmra.mxu2 %vm1545_vm5, %v3140_v11 }
 0x344   : > { %v2174_v31 = vpop.f32.mrf.mxu3 }
 0x345   : > { %v2235_v39 = vadd.f32 %v2174_v31, %v1889_v40  ;;  %v2496_v31 = vld [vmem:[%s3488_s16 + $0x8] sm:$0xff] }
 0x346   : > { %v1891_v3 = vpop.f32.mrf.mxu2  ;;  %v1645_v34 = vpop.f32.mrf.mxu1 }
 0x347   : > { %v2271_v2 = vadd.f32 %v4264_v5, %v2235_v39  ;;  %v1892_v25 = vadd.f32 %v1891_v3, %v1638_v28 }
 0x349   : > { %v2303_v18 = vmax.f32 %v2271_v2, 0.0  ;;  %3066 = vmatmul.msk.bf16.gmra.mxu3 %vm1545_vm5, %v3172_v14 }
 0x34b   : > { %v2328_v22 = vpack.c.bf16 %v2303_v18, %v2302_v19 }
 0x34c   : > { %v2177_v23 = vpop.f32.mrf.mxu3 }
 0x34d   : > { %3081 = vmatmul.msk.bf16.gmra.mxu1 %vm1092_vm3, %v2328_v22  ;;  %v2236_v17 = vadd.f32 %v2177_v23, %v1892_v25  ;;  %v2497_v25 = vld [vmem:[%s3488_s16 + $0x10] sm:$0xff] }
 0x34e   : > { %v1893_v24 = vpop.f32.mrf.mxu2 }
 0x34f   : > { %v1894_v62 = vadd.f32 %v1893_v24, %v1640_v56  ;;  %v2272_v55 = vadd.f32 %v4264_v5, %v2236_v17 }
 0x351   : > { %v2304_v58 = vmax.f32 %v2272_v55, 0.0 }
 0x354   : > { %v2179_v63 = vpop.f32.mrf.mxu3 }
 0x355   : > { %v2237_v43 = vadd.f32 %v2179_v63, %v1894_v62 }
 0x356   : > { %v1896_v47 = vpop.f32.mrf.mxu2 }
 0x357   : > { %v2273_v21 = vadd.f32 %v4264_v5, %v2237_v43  ;;  %v1897_v27 = vadd.f32 %v1896_v47, %v1643_v44 }
 0x359   : > { %v2305_v15 = vmax.f32 %v2273_v21, 0.0 }
 0x35b   : > { %v2329_v57 = vpack.c.bf16 %v2305_v15, %v2304_v58  ;;  %v2498_v58 = vld [vmem:[%s3488_s16 + $0x18] sm:$0xff] }
 0x35c   : > { %v2182_v26 = vpop.f32.mrf.mxu3 }
 0x35d   : > { %3082 = vmatmul.msk.bf16.gmra.mxu1 %vm1092_vm3, %v2329_v57  ;;  %v2238_v33 = vadd.f32 %v2182_v26, %v1897_v27 }
 0x35e   : > { %v1898_v30 = vpop.f32.mrf.mxu2 }
 0x35f   : > { %v1899_v59 = vadd.f32 %v1898_v30, %v1645_v34  ;;  %v2274_v48 = vadd.f32 %v4264_v5, %v2238_v33 }
 0x361   : > { %v2306_v9 = vmax.f32 %v2274_v48, 0.0 }
 0x364   : > { %v2184_v41 = vpop.f32.mrf.mxu3 }
 0x365   : > { %v2239_v45 = vadd.f32 %v2184_v41, %v1899_v59 }
 0x366   : > { %v1901_v49 = vpop.f32.mrf.mxu2 }
 0x367   : > { %v2275_v60 = vadd.f32 %v4264_v5, %v2239_v45  ;;  %v1902_v11 = vadd.f32 %v1901_v49, %v4158_v51  ;;  %v2499_v45 = vld [vmem:[%s3488_s16 + $0x20] sm:$0xff] }
 0x369   : > { %v2307_v46 = vmax.f32 %v2275_v60, 0.0 }
 0x36a   : > { %v2415_v35 = vpop.f32.mrf.mxu1 }
 0x36b   : > { %v2330_v10 = vpack.c.bf16 %v2307_v46, %v2306_v9  ;;  %v2416_v12 = vadd.f32 %v4309_v29, %v2415_v35 }
 0x36c   : > { %v2187_v0 = vpop.f32.mrf.mxu3 }
 0x36d   : > { %v2527_v4 = vadd.f32 %v2495_v6, %v2416_v12  ;;  %3083 = vmatmul.msk.bf16.gmra.mxu1 %vm1092_vm3, %v2330_v10  ;;  %v2240_v40 = vadd.f32 %v2187_v0, %v1902_v11 }
 0x36e   : > { %v1903_v37 = vpop.f32.mrf.mxu2 }
 0x36f   : > { %v2559_v52 = vmax.f32 %v2527_v4, 0.0  ;;  %v1904_v8 = vadd.f32 %v1903_v37, %v4172_v20  ;;  %v2276_v2 = vadd.f32 %v4264_v5, %v2240_v40  ;;  %v2500_v4 = vld [vmem:[%s3488_s16 + $0x28] sm:$0xff] }
 0x371   : > { %2591 = vst [vmem:[%s4317_s15] sm:$0xff] %v2559_v52  ;;  %v2308_v23 = vmax.f32 %v2276_v2, 0.0 }
 0x372   : > { %v2417_v28 = vpop.f32.mrf.mxu1 }
 0x373   : > { %v2418_v3 = vadd.f32 %v4309_v29, %v2417_v28 }
 0x374   : > { %v2189_v39 = vpop.f32.mrf.mxu3 }
 0x375   : > { %v2528_v14 = vadd.f32 %v2496_v31, %v2418_v3  ;;  %v2241_v19 = vadd.f32 %v2189_v39, %v1904_v8 }
 0x376   : > { %v1906_v51 = vpop.f32.mrf.mxu2 }
 0x377   : > { %v2560_v18 = vmax.f32 %v2528_v14, 0.0  ;;  %v2277_v22 = vadd.f32 %v4264_v5, %v2241_v19  ;;  %v1907_v47 = vadd.f32 %v1906_v51, %v4195_v36  ;;  %v2501_v51 = vld [vmem:[%s3488_s16 + $0x30] sm:$0xff] }
 0x379   : > { %2592 = vst [vmem:[%s4317_s15 + $0x8] sm:$0xff] %v2560_v18  ;;  %v2309_v24 = vmax.f32 %v2277_v22, 0.0 }
 0x37a   : > { %v2420_v56 = vpop.f32.mrf.mxu1 }
 0x37b   : > { %v2331_v17 = vpack.c.bf16 %v2309_v24, %v2308_v23  ;;  %v2421_v20 = vadd.f32 %v4309_v29, %v2420_v56 }
 0x37c   : > { %v2192_v62 = vpop.f32.mrf.mxu3 }
 0x37d   : > { %v2529_v63 = vadd.f32 %v2497_v25, %v2421_v20  ;;  %3084 = vmatmul.msk.bf16.gmra.mxu1 %vm1092_vm3, %v2331_v17  ;;  %v2242_v21 = vadd.f32 %v2192_v62, %v1907_v47  ;;  %v2502_v20 = vld [vmem:[%s3488_s16 + $0x38] sm:$0xff] }
 0x37e   : > { %v1908_v55 = vpop.f32.mrf.mxu2 }
 0x37f   : > { %v2561_v43 = vmax.f32 %v2529_v63, 0.0  ;;  %v1909_v15 = vadd.f32 %v1908_v55, %v4208_v13  ;;  %v2278_v30 = vadd.f32 %v4264_v5, %v2242_v21 }
 0x381   : > { %2593 = vst [vmem:[%s4317_s15 + $0x10] sm:$0xff] %v2561_v43  ;;  %v2310_v41 = vmax.f32 %v2278_v30, 0.0  ;;  %v2503_v30 = vld [vmem:[%s3488_s16 + $0x40] sm:$0xff] }
 0x382   : > { %v2422_v44 = vpop.f32.mrf.mxu1 }
 0x383   : > { %v2423_v57 = vadd.f32 %v4309_v29, %v2422_v44 }
 0x384   : > { %v2194_v26 = vpop.f32.mrf.mxu3 }
 0x385   : > { %v2530_v27 = vadd.f32 %v2498_v58, %v2423_v57  ;;  %v2243_v34 = vadd.f32 %v2194_v26, %v1909_v15 }
 0x386   : > { %v1911_v33 = vpop.f32.mrf.mxu2 }
 0x387   : > { %v2562_v59 = vmax.f32 %v2530_v27, 0.0  ;;  %v2279_v36 = vadd.f32 %v4264_v5, %v2243_v34  ;;  %v1912_v6 = vadd.f32 %v1911_v33, %v4221_v1 }
 0x389   : > { %2594 = vst [vmem:[%s4317_s15 + $0x18] sm:$0xff] %v2562_v59  ;;  %v2311_v48 = vmax.f32 %v2279_v36, 0.0 }
 0x38a   : > { %v2425_v49 = vpop.f32.mrf.mxu1 }
 0x38b   : > { %v2332_v60 = vpack.c.bf16 %v2311_v48, %v2310_v41  ;;  %v2426_v13 = vadd.f32 %v4309_v29, %v2425_v49 }
 0x38c   : > { %v2197_v9 = vpop.f32.mrf.mxu3 }
 0x38d   : > { %v2531_v46 = vadd.f32 %v2499_v45, %v2426_v13  ;;  %3085 = vmatmul.msk.bf16.gmra.mxu1 %vm1092_vm3, %v2332_v60  ;;  %v2244_v12 = vadd.f32 %v2197_v9, %v1912_v6  ;;  %v2504_v45 = vld [vmem:[%s3488_s16 + $0x48] sm:$0xff] }
 0x38e   : > { %v1913_v35 = vpop.f32.mrf.mxu2 }
 0x38f   : > { %v2563_v10 = vmax.f32 %v2531_v46, 0.0  ;;  %v1914_v37 = vadd.f32 %v1913_v35, %v4234_v32  ;;  %v2280_v40 = vadd.f32 %v4264_v5, %v2244_v12 }
 0x391   : > { %2595 = vst [vmem:[%s4317_s15 + $0x20] sm:$0xff] %v2563_v10  ;;  %v2312_v39 = vmax.f32 %v2280_v40, 0.0 }
 0x392   : > { %v2427_v0 = vpop.f32.mrf.mxu1 }
 0x393   : > { %v2428_v11 = vadd.f32 %v4309_v29, %v2427_v0 }
 0x394   : > { %v2199_v52 = vpop.f32.mrf.mxu3 }
 0x395   : > { %v2532_v28 = vadd.f32 %v2500_v4, %v2428_v11  ;;  %v2245_v8 = vadd.f32 %v2199_v52, %v1914_v37  ;;  %v2505_v11 = vld [vmem:[%s3488_s16 + $0x50] sm:$0xff] }
 0x396   : > { %v1916_v31 = vpop.f32.mrf.mxu2 }
 0x397   : > { %v2564_v3 = vmax.f32 %v2532_v28, 0.0  ;;  %v2281_v1 = vadd.f32 %v4264_v5, %v2245_v8  ;;  %v1917_v24 = vadd.f32 %v1916_v31, %v4237_v38 }
 0x399   : > { %2596 = vst [vmem:[%s4317_s15 + $0x28] sm:$0xff] %v2564_v3  ;;  %v2313_v2 = vmax.f32 %v2281_v1, 0.0 }
 0x39a   : > { %v2430_v14 = vpop.f32.mrf.mxu1 }
 0x39b   : > { %v2333_v19 = vpack.c.bf16 %v2313_v2, %v2312_v39  ;;  %v2431_v32 = vadd.f32 %v4309_v29, %v2430_v14  ;;  %v2506_v2 = vld [vmem:[%s3488_s16 + $0x58] sm:$0xff] }
 0x39c   : > { %v2202_v18 = vpop.f32.mrf.mxu3 }
 0x39d   : > { %v2533_v22 = vadd.f32 %v2501_v51, %v2431_v32  ;;  %3086 = vmatmul.msk.bf16.gmra.mxu1 %vm1092_vm3, %v2333_v19  ;;  %v2246_v25 = vadd.f32 %v2202_v18, %v1917_v24 }
 0x39e   : > { %v1918_v23 = vpop.f32.mrf.mxu2 }
 0x39f   : > { %v2565_v56 = vmax.f32 %v2533_v22, 0.0  ;;  %v1919_v62 = vadd.f32 %v1918_v23, %v4242_v42  ;;  %v2282_v47 = vadd.f32 %v4264_v5, %v2246_v25 }
 0x3a1   : > { %2597 = vst [vmem:[%s4317_s15 + $0x30] sm:$0xff] %v2565_v56  ;;  %v2314_v15 = vmax.f32 %v2282_v47, 0.0 }
 0x3a2   : > { %v2432_v17 = vpop.f32.mrf.mxu1 }
 0x3a3   : > { %v2433_v63 = vadd.f32 %v4309_v29, %v2432_v17 }
 0x3a4   : > { %v2204_v55 = vpop.f32.mrf.mxu3 }
 0x3a5   : > { %v2534_v43 = vadd.f32 %v2502_v20, %v2433_v63  ;;  %v2247_v44 = vadd.f32 %v2204_v55, %v1919_v62  ;;  %v2507_v20 = vld [vmem:[%s3488_s16 + $0x60] sm:$0xff] }
 0x3a6   : > { %v1921_v21 = vpop.f32.mrf.mxu2 }
 0x3a7   : > { %v2566_v58 = vmax.f32 %v2534_v43, 0.0  ;;  %v2283_v38 = vadd.f32 %v4264_v5, %v2247_v44  ;;  %v1922_v36 = vadd.f32 %v1921_v21, %v4248_v61 }
 0x3a9   : > { %2598 = vst [vmem:[%s4317_s15 + $0x38] sm:$0xff] %v2566_v58  ;;  %v2315_v57 = vmax.f32 %v2283_v38, 0.0  ;;  %v2508_v38 = vld [vmem:[%s3488_s16 + $0x68] sm:$0xff] }
 0x3aa   : > { %v2435_v26 = vpop.f32.mrf.mxu1 }
 0x3ab   : > { %v2334_v27 = vpack.c.bf16 %v2315_v57, %v2314_v15  ;;  %v2436_v42 = vadd.f32 %v4309_v29, %v2435_v26 }
 0x3ac   : > { %v2207_v33 = vpop.f32.mrf.mxu3 }
 0x3ad   : > { %v2535_v34 = vadd.f32 %v2503_v30, %v2436_v42  ;;  %3087 = vmatmul.msk.bf16.gmra.mxu1 %vm1092_vm3, %v2334_v27  ;;  %v2248_v48 = vadd.f32 %v2207_v33, %v1922_v36 }
 0x3ae   : > { %v1923_v59 = vpop.f32.mrf.mxu2 }
 0x3af   : > { %v2567_v41 = vmax.f32 %v2535_v34, 0.0  ;;  %v1924_v60 = vadd.f32 %v1923_v59, %v4253_v53  ;;  %v2284_v46 = vadd.f32 %v4264_v5, %v2248_v48 }
 0x3b1   : > { %2599 = vst [vmem:[%s4317_s15 + $0x40] sm:$0xff] %v2567_v41  ;;  %v2316_v0 = vmax.f32 %v2284_v46, 0.0  ;;  %v2509_v41 = vld [vmem:[%s3488_s16 + $0x70] sm:$0xff] }
 0x3b2   : > { %v2437_v49 = vpop.f32.mrf.mxu1 }
 0x3b3   : > { %v2438_v13 = vadd.f32 %v4309_v29, %v2437_v49 }
 0x3b4   : > { %v2209_v9 = vpop.f32.mrf.mxu3 }
 0x3b5   : > { %v2536_v35 = vadd.f32 %v2504_v45, %v2438_v13  ;;  %v2249_v10 = vadd.f32 %v2209_v9, %v1924_v60  ;;  %v2510_v13 = vld [vmem:[%s3488_s16 + $0x78] sm:$0xff] }
 0x3b6   : > { %v1926_v6 = vpop.f32.mrf.mxu2 }
 0x3b7   : > { %v2568_v12 = vmax.f32 %v2536_v35, 0.0  ;;  %v2285_v61 = vadd.f32 %v4264_v5, %v2249_v10  ;;  %v1927_v8 = vadd.f32 %v1926_v6, %v4244_v16  ;;  %v2511_v6 = vld [vmem:[%s3488_s16 + $0x80] sm:$0xff] }
 0x3b9   : > { %2600 = vst [vmem:[%s4317_s15 + $0x48] sm:$0xff] %v2568_v12  ;;  %v2317_v4 = vmax.f32 %v2285_v61, 0.0 }
 0x3ba   : > { %v2440_v37 = vpop.f32.mrf.mxu1 }
 0x3bb   : > { %v2335_v52 = vpack.c.bf16 %v2317_v4, %v2316_v0  ;;  %v2441_v53 = vadd.f32 %v4309_v29, %v2440_v37  ;;  %v2512_v4 = vld [vmem:[%s3488_s16 + $0x88] sm:$0xff] }
 0x3bc   : > { %v2212_v40 = vpop.f32.mrf.mxu3 }
 0x3bd   : > { %v2537_v28 = vadd.f32 %v2505_v11, %v2441_v53  ;;  %3088 = vmatmul.msk.bf16.gmra.mxu1 %vm1092_vm3, %v2335_v52  ;;  %v2250_v1 = vadd.f32 %v2212_v40, %v1927_v8  ;;  %v2513_v40 = vld [vmem:[%s3488_s16 + $0x90] sm:$0xff] }
 0x3be   : > { %v1928_v31 = vpop.f32.mrf.mxu2 }
 0x3bf   : > { %v2569_v3 = vmax.f32 %v2537_v28, 0.0  ;;  %v1929_v14 = vadd.f32 %v1928_v31, %v4250_v50  ;;  %v2286_v32 = vadd.f32 %v4264_v5, %v2250_v1  ;;  %v2514_v1 = vld [vmem:[%s3488_s16 + $0x98] sm:$0xff] }
 0x3c1   : > { %2601 = vst [vmem:[%s4317_s15 + $0x50] sm:$0xff] %v2569_v3  ;;  %v2318_v56 = vmax.f32 %v2286_v32, 0.0 }
 0x3c2   : > { %v2442_v39 = vpop.f32.mrf.mxu1 }
 0x3c3   : > { %v2443_v51 = vadd.f32 %v4309_v29, %v2442_v39 }
 0x3c4   : > { %v2214_v19 = vpop.f32.mrf.mxu3 }
 0x3c5   : > { %v2538_v18 = vadd.f32 %v2506_v2, %v2443_v51  ;;  %v2251_v22 = vadd.f32 %v2214_v19, %v1929_v14  ;;  %v2515_v19 = vld [vmem:[%s3488_s16 + $0xa0] sm:$0xff] }
 0x3c6   : > { %v1931_v23 = vpop.f32.mrf.mxu2 }
 0x3c7   : > { %v2570_v24 = vmax.f32 %v2538_v18, 0.0  ;;  %v2287_v16 = vadd.f32 %v4264_v5, %v2251_v22  ;;  %v1932_v47 = vadd.f32 %v1931_v23, %v4255_v54 }
 0x3c9   : > { %2602 = vst [vmem:[%s4317_s15 + $0x58] sm:$0xff] %v2570_v24  ;;  %v2319_v25 = vmax.f32 %v2287_v16, 0.0  ;;  %v2516_v24 = vld [vmem:[%s3488_s16 + $0xa8] sm:$0xff] }
 0x3ca   : > { %v2445_v17 = vpop.f32.mrf.mxu1 }
 0x3cb   : > { %v2336_v62 = vpack.c.bf16 %v2319_v25, %v2318_v56  ;;  %v2446_v50 = vadd.f32 %v4309_v29, %v2445_v17 }
 0x3cc   : > { %v2217_v63 = vpop.f32.mrf.mxu3 }
 0x3cd   : > { %v2539_v55 = vadd.f32 %v2507_v20, %v2446_v50  ;;  %3089 = vmatmul.msk.bf16.gmra.mxu1 %vm1092_vm3, %v2336_v62  ;;  %v2252_v44 = vadd.f32 %v2217_v63, %v1932_v47  ;;  %v2517_v20 = vld [vmem:[%s3488_s16 + $0xb0] sm:$0xff]  ;;  %v2518_v47 = vld [vmem:[%s3488_s16 + $0xb8] sm:$0xff] }
 0x3ce   : > { %v1933_v21 = vpop.f32.mrf.mxu2 }
 0x3cf   : > { %v2571_v43 = vmax.f32 %v2539_v55, 0.0  ;;  %v1934_v15 = vadd.f32 %v1933_v21, %v4258_v7  ;;  %v2288_v30 = vadd.f32 %v4264_v5, %v2252_v44 }
 0x3d1   : > { %2603 = vst [vmem:[%s4317_s15 + $0x60] sm:$0xff] %v2571_v43  ;;  %v2320_v34 = vmax.f32 %v2288_v30, 0.0 }
 0x3d2   : > { %v2447_v58 = vpop.f32.mrf.mxu1 }
 0x3d3   : > { %v2448_v57 = vadd.f32 %v4309_v29, %v2447_v58 }
 0x3d4   : > { %v2219_v26 = vpop.f32.mrf.mxu3 }
 0x3d5   : > { %v2540_v27 = vadd.f32 %v2508_v38, %v2448_v57  ;;  %v2253_v42 = vadd.f32 %v2219_v26, %v1934_v15  ;;  %v2519_v38 = vld [vmem:[%s3488_s16 + $0xc0] sm:$0xff] }
 0x3d7   : > { %v2572_v54 = vmax.f32 %v2540_v27, 0.0  ;;  %v2289_v33 = vadd.f32 %v4264_v5, %v2253_v42  ;;  %v2520_v27 = vld [vmem:[%s3488_s16 + $0xc8] sm:$0xff] }
 0x3d9   : > { %2604 = vst [vmem:[%s4317_s15 + $0x68] sm:$0xff] %v2572_v54  ;;  %v2321_v59 = vmax.f32 %v2289_v33, 0.0 }
 0x3da   : > { %v2450_v36 = vpop.f32.mrf.mxu1 }
 0x3db   : > { %v2337_v7 = vpack.c.bf16 %v2321_v59, %v2320_v34  ;;  %v2451_v48 = vadd.f32 %v4309_v29, %v2450_v36  ;;  %v2521_v59 = vld [vmem:[%s3488_s16 + $0xd0] sm:$0xff] }
 0x3dd   : > { %v2541_v49 = vadd.f32 %v2509_v41, %v2451_v48  ;;  %3090 = vmatmul.msk.bf16.gmra.mxu1 %vm1092_vm3, %v2337_v7 }
 0x3df   : > { %v2573_v45 = vmax.f32 %v2541_v49, 0.0  ;;  %v2522_v49 = vld [vmem:[%s3488_s16 + $0xd8] sm:$0xff] }
 0x3e1   : > { %2605 = vst [vmem:[%s4317_s15 + $0x70] sm:$0xff] %v2573_v45 }
 0x3e2   : > { %v2452_v60 = vpop.f32.mrf.mxu1 }
 0x3e3   : > { %v2453_v5 = vadd.f32 %v4309_v29, %v2452_v60 }
 0x3e5   : > { %v2542_v9 = vadd.f32 %v2510_v13, %v2453_v5 }
 0x3e7   : > { %v2574_v46 = vmax.f32 %v2542_v9, 0.0  ;;  %v2523_v9 = vld [vmem:[%s3488_s16 + $0xe0] sm:$0xff] }
 0x3e9   : > { %2606 = vst [vmem:[%s4317_s15 + $0x78] sm:$0xff] %v2574_v46 }
 0x3ea   : > { %v2455_v35 = vpop.f32.mrf.mxu1 }
 0x3eb   : > { %v2456_v10 = vadd.f32 %v4309_v29, %v2455_v35 }
 0x3ed   : > { %v2543_v12 = vadd.f32 %v2511_v6, %v2456_v10 }
 0x3ef   : > { %v2575_v61 = vmax.f32 %v2543_v12, 0.0  ;;  %v2524_v12 = vld [vmem:[%s3488_s16 + $0xe8] sm:$0xff] }
 0x3f1   : > { %2607 = vst [vmem:[%s4317_s15 + $0x80] sm:$0xff] %v2575_v61 }
 0x3f2   : > { %v2457_v0 = vpop.f32.mrf.mxu1 }
 0x3f3   : > { %v2458_v37 = vadd.f32 %v4309_v29, %v2457_v0 }
 0x3f5   : > { %v2544_v11 = vadd.f32 %v2512_v4, %v2458_v37 }
 0x3f7   : > { %v2576_v52 = vmax.f32 %v2544_v11, 0.0  ;;  %v2525_v11 = vld [vmem:[%s3488_s16 + $0xf0] sm:$0xff] }
 0x3f9   : > { %2608 = vst [vmem:[%s4317_s15 + $0x88] sm:$0xff] %v2576_v52 }
 0x3fa   : > { %v2460_v53 = vpop.f32.mrf.mxu1 }
 0x3fb   : > { %v2461_v28 = vadd.f32 %v4309_v29, %v2460_v53 }
 0x3fd   : > { %v2545_v31 = vadd.f32 %v2513_v40, %v2461_v28 }
 0x3ff   : > { %v2577_v8 = vmax.f32 %v2545_v31, 0.0  ;;  %v2526_v31 = vld [vmem:[%s3488_s16 + $0xf8] sm:$0xff]  ;;  %s3301_s16 = scalar_lea.hbm %s4488_s7, 512 }
 0x400   : > { %p3303_p1 = scmp.lt.s32.totalorder %s3301_s16, %s3297_s8 }
 0x401   : > { %2609 = vst [vmem:[%s4317_s15 + $0x90] sm:$0xff] %v2577_v8 }
 0x402   : > { %v2462_v3 = vpop.f32.mrf.mxu1  ;;  %p3304_p3 = por %p3303_p1, %p3302_p0 }
 0x403   : > { %v2463_v39 = vadd.f32 %v4309_v29, %v2462_v3 }
 0x404   : > { %p3305_p4 = pnand %p3304_p3, %p3300_p13 }
 0x405   : > { %v2546_v2 = vadd.f32 %v2514_v1, %v2463_v39 }
 0x407   : > { %v2578_v14 = vmax.f32 %v2546_v2, 0.0 }
 0x409   : > { %2610 = vst [vmem:[%s4317_s15 + $0x98] sm:$0xff] %v2578_v14 }
 0x40a   : > { %v2465_v51 = vpop.f32.mrf.mxu1 }
 0x40b   : > { %v2466_v32 = vadd.f32 %v4309_v29, %v2465_v51 }
 0x40d   : > { %v2547_v18 = vadd.f32 %v2515_v19, %v2466_v32 }
 0x40f   : > { %v2579_v22 = vmax.f32 %v2547_v18, 0.0 }
 0x411   : > { %2611 = vst [vmem:[%s4317_s15 + $0xa0] sm:$0xff] %v2579_v22 }
 0x412   : > { %v2467_v23 = vpop.f32.mrf.mxu1 }
 0x413   : > { %v2468_v16 = vadd.f32 %v4309_v29, %v2467_v23 }
 0x415   : > { %v2548_v56 = vadd.f32 %v2516_v24, %v2468_v16 }
 0x417   : > { %v2580_v25 = vmax.f32 %v2548_v56, 0.0 }
 0x419   : > { %2612 = vst [vmem:[%s4317_s15 + $0xa8] sm:$0xff] %v2580_v25 }
 0x41a   : > { %v2470_v17 = vpop.f32.mrf.mxu1 }
 0x41b   : > { %v2471_v62 = vadd.f32 %v4309_v29, %v2470_v17 }
 0x41d   : > { %v2549_v50 = vadd.f32 %v2517_v20, %v2471_v62 }
 0x41f   : > { %v2581_v63 = vmax.f32 %v2549_v50, 0.0 }
 0x421   : > { %2613 = vst [vmem:[%s4317_s15 + $0xb0] sm:$0xff] %v2581_v63 }
 0x422   : > { %v2472_v55 = vpop.f32.mrf.mxu1 }
 0x423   : > { %v2473_v43 = vadd.f32 %v4309_v29, %v2472_v55 }
 0x425   : > { %v2550_v21 = vadd.f32 %v2518_v47, %v2473_v43 }
 0x427   : > { %v2582_v44 = vmax.f32 %v2550_v21, 0.0 }
 0x429   : > { %2614 = vst [vmem:[%s4317_s15 + $0xb8] sm:$0xff] %v2582_v44 }
 0x42a   : > { %v2475_v58 = vpop.f32.mrf.mxu1 }
 0x42b   : > { %v2476_v15 = vadd.f32 %v4309_v29, %v2475_v58 }
 0x42d   : > { %v2551_v57 = vadd.f32 %v2519_v38, %v2476_v15 }
 0x42f   : > { %v2583_v26 = vmax.f32 %v2551_v57, 0.0 }
 0x431   : > { %2615 = vst [vmem:[%s4317_s15 + $0xc0] sm:$0xff] %v2583_v26 }
 0x432   : > { %v2477_v30 = vpop.f32.mrf.mxu1 }
 0x433   : > { %v2478_v42 = vadd.f32 %v4309_v29, %v2477_v30 }
 0x435   : > { %v2552_v54 = vadd.f32 %v2520_v27, %v2478_v42 }
 0x437   : > { %v2584_v33 = vmax.f32 %v2552_v54, 0.0 }
 0x439   : > { %2616 = vst [vmem:[%s4317_s15 + $0xc8] sm:$0xff] %v2584_v33 }
 0x43a   : > { %v2480_v34 = vpop.f32.mrf.mxu1 }
 0x43b   : > { %v2481_v36 = vadd.f32 %v4309_v29, %v2480_v34 }
 0x43d   : > { %v2553_v41 = vadd.f32 %v2521_v59, %v2481_v36 }
 0x43f   : > { %v2585_v7 = vmax.f32 %v2553_v41, 0.0 }
 0x441   : > { %2617 = vst [vmem:[%s4317_s15 + $0xd0] sm:$0xff] %v2585_v7 }
 0x442   : > { %v2482_v48 = vpop.f32.mrf.mxu1 }
 0x443   : > { %v2483_v45 = vadd.f32 %v4309_v29, %v2482_v48 }
 0x445   : > { %v2554_v60 = vadd.f32 %v2522_v49, %v2483_v45 }
 0x447   : > { %v2586_v13 = vmax.f32 %v2554_v60, 0.0 }
 0x449   : > { %2618 = vst [vmem:[%s4317_s15 + $0xd8] sm:$0xff] %v2586_v13 }
 0x44a   : > { %v2485_v5 = vpop.f32.mrf.mxu1 }
 0x44b   : > { %v2486_v46 = vadd.f32 %v4309_v29, %v2485_v5 }
 0x44d   : > { %v2555_v35 = vadd.f32 %v2523_v9, %v2486_v46 }
 0x44f   : > { %v2587_v6 = vmax.f32 %v2555_v35, 0.0 }
 0x451   : > { %2619 = vst [vmem:[%s4317_s15 + $0xe0] sm:$0xff] %v2587_v6 }
 0x452   : > { %v2487_v10 = vpop.f32.mrf.mxu1 }
 0x453   : > { %v2488_v61 = vadd.f32 %v4309_v29, %v2487_v10 }
 0x455   : > { %v2556_v0 = vadd.f32 %v2524_v12, %v2488_v61 }
 0x457   : > { %v2588_v4 = vmax.f32 %v2556_v0, 0.0 }
 0x459   : > { %2620 = vst [vmem:[%s4317_s15 + $0xe8] sm:$0xff] %v2588_v4 }
 0x45a   : > { %v2490_v37 = vpop.f32.mrf.mxu1 }
 0x45b   : > { %v2491_v52 = vadd.f32 %v4309_v29, %v2490_v37 }
 0x45d   : > { %v2557_v53 = vadd.f32 %v2525_v11, %v2491_v52 }
 0x45f   : > { %v2589_v40 = vmax.f32 %v2557_v53, 0.0 }
 0x461   : > { %2621 = vst [vmem:[%s4317_s15 + $0xf0] sm:$0xff] %v2589_v40 }
 0x462   : > { %v2492_v28 = vpop.f32.mrf.mxu1 }
 0x463   : > { %v2493_v8 = vadd.f32 %v4309_v29, %v2492_v28 }
 0x465   : > { %v2558_v3 = vadd.f32 %v2526_v31, %v2493_v8 }
 0x467   : > { %v2590_v1 = vmax.f32 %v2558_v3, 0.0 }
 0x469   : > { %2622 = vst [vmem:[%s4317_s15 + $0xf8] sm:$0xff] %v2590_v1 }
 0x46a   : > { %3308 = shalt.err (!%p3305_p4)
}
 0x46b   : > { %s3354_s22 = smov 128   ;;  %s3355_s15 = smov 8  }
 0x46c   : > { %3197 = dma.vmem_to_hbm [thread:$0]  (%p3446_p11), %s2638_s19, 4096, %s2640_s23, %s2624_s29, %s3354_s22, %s3354_s22, %s3355_s15  }
 0x46d PF: > { %s2654_s10 = sand.u32 1, %s3335_s24   ;;  %p4495_p7 = scmp.ge.s32.totalorder %s3347_s27, 2 }
 0x46e   : > { %s2655_s20 = scalar_lea.sflag [#allocation5], %s2654_s10 }
 0x46f   : > { %p3204_p5 = pnand %p4495_p7, %p3450_p12 }
 0x471   : > { %p3205_p8 = pneg %p3204_p5 }
 0x473   : > { %3330 = dma.done.wait (%p3205_p8), %s2655_s20, 4096  }
 0x474   : > { %3332 = vsyncadd (%p3205_p8), %s2655_s20, 4294963200  ;;  %s4496_s9 = sld [smem:[#allocation9_spill]]  ;;  %p20_p10 = scmp.ge.s32.totalorder %s3421_s30, 4  }
 0x475   : > { %s4497_s24 = smov %s3339_s25  ;;  %s4498_s25 = smov %s3343_s26 }
 0x476   : > { %s4500_s27 = smov %s3421_s30  ;;  %22 = sbr.rel (!%p20_p10) target bundleno = 5 (0x5), region = 96 }
 0x47a   : > { %s4499_s26 = smov %s4496_s9 }
 0x47b   :  { %2661 = vsyncpa [#allocation4], 1 }
 0x47c   :  { %2663 = vsyncpa [#allocation4 + $0x1], 1 }
 0x47d   :  { %2664 = vsyncpa [#allocation5], 1 }
 0x47e   :  { %2666 = vsyncpa [#allocation5 + $0x1], 1 }

</bundles_post_ra>
